<compile_context>
chip_gen: v6e
topology: v6e:2x2x1
jax: 0.10.0
libtpu: 0.0.40
codegen_flags: <defaults>
</compile_context>

<pallas_src>
import functools

import jax
import jax.numpy as jnp
from jax.experimental import pallas as pl
from jax.experimental.pallas import tpu as pltpu


# ----------------------------------------------------------------------------
# Shared helper: "same" 1-D conv (k=3, stride=1) as a single fused MXU matmul.
# ----------------------------------------------------------------------------
def _conv3_same(x3, w, b):
    """out[l] = W @ [x[l-1]; x[l]; x[l+1]] + b  (zero halo at the edges).

    x3: (NB, L, Cin) f32 value
    w:  (3*Cin, Cout) value; its dtype picks the MXU input precision (bf16/f32)
    b:  (1, Cout) f32 value or None
    returns (NB*L, Cout) f32
    """
    NB, L, Cin = x3.shape
    zero = jnp.zeros((NB, 1, Cin), x3.dtype)
    left = jnp.concatenate([zero, x3[:, : L - 1, :]], axis=1)   # row l holds x[l-1]
    right = jnp.concatenate([x3[:, 1:, :], zero], axis=1)       # row l holds x[l+1]
    xcat = jnp.concatenate([left, x3, right], axis=-1)          # (NB, L, 3*Cin)
    out = jnp.dot(xcat.reshape(NB * L, 3 * Cin).astype(w.dtype), w,
                  preferred_element_type=jnp.float32)
    return out if b is None else out + b


# ----------------------------------------------------------------------------
# Stage 1: conv1 + ReLU, conv2 (bias dropped), BatchNorm partial statistics.
# ----------------------------------------------------------------------------
def _stage1_kernel(x_ref, w1_ref, b1_ref, w2_ref, h2_ref, sum_ref, sq_ref):
    NB, _, L = x_ref.shape
    # NCL -> NLC in-register (saves a full XLA transpose pass over HBM).
    x_nlc = jnp.transpose(x_ref[...], (0, 2, 1))                          # (NB, L, 160)
    h1 = jnp.maximum(_conv3_same(x_nlc, w1_ref[...], b1_ref[...]), 0.0)   # (M, 64) f32
    # conv2 bias omitted: training-mode BatchNorm mean subtraction cancels it.
    h2 = _conv3_same(h1.reshape(NB, L, 64), w2_ref[...], None)            # (M, 128) f32
    # Per-tile BN partials in f32 -> no second full-HBM read of h2 for stats.
    sum_ref[...] = jnp.sum(h2, axis=0).reshape(1, 1, 128)
    sq_ref[...] = jnp.sum(h2 * h2, axis=0).reshape(1, 1, 128)
    h2_ref[...] = h2.reshape(NB, L, 128).astype(h2_ref.dtype)


# ----------------------------------------------------------------------------
# Stage 2: BN affine (precomputed scale/shift) + ReLU, conv3 + ReLU,
#          MaxPool1d(3, stride=2) with argmax indices — all in-register.
# ----------------------------------------------------------------------------
def _stage2_kernel(h2_ref, scale_ref, shift_ref, w3_ref, b3_ref, y_ref, idx_ref,
                   *, ncl_out):
    NB, L, C2 = h2_ref.shape
    C3 = b3_ref.shape[-1]
    L_out = (L - 3) // 2 + 1

    h2 = h2_ref[...].astype(jnp.float32).reshape(NB * L, C2)
    h2 = jnp.maximum(h2 * scale_ref[...] + shift_ref[...], 0.0)           # BN + ReLU
    h3 = jnp.maximum(_conv3_same(h2.reshape(NB, L, C2), w3_ref[...], b3_ref[...]), 0.0)
    h3 = h3.reshape(NB, L, C3)

    # MaxPool window p covers positions {2p, 2p+1, 2p+2}.  Extract the three
    # taps via lane-preserving reshapes of the in-register h3 (no scratch
    # store, no strided ref loads).
    Lp = 2 * L_out
    a = h3[:, :Lp, :].reshape(NB, L_out, 2, C3)
    e0, e1 = a[:, :, 0, :], a[:, :, 1, :]
    e2 = h3[:, 1:Lp + 1, :].reshape(NB, L_out, 2, C3)[:, :, 1, :]
    base = 2 * jax.lax.broadcasted_iota(jnp.int32, (1, L_out, 1), 1)       # 2p
    take1 = e1 > e0                               # strict '>': first index wins ties
    m01 = jnp.where(take1, e1, e0)
    i01 = jnp.where(take1, base + 1, base)
    take2 = e2 > m01
    y = jnp.where(take2, e2, m01)
    idx = jnp.where(take2, base + 2, i01).astype(idx_ref.dtype)

    if ncl_out:
        # NLC -> NCL in-register so no extra XLA transpose pass is needed.
        y = jnp.transpose(y, (0, 2, 1))
        idx = jnp.transpose(idx, (0, 2, 1))
    y_ref[...] = y.astype(y_ref.dtype)
    idx_ref[...] = idx


# ----------------------------------------------------------------------------
# Wrapper: generation-aware VMEM sizing, BN stats from partials, pallas grids.
# ----------------------------------------------------------------------------
def _vmem_capacity_bytes():
    try:
        cap = getattr(pltpu.get_tpu_info(), "vmem_capacity_bytes", None)
        if cap:
            return int(cap)
    except Exception:
        pass
    return 64 << 20   # conservative fallback: v7x per-TensorCore VMEM


def _compiler_params(step_bytes):
    cap = _vmem_capacity_bytes()
    want = 3 * step_bytes + (12 << 20)        # double-buffered blocks + live values
    limit = int(min(max(want, 24 << 20), cap * 3 // 4))   # 48 MiB on v7x, 96 MiB on v5e/v6e
    return pltpu.CompilerParams(dimension_semantics=("parallel",),
                                vmem_limit_bytes=limit)


def _default_block_n(N, L, target_rows=512, max_rows=4096):
    """Smallest batch tile giving >= target_rows MXU rows, preferring >= 4 grid
    steps (double-buffering + v7x megacore sharding); rows capped for VMEM."""
    divs = [d for d in range(1, N + 1) if N % d == 0 and d * L <= max_rows]
    if not divs:
        return 1
    for d in divs:
        if d * L >= target_rows and N // d >= 4:
            return d
    for d in divs:
        if d * L >= target_rows:
            return d
    return divs[-1]


@functools.partial(jax.jit, static_argnames=("block_n", "compute_dtype", "ncl_out"))
def encoder_forward(x_ncl, params, *, block_n=None, compute_dtype=jnp.bfloat16,
                    ncl_out=True):
    """x_ncl: (N, 160, L) f32.

    Returns (y, idx): (N, 256, L_out) f32 / int32 when ncl_out=True (PyTorch NCL
    convention); set ncl_out=False to keep the lane-dense (N, L_out, 256) layout
    and skip the in-kernel output transpose.  compute_dtype sets the MXU input
    precision and the dtype of the h2 HBM intermediate (bf16 default; float32
    for exact parity with the f32 reference).
    """
    (w1, b1, w2, _b2, gamma, beta, w3, b3) = params
    N, c_in, L = x_ncl.shape
    assert c_in == 160 and L >= 3
    NB = block_n if block_n is not None else _default_block_n(N, L)
    assert N % NB == 0
    G = N // NB
    L_out = (L - 3) // 2 + 1
    cdt = jnp.dtype(compute_dtype)
    esz = cdt.itemsize

    fuse = lambda w: w.reshape(-1, w.shape[-1]).astype(cdt)   # (3,Cin,Cout)->(3Cin,Cout)
    row = lambda v: v.reshape(1, -1).astype(jnp.float32)
    w1f, w2f, w3f = fuse(w1), fuse(w2), fuse(w3)

    # ---- Stage 1: conv1+ReLU, conv2 (no bias), BN partial stats -------------
    s1_bytes = (4 * NB * 160 * L + esz * NB * L * 128
                + esz * (w1f.size + w2f.size) + 4 * (64 + 2 * 128))
    h2, sums, sqs = pl.pallas_call(
        _stage1_kernel,
        out_shape=(jax.ShapeDtypeStruct((N, L, 128), cdt),
                   jax.ShapeDtypeStruct((G, 1, 128), jnp.float32),
                   jax.ShapeDtypeStruct((G, 1, 128), jnp.float32)),
        grid=(G,),
        in_specs=[
            pl.BlockSpec((NB, 160, L), lambda i: (i, 0, 0)),
            pl.BlockSpec((3 * 160, 64), lambda i: (0, 0)),
            pl.BlockSpec((1, 64), lambda i: (0, 0)),
            pl.BlockSpec((3 * 64, 128), lambda i: (0, 0)),
        ],
        out_specs=(pl.BlockSpec((NB, L, 128), lambda i: (i, 0, 0)),
                   pl.BlockSpec((1, 1, 128), lambda i: (i, 0, 0)),
                   pl.BlockSpec((1, 1, 128), lambda i: (i, 0, 0))),
        compiler_params=_compiler_params(s1_bytes),
    )(x_ncl, w1f, row(b1), w2f)

    # ---- BatchNorm1d training-mode statistics from the tiny per-tile partials
    count = jnp.float32(N * L)
    mean = jnp.sum(sums, axis=(0, 1)) / count                              # (128,)
    var = jnp.maximum(jnp.sum(sqs, axis=(0, 1)) / count - mean * mean, 0.0)
    scale = gamma.reshape(-1).astype(jnp.float32) * jax.lax.rsqrt(var + 1e-5)
    shift = beta.reshape(-1).astype(jnp.float32) - mean * scale

    # ---- Stage 2: BN+ReLU, conv3+ReLU, maxpool(3, stride=2) -----------------
    out_sh = (N, 256, L_out) if ncl_out else (N, L_out, 256)
    out_blk = (NB, 256, L_out) if ncl_out else (NB, L_out, 256)
    s2_bytes = (esz * NB * L * 128 + esz * w3f.size + 4 * (2 * 128 + 256)
                + 2 * 4 * NB * 256 * L_out + 4 * NB * L * 256)
    y, idx = pl.pallas_call(
        functools.partial(_stage2_kernel, ncl_out=ncl_out),
        out_shape=(jax.ShapeDtypeStruct(out_sh, jnp.float32),
                   jax.ShapeDtypeStruct(out_sh, jnp.int32)),
        grid=(G,),
        in_specs=[
            pl.BlockSpec((NB, L, 128), lambda i: (i, 0, 0)),
            pl.BlockSpec((1, 128), lambda i: (0, 0)),
            pl.BlockSpec((1, 128), lambda i: (0, 0)),
            pl.BlockSpec((3 * 128, 256), lambda i: (0, 0)),
            pl.BlockSpec((1, 256), lambda i: (0, 0)),
        ],
        out_specs=(pl.BlockSpec(out_blk, lambda i: (i, 0, 0)),
                   pl.BlockSpec(out_blk, lambda i: (i, 0, 0))),
        compiler_params=_compiler_params(s2_bytes),
    )(h2, scale.reshape(1, 128), shift.reshape(1, 128), w3f, row(b3))

    return y, idx


# ----------------------------------------------------------------------------
# Deterministic parameter init (PyTorch-default-style uniform)
# ----------------------------------------------------------------------------
def init_params(key):
    def conv_init(key, cin, cout, k=3):
        bound = 1.0 / (cin * k) ** 0.5
        kw, kb = jax.random.split(key)
        w = jax.random.uniform(kw, (k, cin, cout), jnp.float32, -bound, bound)
        b = jax.random.uniform(kb, (cout,), jnp.float32, -bound, bound)
        return w, b

    k1, k2, k3 = jax.random.split(key, 3)
    w1, b1 = conv_init(k1, 160, 64)
    w2, b2 = conv_init(k2, 64, 128)
    w3, b3 = conv_init(k3, 128, 256)
    gamma = jnp.ones((128,), jnp.float32)
    beta = jnp.zeros((128,), jnp.float32)
    return (w1, b1, w2, b2, gamma, beta, w3, b3)


# ----------------------------------------------------------------------------
# Pure-JAX reference (faithful port of the PyTorch forward, for verification)
# ----------------------------------------------------------------------------
def reference_forward(x_ncl, params):
    (w1, b1, w2, b2, gamma, beta, w3, b3) = params

    def conv(x, w_kio, b):
        w = jnp.transpose(w_kio, (2, 1, 0))                    # (Cout, Cin, K)
        y = jax.lax.conv_general_dilated(
            x, w, window_strides=(1,), padding=((1, 1),),
            dimension_numbers=('NCH', 'OIH', 'NCH'))
        return y + b.reshape(1, -1, 1)

    h = jax.nn.relu(conv(x_ncl, w1, b1))
    h = conv(h, w2, b2)
    mean = jnp.mean(h, axis=(0, 2), keepdims=True)
    var = jnp.mean((h - mean) ** 2, axis=(0, 2), keepdims=True)
    h = (h - mean) * jax.lax.rsqrt(var + 1e-5)
    h = h * gamma.reshape(1, -1, 1) + beta.reshape(1, -1, 1)
    h = jax.nn.relu(h)
    h = jax.nn.relu(conv(h, w3, b3))

    L = h.shape[-1]
    L_out = (L - 3) // 2 + 1
    win = jnp.stack([h[:, :, 2 * p:2 * p + 3] for p in range(L_out)], axis=2)
    y = jnp.max(win, axis=-1)
    idx = jnp.argmax(win, axis=-1).astype(jnp.int32) + 2 * jnp.arange(L_out, dtype=jnp.int32)
    return y, idx


if __name__ == "__main__":
    key = jax.random.PRNGKey(0)
    k_param, k_x = jax.random.split(key)

    N, C_IN, L = 8, 160, 64                                    # small smoke-test shapes
    x = jax.random.normal(k_x, (N, C_IN, L), jnp.float32)
    params = init_params(k_param)

    # Production path: bf16 MXU inputs + bf16 h2 intermediate (f32 accumulation).
    y_bf, idx_bf = encoder_forward(x, params, block_n=2)       # grid=(4,)
    jax.block_until_ready((y_bf, idx_bf))

    # Exact-parity path (f32 everywhere), checked strictly against the reference.
    y, idx = encoder_forward(x, params, block_n=2, compute_dtype=jnp.float32)
    jax.block_until_ready((y, idx))

    y_ref, idx_ref = reference_forward(x, params)
    L_out = (L - 3) // 2 + 1
    assert y.shape == (N, 256, L_out) and idx.shape == (N, 256, L_out)
    assert jnp.allclose(y, y_ref, rtol=1e-4, atol=1e-4), "f32 maxpooled values mismatch"
    # Indices can legitimately differ only at (near-)ties; require near-perfect match.
    f32_match = float(jnp.mean((idx == idx_ref).astype(jnp.float32)))
    assert f32_match >= 0.999, f"f32 maxpool indices mismatch ({f32_match})"

    # bf16 path: values within bf16 rounding; indices may flip only on near-ties.
    assert jnp.allclose(y_bf, y_ref, rtol=1e-1, atol=1e-1), "bf16 values out of tolerance"
    assert float(jnp.mean((idx_bf == idx_ref).astype(jnp.float32))) > 0.9

    # TODO(synk): PyTorch returns int64 pooling indices; int32 is emitted here.
    print("KERNEL_OK")
</pallas_src>

<mosaic_0001>
module attributes {stable_mosaic.version = 11 : i64} {
  func.func @_stage1_kernel(%arg0: i32, %arg1: memref<2x160x64xf32, #tpu.memory_space<vmem>>, %arg2: memref<480x64xbf16, #tpu.memory_space<vmem>>, %arg3: memref<1x64xf32, #tpu.memory_space<vmem>>, %arg4: memref<192x128xbf16, #tpu.memory_space<vmem>>, %arg5: memref<2x64x128xbf16, #tpu.memory_space<vmem>>, %arg6: memref<1x1x128xf32, #tpu.memory_space<vmem>>, %arg7: memref<1x1x128xf32, #tpu.memory_space<vmem>>) attributes {dimension_semantics = [#tpu.dimension_semantics<parallel>], iteration_bounds = array<i64: 4>, scalar_prefetch = 0 : i64, scratch_operands = 0 : i64, tpu.core_type = #tpu.core_type<tc>, window_params = [{transform_indices = @transform_0, window_bounds = array<i64: 2, 160, 64>}, {pipeline_mode = #tpu.pipeline_mode<synchronous>, transform_indices = @transform_1, window_bounds = array<i64: 480, 64>}, {pipeline_mode = #tpu.pipeline_mode<synchronous>, transform_indices = @transform_2, window_bounds = array<i64: 1, 64>}, {pipeline_mode = #tpu.pipeline_mode<synchronous>, transform_indices = @transform_3, window_bounds = array<i64: 192, 128>}, {transform_indices = @transform_4, window_bounds = array<i64: 2, 64, 128>}, {transform_indices = @transform_5, window_bounds = array<i64: 1, 1, 128>}, {transform_indices = @transform_6, window_bounds = array<i64: 1, 1, 128>}]} {
    %c0 = arith.constant 0 : index
    %c0_0 = arith.constant 0 : index
    %c0_1 = arith.constant 0 : index
    %0 = vector.load %arg1[%c0, %c0_0, %c0_1] : memref<2x160x64xf32, #tpu.memory_space<vmem>>, vector<2x160x64xf32>
    %1 = tpu.transpose %0, [0, 2, 1] : vector<2x160x64xf32> -> vector<2x64x160xf32>
    %c0_2 = arith.constant 0 : index
    %c0_3 = arith.constant 0 : index
    %2 = vector.load %arg2[%c0_2, %c0_3] : memref<480x64xbf16, #tpu.memory_space<vmem>>, vector<480x64xbf16>
    %c0_4 = arith.constant 0 : index
    %c0_5 = arith.constant 0 : index
    %3 = vector.load %arg3[%c0_4, %c0_5] : memref<1x64xf32, #tpu.memory_space<vmem>>, vector<1x64xf32>
    %cst = arith.constant 0.000000e+00 : f32
    %4 = vector.broadcast %cst : f32 to vector<2x1x160xf32>
    %5 = vector.extract_strided_slice %1 {offsets = [0, 0, 0], sizes = [2, 63, 160], strides = [1, 1, 1]} : vector<2x64x160xf32> to vector<2x63x160xf32>
    %6 = tpu.concatenate %4, %5 in 1 : vector<2x1x160xf32>, vector<2x63x160xf32> -> vector<2x64x160xf32>
    %7 = vector.extract_strided_slice %1 {offsets = [0, 1, 0], sizes = [2, 63, 160], strides = [1, 1, 1]} : vector<2x64x160xf32> to vector<2x63x160xf32>
    %8 = tpu.concatenate %7, %4 in 1 : vector<2x63x160xf32>, vector<2x1x160xf32> -> vector<2x64x160xf32>
    %9 = tpu.concatenate %6, %1, %8 in 2 : vector<2x64x160xf32>, vector<2x64x160xf32>, vector<2x64x160xf32> -> vector<2x64x480xf32>
    %10 = vector.shape_cast %9 : vector<2x64x480xf32> to vector<128x480xf32>
    %11 = arith.truncf %10 : vector<128x480xf32> to vector<128x480xbf16>
    %cst_6 = arith.constant dense<0.000000e+00> : vector<128x64xf32>
    %12 = tpu.matmul %11, %2, %cst_6 {dimension_numbers = #tpu.dot_dimension_numbers<[1], [0], [0], [1], [0, 0, 1, 1], [], []>} : vector<128x480xbf16>, vector<480x64xbf16>, vector<128x64xf32> -> vector<128x64xf32>
    %13 = vector.broadcast %3 : vector<1x64xf32> to vector<128x64xf32>
    %14 = arith.addf %12, %13 : vector<128x64xf32>
    %cst_7 = arith.constant 0.000000e+00 : f32
    %15 = vector.broadcast %cst_7 : f32 to vector<128x64xf32>
    %16 = arith.maximumf %14, %15 : vector<128x64xf32>
    %17 = vector.shape_cast %16 : vector<128x64xf32> to vector<2x64x64xf32>
    %c0_8 = arith.constant 0 : index
    %c0_9 = arith.constant 0 : index
    %18 = vector.load %arg4[%c0_8, %c0_9] : memref<192x128xbf16, #tpu.memory_space<vmem>>, vector<192x128xbf16>
    %cst_10 = arith.constant 0.000000e+00 : f32
    %19 = vector.broadcast %cst_10 : f32 to vector<2x1x64xf32>
    %20 = vector.extract_strided_slice %17 {offsets = [0, 0, 0], sizes = [2, 63, 64], strides = [1, 1, 1]} : vector<2x64x64xf32> to vector<2x63x64xf32>
    %21 = tpu.concatenate %19, %20 in 1 : vector<2x1x64xf32>, vector<2x63x64xf32> -> vector<2x64x64xf32>
    %22 = vector.extract_strided_slice %17 {offsets = [0, 1, 0], sizes = [2, 63, 64], strides = [1, 1, 1]} : vector<2x64x64xf32> to vector<2x63x64xf32>
    %23 = tpu.concatenate %22, %19 in 1 : vector<2x63x64xf32>, vector<2x1x64xf32> -> vector<2x64x64xf32>
    %24 = tpu.concatenate %21, %17, %23 in 2 : vector<2x64x64xf32>, vector<2x64x64xf32>, vector<2x64x64xf32> -> vector<2x64x192xf32>
    %25 = vector.shape_cast %24 : vector<2x64x192xf32> to vector<128x192xf32>
    %26 = arith.truncf %25 : vector<128x192xf32> to vector<128x192xbf16>
    %cst_11 = arith.constant dense<0.000000e+00> : vector<128x128xf32>
    %27 = tpu.matmul %26, %18, %cst_11 {dimension_numbers = #tpu.dot_dimension_numbers<[1], [0], [0], [1], [0, 0, 1, 1], [], []>} : vector<128x192xbf16>, vector<192x128xbf16>, vector<128x128xf32> -> vector<128x128xf32>
    %cst_12 = arith.constant dense<0.000000e+00> : vector<128xf32>
    %28 = vector.multi_reduction <add>, %27, %cst_12 [0] : vector<128x128xf32> to vector<128xf32>
    %29 = vector.shape_cast %28 : vector<128xf32> to vector<1x1x128xf32>
    %c0_13 = arith.constant 0 : index
    %c0_14 = arith.constant 0 : index
    %c0_15 = arith.constant 0 : index
    %30 = vector.load %arg6[%c0_13, %c0_14, %c0_15] : memref<1x1x128xf32, #tpu.memory_space<vmem>>, vector<1x1x128xf32>
    tpu.vector_store %arg6[%c0_13, %c0_14, %c0_15], %29 {strides = array<i32>} : memref<1x1x128xf32, #tpu.memory_space<vmem>>, vector<1x1x128xf32>,
    %31 = arith.mulf %27, %27 : vector<128x128xf32>
    %cst_16 = arith.constant dense<0.000000e+00> : vector<128xf32>
    %32 = vector.multi_reduction <add>, %31, %cst_16 [0] : vector<128x128xf32> to vector<128xf32>
    %33 = vector.shape_cast %32 : vector<128xf32> to vector<1x1x128xf32>
    %c0_17 = arith.constant 0 : index
    %c0_18 = arith.constant 0 : index
    %c0_19 = arith.constant 0 : index
    %34 = vector.load %arg7[%c0_17, %c0_18, %c0_19] : memref<1x1x128xf32, #tpu.memory_space<vmem>>, vector<1x1x128xf32>
    tpu.vector_store %arg7[%c0_17, %c0_18, %c0_19], %33 {strides = array<i32>} : memref<1x1x128xf32, #tpu.memory_space<vmem>>, vector<1x1x128xf32>,
    %35 = vector.shape_cast %27 : vector<128x128xf32> to vector<2x64x128xf32>
    %36 = arith.truncf %35 : vector<2x64x128xf32> to vector<2x64x128xbf16>
    %c0_20 = arith.constant 0 : index
    %c0_21 = arith.constant 0 : index
    %c0_22 = arith.constant 0 : index
    %37 = vector.load %arg5[%c0_20, %c0_21, %c0_22] : memref<2x64x128xbf16, #tpu.memory_space<vmem>>, vector<2x64x128xbf16>
    tpu.vector_store %arg5[%c0_20, %c0_21, %c0_22], %36 {strides = array<i32>} : memref<2x64x128xbf16, #tpu.memory_space<vmem>>, vector<2x64x128xbf16>,
    return
  }
  func.func @transform_0(%arg0: i32) -> (i32, i32, i32) {
    %c0_i32 = arith.constant 0 : i32
    %c0_i32_0 = arith.constant 0 : i32
    %c0_i32_1 = arith.constant 0 : i32
    return %arg0, %c0_i32, %c0_i32_0 : i32, i32, i32
  }
  func.func @transform_1(%arg0: i32) -> (i32, i32) {
    %c0_i32 = arith.constant 0 : i32
    %c0_i32_0 = arith.constant 0 : i32
    %c0_i32_1 = arith.constant 0 : i32
    return %c0_i32, %c0_i32_0 : i32, i32
  }
  func.func @transform_2(%arg0: i32) -> (i32, i32) {
    %c0_i32 = arith.constant 0 : i32
    %c0_i32_0 = arith.constant 0 : i32
    %c0_i32_1 = arith.constant 0 : i32
    return %c0_i32, %c0_i32_0 : i32, i32
  }
  func.func @transform_3(%arg0: i32) -> (i32, i32) {
    %c0_i32 = arith.constant 0 : i32
    %c0_i32_0 = arith.constant 0 : i32
    %c0_i32_1 = arith.constant 0 : i32
    return %c0_i32, %c0_i32_0 : i32, i32
  }
  func.func @transform_4(%arg0: i32) -> (i32, i32, i32) {
    %c0_i32 = arith.constant 0 : i32
    %c0_i32_0 = arith.constant 0 : i32
    %c0_i32_1 = arith.constant 0 : i32
    return %arg0, %c0_i32, %c0_i32_0 : i32, i32, i32
  }
  func.func @transform_5(%arg0: i32) -> (i32, i32, i32) {
    %c0_i32 = arith.constant 0 : i32
    %c0_i32_0 = arith.constant 0 : i32
    %c0_i32_1 = arith.constant 0 : i32
    return %arg0, %c0_i32, %c0_i32_0 : i32, i32, i32
  }
  func.func @transform_6(%arg0: i32) -> (i32, i32, i32) {
    %c0_i32 = arith.constant 0 : i32
    %c0_i32_0 = arith.constant 0 : i32
    %c0_i32_1 = arith.constant 0 : i32
    return %arg0, %c0_i32, %c0_i32_0 : i32, i32, i32
  }
}

module attributes {stable_mosaic.version = 11 : i64} {
  func.func @_stage2_kernel(%arg0: i32, %arg1: memref<2x64x128xbf16, #tpu.memory_space<vmem>>, %arg2: memref<1x128xf32, #tpu.memory_space<vmem>>, %arg3: memref<1x128xf32, #tpu.memory_space<vmem>>, %arg4: memref<384x256xbf16, #tpu.memory_space<vmem>>, %arg5: memref<1x256xf32, #tpu.memory_space<vmem>>, %arg6: memref<2x256x31xf32, #tpu.memory_space<vmem>>, %arg7: memref<2x256x31xi32, #tpu.memory_space<vmem>>) attributes {dimension_semantics = [#tpu.dimension_semantics<parallel>], iteration_bounds = array<i64: 4>, scalar_prefetch = 0 : i64, scratch_operands = 0 : i64, tpu.core_type = #tpu.core_type<tc>, window_params = [{transform_indices = @transform_0, window_bounds = array<i64: 2, 64, 128>}, {pipeline_mode = #tpu.pipeline_mode<synchronous>, transform_indices = @transform_1, window_bounds = array<i64: 1, 128>}, {pipeline_mode = #tpu.pipeline_mode<synchronous>, transform_indices = @transform_2, window_bounds = array<i64: 1, 128>}, {pipeline_mode = #tpu.pipeline_mode<synchronous>, transform_indices = @transform_3, window_bounds = array<i64: 384, 256>}, {pipeline_mode = #tpu.pipeline_mode<synchronous>, transform_indices = @transform_4, window_bounds = array<i64: 1, 256>}, {transform_indices = @transform_5, window_bounds = array<i64: 2, 256, 31>}, {transform_indices = @transform_6, window_bounds = array<i64: 2, 256, 31>}]} {
    %c0 = arith.constant 0 : index
    %c0_0 = arith.constant 0 : index
    %c0_1 = arith.constant 0 : index
    %0 = vector.load %arg1[%c0, %c0_0, %c0_1] : memref<2x64x128xbf16, #tpu.memory_space<vmem>>, vector<2x64x128xbf16>
    %1 = arith.extf %0 : vector<2x64x128xbf16> to vector<2x64x128xf32>
    %2 = vector.shape_cast %1 : vector<2x64x128xf32> to vector<128x128xf32>
    %c0_2 = arith.constant 0 : index
    %c0_3 = arith.constant 0 : index
    %3 = vector.load %arg2[%c0_2, %c0_3] : memref<1x128xf32, #tpu.memory_space<vmem>>, vector<1x128xf32>
    %4 = vector.broadcast %3 : vector<1x128xf32> to vector<128x128xf32>
    %5 = arith.mulf %2, %4 : vector<128x128xf32>
    %c0_4 = arith.constant 0 : index
    %c0_5 = arith.constant 0 : index
    %6 = vector.load %arg3[%c0_4, %c0_5] : memref<1x128xf32, #tpu.memory_space<vmem>>, vector<1x128xf32>
    %7 = vector.broadcast %6 : vector<1x128xf32> to vector<128x128xf32>
    %8 = arith.addf %5, %7 : vector<128x128xf32>
    %cst = arith.constant 0.000000e+00 : f32
    %9 = vector.broadcast %cst : f32 to vector<128x128xf32>
    %10 = arith.maximumf %8, %9 : vector<128x128xf32>
    %11 = vector.shape_cast %10 : vector<128x128xf32> to vector<2x64x128xf32>
    %c0_6 = arith.constant 0 : index
    %c0_7 = arith.constant 0 : index
    %12 = vector.load %arg4[%c0_6, %c0_7] : memref<384x256xbf16, #tpu.memory_space<vmem>>, vector<384x256xbf16>
    %c0_8 = arith.constant 0 : index
    %c0_9 = arith.constant 0 : index
    %13 = vector.load %arg5[%c0_8, %c0_9] : memref<1x256xf32, #tpu.memory_space<vmem>>, vector<1x256xf32>
    %cst_10 = arith.constant 0.000000e+00 : f32
    %14 = vector.broadcast %cst_10 : f32 to vector<2x1x128xf32>
    %15 = vector.extract_strided_slice %11 {offsets = [0, 0, 0], sizes = [2, 63, 128], strides = [1, 1, 1]} : vector<2x64x128xf32> to vector<2x63x128xf32>
    %16 = tpu.concatenate %14, %15 in 1 : vector<2x1x128xf32>, vector<2x63x128xf32> -> vector<2x64x128xf32>
    %17 = vector.extract_strided_slice %11 {offsets = [0, 1, 0], sizes = [2, 63, 128], strides = [1, 1, 1]} : vector<2x64x128xf32> to vector<2x63x128xf32>
    %18 = tpu.concatenate %17, %14 in 1 : vector<2x63x128xf32>, vector<2x1x128xf32> -> vector<2x64x128xf32>
    %19 = tpu.concatenate %16, %11, %18 in 2 : vector<2x64x128xf32>, vector<2x64x128xf32>, vector<2x64x128xf32> -> vector<2x64x384xf32>
    %20 = vector.shape_cast %19 : vector<2x64x384xf32> to vector<128x384xf32>
    %21 = arith.truncf %20 : vector<128x384xf32> to vector<128x384xbf16>
    %cst_11 = arith.constant dense<0.000000e+00> : vector<128x256xf32>
    %22 = tpu.matmul %21, %12, %cst_11 {dimension_numbers = #tpu.dot_dimension_numbers<[1], [0], [0], [1], [0, 0, 1, 1], [], []>} : vector<128x384xbf16>, vector<384x256xbf16>, vector<128x256xf32> -> vector<128x256xf32>
    %23 = vector.broadcast %13 : vector<1x256xf32> to vector<128x256xf32>
    %24 = arith.addf %22, %23 : vector<128x256xf32>
    %cst_12 = arith.constant 0.000000e+00 : f32
    %25 = vector.broadcast %cst_12 : f32 to vector<128x256xf32>
    %26 = arith.maximumf %24, %25 : vector<128x256xf32>
    %27 = vector.shape_cast %26 : vector<128x256xf32> to vector<2x64x256xf32>
    %28 = vector.extract_strided_slice %27 {offsets = [0, 0, 0], sizes = [2, 62, 256], strides = [1, 1, 1]} : vector<2x64x256xf32> to vector<2x62x256xf32>
    %29 = vector.shape_cast %28 : vector<2x62x256xf32> to vector<2x31x2x256xf32>
    %30 = vector.extract_strided_slice %29 {offsets = [0, 0, 0, 0], sizes = [2, 31, 1, 256], strides = [1, 1, 1, 1]} : vector<2x31x2x256xf32> to vector<2x31x1x256xf32>
    %31 = vector.shape_cast %30 : vector<2x31x1x256xf32> to vector<2x31x256xf32>
    %32 = vector.extract_strided_slice %29 {offsets = [0, 0, 1, 0], sizes = [2, 31, 1, 256], strides = [1, 1, 1, 1]} : vector<2x31x2x256xf32> to vector<2x31x1x256xf32>
    %33 = vector.shape_cast %32 : vector<2x31x1x256xf32> to vector<2x31x256xf32>
    %34 = vector.extract_strided_slice %27 {offsets = [0, 1, 0], sizes = [2, 62, 256], strides = [1, 1, 1]} : vector<2x64x256xf32> to vector<2x62x256xf32>
    %35 = vector.shape_cast %34 : vector<2x62x256xf32> to vector<2x31x2x256xf32>
    %36 = vector.extract_strided_slice %35 {offsets = [0, 0, 1, 0], sizes = [2, 31, 1, 256], strides = [1, 1, 1, 1]} : vector<2x31x2x256xf32> to vector<2x31x1x256xf32>
    %37 = vector.shape_cast %36 : vector<2x31x1x256xf32> to vector<2x31x256xf32>
    %38 = tpu.iota {dimensions = array<i32: 1>} : vector<1x31x1xi32>
    %c2_i32 = arith.constant 2 : i32
    %39 = vector.broadcast %c2_i32 : i32 to vector<1x31x1xi32>
    %40 = arith.muli %39, %38 : vector<1x31x1xi32>
    %41 = arith.cmpf ogt, %33, %31 : vector<2x31x256xf32>
    %42 = arith.select %41, %33, %31 : vector<2x31x256xi1>, vector<2x31x256xf32>
    %c1_i32 = arith.constant 1 : i32
    %43 = vector.broadcast %c1_i32 : i32 to vector<1x31x1xi32>
    %44 = arith.addi %40, %43 : vector<1x31x1xi32>
    %45 = vector.shape_cast %44 : vector<1x31x1xi32> to vector<1x31x1xi32>
    %46 = vector.broadcast %45 : vector<1x31x1xi32> to vector<2x31x256xi32>
    %47 = vector.shape_cast %40 : vector<1x31x1xi32> to vector<1x31x1xi32>
    %48 = vector.broadcast %47 : vector<1x31x1xi32> to vector<2x31x256xi32>
    %49 = arith.select %41, %46, %48 : vector<2x31x256xi1>, vector<2x31x256xi32>
    %50 = arith.cmpf ogt, %37, %42 : vector<2x31x256xf32>
    %51 = arith.select %50, %37, %42 : vector<2x31x256xi1>, vector<2x31x256xf32>
    %c2_i32_13 = arith.constant 2 : i32
    %52 = vector.broadcast %c2_i32_13 : i32 to vector<1x31x1xi32>
    %53 = arith.addi %40, %52 : vector<1x31x1xi32>
    %54 = vector.shape_cast %53 : vector<1x31x1xi32> to vector<1x31x1xi32>
    %55 = vector.broadcast %54 : vector<1x31x1xi32> to vector<2x31x256xi32>
    %56 = arith.select %50, %55, %49 : vector<2x31x256xi1>, vector<2x31x256xi32>
    %57 = tpu.transpose %51, [0, 2, 1] : vector<2x31x256xf32> -> vector<2x256x31xf32>
    %58 = tpu.transpose %56, [0, 2, 1] : vector<2x31x256xi32> -> vector<2x256x31xi32>
    %c0_14 = arith.constant 0 : index
    %c0_15 = arith.constant 0 : index
    %c0_16 = arith.constant 0 : index
    %59 = vector.load %arg6[%c0_14, %c0_15, %c0_16] : memref<2x256x31xf32, #tpu.memory_space<vmem>>, vector<2x256x31xf32>
    tpu.vector_store %arg6[%c0_14, %c0_15, %c0_16], %57 {strides = array<i32>} : memref<2x256x31xf32, #tpu.memory_space<vmem>>, vector<2x256x31xf32>,
    %c0_17 = arith.constant 0 : index
    %c0_18 = arith.constant 0 : index
    %c0_19 = arith.constant 0 : index
    %60 = vector.load %arg7[%c0_17, %c0_18, %c0_19] : memref<2x256x31xi32, #tpu.memory_space<vmem>>, vector<2x256x31xi32>
    tpu.vector_store %arg7[%c0_17, %c0_18, %c0_19], %58 {strides = array<i32>} : memref<2x256x31xi32, #tpu.memory_space<vmem>>, vector<2x256x31xi32>,
    return
  }
  func.func @transform_0(%arg0: i32) -> (i32, i32, i32) {
    %c0_i32 = arith.constant 0 : i32
    %c0_i32_0 = arith.constant 0 : i32
    %c0_i32_1 = arith.constant 0 : i32
    return %arg0, %c0_i32, %c0_i32_0 : i32, i32, i32
  }
  func.func @transform_1(%arg0: i32) -> (i32, i32) {
    %c0_i32 = arith.constant 0 : i32
    %c0_i32_0 = arith.constant 0 : i32
    %c0_i32_1 = arith.constant 0 : i32
    return %c0_i32, %c0_i32_0 : i32, i32
  }
  func.func @transform_2(%arg0: i32) -> (i32, i32) {
    %c0_i32 = arith.constant 0 : i32
    %c0_i32_0 = arith.constant 0 : i32
    %c0_i32_1 = arith.constant 0 : i32
    return %c0_i32, %c0_i32_0 : i32, i32
  }
  func.func @transform_3(%arg0: i32) -> (i32, i32) {
    %c0_i32 = arith.constant 0 : i32
    %c0_i32_0 = arith.constant 0 : i32
    %c0_i32_1 = arith.constant 0 : i32
    return %c0_i32, %c0_i32_0 : i32, i32
  }
  func.func @transform_4(%arg0: i32) -> (i32, i32) {
    %c0_i32 = arith.constant 0 : i32
    %c0_i32_0 = arith.constant 0 : i32
    %c0_i32_1 = arith.constant 0 : i32
    return %c0_i32, %c0_i32_0 : i32, i32
  }
  func.func @transform_5(%arg0: i32) -> (i32, i32, i32) {
    %c0_i32 = arith.constant 0 : i32
    %c0_i32_0 = arith.constant 0 : i32
    %c0_i32_1 = arith.constant 0 : i32
    return %arg0, %c0_i32, %c0_i32_0 : i32, i32, i32
  }
  func.func @transform_6(%arg0: i32) -> (i32, i32, i32) {
    %c0_i32 = arith.constant 0 : i32
    %c0_i32_0 = arith.constant 0 : i32
    %c0_i32_1 = arith.constant 0 : i32
    return %arg0, %c0_i32, %c0_i32_0 : i32, i32, i32
  }
}

</mosaic_0001>

<bundles_post_ra>
// kernel: encoder_forward.2
= control target key start
LH: loop header
LB: loop body
LE: loop exit
PB: predicated region body
PF: predicated region fallthrough
CT: control target
= control target key end

     0   :  { %s2747_s21 = smov 0   ;;  %s3767_s0 = inlined_call_operand.vmem [shape: f32[8,160,64], index: 0, kind: input, shape index: {}]   ;;  %s3768_s1 = inlined_call_operand.vmem [shape: bf16[480,64], index: 1, kind: input, shape index: {}]   ;;  %s3769_s2 = inlined_call_operand.vmem [shape: f32[1,64], index: 2, kind: input, shape index: {}]   ;;  %s3770_s3 = inlined_call_operand.vmem [shape: bf16[192,128], index: 3, kind: input, shape index: {}]   ;;  %s3771_s4 = inlined_call_operand.vmem [shape: bf16[8,64,128], index: 4, kind: output, shape index: {0}]   ;;  %s3772_s5 = inlined_call_operand.vmem [shape: f32[4,1,128], index: 5, kind: output, shape index: {1}]   ;;  %s3773_s6 = inlined_call_operand.vmem [shape: f32[4,1,128], index: 6, kind: output, shape index: {2}]  }
   0x1 LB: > { %s2753_s22 = sadd.s32 4294967295, %s2706_s21   ;;  %p2081_p0 = scmp.ge.s32.totalorder %s2706_s21, 1  ;;  %s2706_s21 = sphi %s2747_s21, %s17_s21  }
   0x2   : > { %p219_p1 = scmp.lt.s32.totalorder %s2706_s21, 5 }
   0x4   : > { %p220_p2 = pnand %p2081_p0, %p219_p1 }
   0x5   : > { %s2082_s23 = sshll.u32 (!%p220_p2), %s2753_s22, 1  ;;  %s2709_s16 = smov (!%p220_p2), 32  }
   0x6   : > { %223 = sbr.rel (%p220_p2) target bundleno = 896 (0x380), region = 36  ;;  %p258_p3 = scmp.lt.s32.totalorder (!%p220_p2), %s2082_s23, 7 }
   0x7   : > { %s2710_s19 = smov (!%p220_p2), 64   ;;  %p271_p4 = scmp.lt.s32.totalorder (!%p220_p2), %s2753_s22, 3 }
   0xb   : > { %s3815_s23 = smov (!%p258_p3, %s2082_s23), 7  ;;  %v2658_v60 = vld [vmem:[%s3768_s1 + $0xb8] sm:$0xff]   ;;  %v3774_v62 = vmov 0   ;;  %vm636_vm0 = vcmask 1046528   ;;  %vm539_vm1 = vcmask 1040384   ;;  %vm769_vm2 = vcmask 261120  }
   0xc   : > { %s2324_s24 = smul.u32 160, %s3815_s23  ;;  %v2660_v61 = vld [vmem:[%s3768_s1 + $0x78] sm:$0xff]   ;;  %1307 = vmatprep.subr.bf16.mxu1 %v3774_v62  ;;  %vm2118_vm3 = vmneg %vm539_vm1  ;;  %vm2711_vm4 = vmmov 1   ;;  %vm886_vm6 = vcmask 523264   ;;  %vm1185_vm7 = vcmask 785408   ;;  %s3817_s22 = smov (!%p271_p4, %s2753_s22), 3 }
   0xd   : > { %v2661_v63 = vld [vmem:[%s3768_s1 + $0x38] sm:$0xff]   ;;  %1308 = vmatpush1.bf16.msra.mxu1 %v2658_v60  ;;  %2236 = vmatprep.subr.bf16.mxu0 %v2660_v61  ;;  %vm3356_vm5 = vmpackc.low %vm2711_vm4, %vm2118_vm3  ;;  %s273_s13 = scalar_lea.vmem %s3772_s5, %s3817_s22 }
   0xe   : > { %s2764_s27 = scalar_lea.vmem %s3767_s0, %s2324_s24  ;;  %1309 = vmatprep.subr.bf16.mxu1 %v3774_v62  ;;  %2237 = vmatpush3.bf16.msra.mxu0 %v2661_v63 }
   0xf   : > { %v294_v0 = vld [vmem:[%s2764_s27 + $0x80] sm:$0xff]  ;;  %v295_v5 = vld [vmem:[%s2764_s27 + $0x88] sm:$0xff]  ;;  %v296_v12 = vld [vmem:[%s2764_s27 + $0x90] sm:$0xff] }
  0x10   : > { %v314_v1 = vld [vmem:[%s2764_s27 + $0x120] sm:$0xff]  ;;  %v315_v6 = vld [vmem:[%s2764_s27 + $0x128] sm:$0xff]  ;;  %v316_v13 = vld [vmem:[%s2764_s27 + $0x130] sm:$0xff] }
  0x11   : > { %v278_v2 = vld [vmem:[%s2764_s27] sm:$0xff]  ;;  %v2338_v3 = vpack.i.bf16 %v314_v1, %v294_v0  ;;  %v279_v8 = vld [vmem:[%s2764_s27 + $0x8] sm:$0xff]  ;;  %v2340_v10 = vpack.i.bf16 %v315_v6, %v295_v5  ;;  %v280_v14 = vld [vmem:[%s2764_s27 + $0x10] sm:$0xff]  ;;  %v2342_v16 = vpack.i.bf16 %v316_v13, %v296_v12 }
  0x12   : > { %v298_v4 = vld [vmem:[%s2764_s27 + $0xa0] sm:$0xff]  ;;  %v299_v9 = vld [vmem:[%s2764_s27 + $0xa8] sm:$0xff]  ;;  %v300_v15 = vld [vmem:[%s2764_s27 + $0xb0] sm:$0xff] }
  0x13   : > { %v2386_v7 = vpack.i.bf16 %v298_v4, %v278_v2  ;;  %2339 = vxpose.xlu1.b32.start [1/4] (short) (narrow) %v2338_v3, 64  ;;  %v2388_v11 = vpack.i.bf16 %v299_v9, %v279_v8  ;;  %v2390_v17 = vpack.i.bf16 %v300_v15, %v280_v14  ;;  %v297_v18 = vld [vmem:[%s2764_s27 + $0x98] sm:$0xff]  ;;  %v282_v24 = vld [vmem:[%s2764_s27 + $0x20] sm:$0xff]  ;;  %v283_v26 = vld [vmem:[%s2764_s27 + $0x28] sm:$0xff] }
  0x14   : > { %v317_v19 = vld [vmem:[%s2764_s27 + $0x138] sm:$0xff]  ;;  %v302_v25 = vld [vmem:[%s2764_s27 + $0xc0] sm:$0xff]  ;;  %v303_v28 = vld [vmem:[%s2764_s27 + $0xc8] sm:$0xff] }
  0x15   : > { %2387 = vxpose.xlu0.b32.start [1/16] (narrow) %v2386_v7, 64  ;;  %v281_v20 = vld [vmem:[%s2764_s27 + $0x18] sm:$0xff]  ;;  %v2344_v22 = vpack.i.bf16 %v317_v19, %v297_v18  ;;  %v2394_v27 = vpack.i.bf16 %v302_v25, %v282_v24  ;;  %v284_v29 = vld [vmem:[%s2764_s27 + $0x30] sm:$0xff]  ;;  %v2396_v30 = vpack.i.bf16 %v303_v28, %v283_v26  ;;  %v286_v35 = vld [vmem:[%s2764_s27 + $0x40] sm:$0xff] }
  0x16   : > { %v301_v21 = vld [vmem:[%s2764_s27 + $0xb8] sm:$0xff]  ;;  %v304_v31 = vld [vmem:[%s2764_s27 + $0xd0] sm:$0xff]  ;;  %v306_v37 = vld [vmem:[%s2764_s27 + $0xe0] sm:$0xff] }
  0x17   : > { %2341 = vxpose.xlu1.b32.cont [2/4] (short) (narrow) %v2340_v10, 64  ;;  %v2392_v23 = vpack.i.bf16 %v301_v21, %v281_v20  ;;  %v285_v32 = vld [vmem:[%s2764_s27 + $0x38] sm:$0xff]  ;;  %v2398_v33 = vpack.i.bf16 %v304_v31, %v284_v29  ;;  %v287_v38 = vld [vmem:[%s2764_s27 + $0x48] sm:$0xff]  ;;  %v2402_v39 = vpack.i.bf16 %v306_v37, %v286_v35  ;;  %v288_v42 = vld [vmem:[%s2764_s27 + $0x50] sm:$0xff] }
  0x18   : > { %v305_v34 = vld [vmem:[%s2764_s27 + $0xd8] sm:$0xff]  ;;  %v307_v40 = vld [vmem:[%s2764_s27 + $0xe8] sm:$0xff]  ;;  %v308_v43 = vld [vmem:[%s2764_s27 + $0xf0] sm:$0xff] }
  0x19   : > { %2389 = vxpose.xlu0.b32.cont [2/16] (narrow) %v2388_v11, 64  ;;  %v2400_v36 = vpack.i.bf16 %v305_v34, %v285_v32  ;;  %v2404_v41 = vpack.i.bf16 %v307_v40, %v287_v38  ;;  %v2406_v44 = vpack.i.bf16 %v308_v43, %v288_v42  ;;  %v289_v45 = vld [vmem:[%s2764_s27 + $0x58] sm:$0xff]  ;;  %v290_v48 = vld [vmem:[%s2764_s27 + $0x60] sm:$0xff]  ;;  %v291_v51 = vld [vmem:[%s2764_s27 + $0x68] sm:$0xff] }
  0x1a   : > { %v309_v46 = vld [vmem:[%s2764_s27 + $0xf8] sm:$0xff]  ;;  %v310_v49 = vld [vmem:[%s2764_s27 + $0x100] sm:$0xff]  ;;  %v311_v52 = vld [vmem:[%s2764_s27 + $0x108] sm:$0xff] }
  0x1b   : > { %2343 = vxpose.xlu1.b32.cont [3/4] (short) (narrow) %v2342_v16, 64  ;;  %v2408_v47 = vpack.i.bf16 %v309_v46, %v289_v45  ;;  %v2410_v50 = vpack.i.bf16 %v310_v49, %v290_v48  ;;  %v2412_v53 = vpack.i.bf16 %v311_v52, %v291_v51  ;;  %v292_v54 = vld [vmem:[%s2764_s27 + $0x70] sm:$0xff]  ;;  %v293_v57 = vld [vmem:[%s2764_s27 + $0x78] sm:$0xff]  ;;  %v2666_v3 = vld [vmem:[%s3768_s1 + $0x68] sm:$0xff]  }
  0x1c   : > { %v312_v55 = vld [vmem:[%s2764_s27 + $0x110] sm:$0xff]  ;;  %v313_v58 = vld [vmem:[%s2764_s27 + $0x118] sm:$0xff]  ;;  %v2662_v4 = vld [vmem:[%s3768_s1 + $0xa8] sm:$0xff]  }
  0x1d   : > { %2391 = vxpose.xlu0.b32.cont [3/16] (narrow) %v2390_v17, 64  ;;  %v2414_v56 = vpack.i.bf16 %v312_v55, %v292_v54  ;;  %v2416_v59 = vpack.i.bf16 %v313_v58, %v293_v57  ;;  %v2663_v0 = vld [vmem:[%s3768_s1 + $0x70] sm:$0xff]   ;;  %v2667_v5 = vld [vmem:[%s3768_s1 + $0x28] sm:$0xff]   ;;  %v2669_v6 = vld [vmem:[%s3768_s1 + $0x60] sm:$0xff]  }
  0x1e   : > { %v2659_v1 = vld [vmem:[%s3768_s1 + $0xb0] sm:$0xff]   ;;  %2238 = vmatprep.subr.bf16.mxu0 %v2663_v0  ;;  %v2665_v7 = vld [vmem:[%s3768_s1 + $0xa0] sm:$0xff]   ;;  %v2672_v9 = vld [vmem:[%s3768_s1 + $0x58] sm:$0xff]  }
  0x1f   : > { %2345 = vxpose.xlu1.b32.end [4/4] (short) (narrow) %v2344_v22, 64  ;;  %v2664_v2 = vld [vmem:[%s3768_s1 + $0x30] sm:$0xff]   ;;  %1310 = vmatpush1.bf16.msra.mxu1 %v2659_v1  ;;  %v2670_v8 = vld [vmem:[%s3768_s1 + $0x20] sm:$0xff]   ;;  %v2668_v10 = vld [vmem:[%s3768_s1 + $0x98] sm:$0xff]  }
  0x20   : > { %1311 = vmatprep.subr.bf16.mxu1 %v3774_v62  ;;  %2239 = vmatpush3.bf16.msra.mxu0 %v2664_v2  ;;  %v2673_v11 = vld [vmem:[%s3768_s1 + $0x18] sm:$0xff]   ;;  %v2675_v12 = vld [vmem:[%s3768_s1 + $0x50] sm:$0xff]   ;;  %v2674_v15 = vld [vmem:[%s3768_s1 + $0x88] sm:$0xff]  }
  0x21   : > { %2393 = vxpose.xlu0.b32.cont [4/16] (narrow) %v2392_v23, 64  ;;  %2240 = vmatprep.subr.bf16.mxu0 %v2666_v3  ;;  %v2671_v13 = vld [vmem:[%s3768_s1 + $0x90] sm:$0xff]   ;;  %v2677_v16 = vld [vmem:[%s3768_s1 + $0x80] sm:$0xff]   ;;  %v2678_v17 = vld [vmem:[%s3768_s1 + $0x48] sm:$0xff]  }
  0x22   : > { %v2676_v14 = vld [vmem:[%s3768_s1 + $0x10] sm:$0xff]   ;;  %v2679_v20 = vld [vmem:[%s3768_s1 + $0x8] sm:$0xff]   ;;  %v2681_v22 = vld [vmem:[%s3768_s1 + $0x40] sm:$0xff]  }
  0x23   : > { %1312 = vmatpush1.bf16.msra.mxu1 %v2662_v4  ;;  %v2680_v21 = vld [vmem:[%s3768_s1 + $0xe8] sm:$0xff]   ;;  %v2682_v24 = vld [vmem:[%s3768_s1] sm:$0xff]   ;;  %v2684_v34 = vld [vmem:[%s3768_s1 + $0xd8] sm:$0xff]  }
  0x24   : > { %1313 = vmatprep.subr.bf16.mxu1 %v3774_v62  ;;  %2241 = vmatpush3.bf16.msra.mxu0 %v2667_v5  ;;  %v2683_v25 = vld [vmem:[%s3768_s1 + $0xe0] sm:$0xff]   ;;  %v2685_v42 = vld [vmem:[%s3768_s1 + $0xd0] sm:$0xff]  }
  0x25   : > { %2395 = vxpose.xlu0.b32.cont [5/16] (narrow) %v2394_v27, 64  ;;  %2242 = vmatprep.subr.bf16.mxu0 %v2669_v6 }
  0x27   : > { %1314 = vmatpush1.bf16.msra.mxu1 %v2665_v7 }
  0x28   : > { %1315 = vmatprep.subr.bf16.mxu1 %v3774_v62  ;;  %2243 = vmatpush3.bf16.msra.mxu0 %v2670_v8 }
  0x29   : > { %2397 = vxpose.xlu0.b32.cont [6/16] (narrow) %v2396_v30, 64  ;;  %2244 = vmatprep.subr.bf16.mxu0 %v2672_v9 }
  0x2b   : > { %1316 = vmatpush1.bf16.msra.mxu1 %v2668_v10 }
  0x2c   : > { %1317 = vmatprep.subr.bf16.mxu1 %v3774_v62  ;;  %2245 = vmatpush3.bf16.msra.mxu0 %v2673_v11 }
  0x2d   : > { %2399 = vxpose.xlu0.b32.cont [7/16] (narrow) %v2398_v33, 64  ;;  %2246 = vmatprep.subr.bf16.mxu0 %v2675_v12 }
  0x2f   : > { %1318 = vmatpush1.bf16.msra.mxu1 %v2671_v13 }
  0x30   : > { %1319 = vmatprep.subr.bf16.mxu1 %v3774_v62  ;;  %2247 = vmatpush3.bf16.msra.mxu0 %v2676_v14 }
  0x31   : > { %2401 = vxpose.xlu0.b32.cont [8/16] (narrow) %v2400_v36, 64  ;;  %2248 = vmatprep.subr.bf16.mxu0 %v2678_v17 }
  0x33   : > { %1320 = vmatpush1.bf16.msra.mxu1 %v2674_v15 }
  0x34   : > { %1321 = vmatprep.subr.bf16.mxu1 %v3774_v62  ;;  %2249 = vmatpush3.bf16.msra.mxu0 %v2679_v20 }
  0x35   : > { %2403 = vxpose.xlu0.b32.cont [9/16] (narrow) %v2402_v39, 64  ;;  %2250 = vmatprep.subr.bf16.mxu0 %v2681_v22 }
  0x37   : > { %1322 = vmatpush1.bf16.msra.mxu1 %v2677_v16 }
  0x38   : > { %1327 = vmatprep.subr.bf16.mxu1 %v3774_v62  ;;  %2251 = vmatpush3.bf16.msra.mxu0 %v2682_v24 }
  0x39   : > { %2405 = vxpose.xlu0.b32.cont [10/16] (narrow) %v2404_v41, 64  ;;  %1732 = vmatprep.subr.bf16.mxu0 %v3774_v62 }
  0x3b   : > { %1328 = vmatpush2.bf16.msra.mxu1 %v2680_v21 }
  0x3c   : > { %1329 = vmatprep.subr.bf16.mxu1 %v3774_v62 }
  0x3d   : > { %2407 = vxpose.xlu0.b32.cont [11/16] (narrow) %v2406_v44, 64 }
  0x3f   : > { %1330 = vmatpush2.bf16.msra.mxu1 %v2683_v25 }
  0x40   : > { %1331 = vmatprep.subr.bf16.mxu1 %v3774_v62 }
  0x41   : > { %2409 = vxpose.xlu0.b32.cont [12/16] (narrow) %v2408_v47, 64 }
  0x43   : > { %1332 = vmatpush2.bf16.msra.mxu1 %v2684_v34 }
  0x44   : > { %1333 = vmatprep.subr.bf16.mxu1 %v3774_v62 }
  0x45   : > { %2411 = vxpose.xlu0.b32.cont [13/16] (narrow) %v2410_v50, 64  ;;  %v2686_v50 = vld [vmem:[%s3768_s1 + $0xc8] sm:$0xff]  }
  0x47   : > { %1334 = vmatpush2.bf16.msra.mxu1 %v2685_v42 }
  0x48   : > { %1335 = vmatprep.subr.bf16.mxu1 %v3774_v62 }
  0x49   : > { %2413 = vxpose.xlu0.b32.cont [14/16] (narrow) %v2412_v53, 64 }
  0x4b   : > { %1336 = vmatpush2.bf16.msra.mxu1 %v2686_v50 }
  0x4c   : > { %1337 = vmatprep.subr.bf16.mxu1 %v3774_v62 }
  0x4d   : > { %2415 = vxpose.xlu0.b32.cont [15/16] (narrow) %v2414_v56, 64 }
  0x51   : > { %2417 = vxpose.xlu0.b32.end [16/16] (narrow) %v2416_v59, 64  ;;  %v2687_v59 = vld [vmem:[%s3768_s1 + $0xc0] sm:$0xff]  }
  0x52   : > { %1338 = vmatpush2.bf16.msra.mxu1 %v2687_v59 }
  0x53   : > { %2300 = vmatprep.subr.bf16.mxu1 %v3774_v62 }
  0x8f   : > { %v2346_v18 = vpop.trf.xlu1 }
  0x90   : > { %v2896_v27 = vunpack.i.l.bf16 %v2346_v18  ;;  %v2930_v48 = vunpack.i.h.bf16 %v2346_v18 }
  0x91   : > { %v2418_v19 = vpop.trf.xlu0 }
  0x92   : > { %v2887_v23 = vunpack.i.l.bf16 %v2418_v19  ;;  %v640_v38 = vrot.slane %v2896_v27, 1  ;;  %v2943_v55 = vunpack.i.h.bf16 %v2418_v19  ;;  %v541_v57 = vrot.slane %v2896_v27, 7 }
  0x93   : > { %v2351_v26 = vpop.trf.xlu1 }
  0x94   : > { %v2898_v28 = vunpack.i.l.bf16 %v2351_v26  ;;  %v637_v32 = vrot.slane %v2887_v23, 1  ;;  %v2937_v51 = vunpack.i.h.bf16 %v2351_v26  ;;  %v540_v58 = vrot.slane %v2887_v23, 7 }
  0x95   : > { %v2423_v29 = vpop.trf.xlu0 }
  0x96   : > { %v2900_v30 = vunpack.i.l.bf16 %v2423_v29  ;;  %v2458_v31 = vpack.i.bf16 %v2898_v28, %v2896_v27  ;;  %v641_v33 = vrot.slane %v2898_v28, 1  ;;  %v2945_v56 = vunpack.i.h.bf16 %v2423_v29 }
  0x97   : > { %v2356_v35 = vpop.trf.xlu1  ;;  %v574_v61 = vrot.slane %v2937_v51, 7  ;;  %v2543_v7 = vpack.i.bf16 %v2937_v51, %v2930_v48 }
  0x98   : > { %v638_v36 = vrot.slane %v2900_v30, 1  ;;  %2459 = vrot.lane.b32.xlu1 %v2458_v31, %s2709_s16  ;;  %v2463_v39 = vpack.i.bf16 %v2900_v30, %v2887_v23  ;;  %v642_v41 = vsel %vm636_vm0, %v640_v38, %v641_v33  ;;  %v2924_v45 = vunpack.i.l.bf16 %v2356_v35 }
  0x99   : > { %v2428_v37 = vpop.trf.xlu0  ;;  %v2954_v63 = vunpack.i.h.bf16 %v2356_v35  ;;  %v542_v9 = vrot.slane %v2900_v30, 7  ;;  %v3779_v19 = vrot.slane %v2945_v56, 1 }
  0x9a   : > { %v639_v40 = vsel %vm636_vm0, %v637_v32, %v638_v36  ;;  %v2939_v52 = vunpack.i.l.bf16 %v2428_v37  ;;  %v645_v2 = vrot.slane %v2924_v45, 1  ;;  %v2974_v13 = vunpack.i.h.bf16 %v2428_v37 }
  0x9b   : > { %v2361_v43 = vpop.trf.xlu1  ;;  %v2468_v44 = vpack.i.bf16 %v642_v41, %v639_v40  ;;  %v548_v17 = vrot.slane %v2924_v45, 7 }
  0x9c   : > { %v2926_v46 = vunpack.i.l.bf16 %v2361_v43  ;;  %2464 = vrot.lane.b32.xlu1 %v2463_v39, %s2709_s16  ;;  %v643_v1 = vrot.slane %v2939_v52, 1  ;;  %v2969_v10 = vunpack.i.h.bf16 %v2361_v43  ;;  %v646_v16 = vsel %vm636_vm0, %v641_v33, %v645_v2 }
  0x9d   : > { %v2433_v47 = vpop.trf.xlu0  ;;  %2469 = vrot.lane.b32.xlu0 %v2468_v44, %s2710_s19  ;;  %v3776_v8 = vrot.slane %v2974_v13, 1 }
  0x9e   : > { %v2473_v49 = vpack.i.bf16 %v2926_v46, %v2924_v45  ;;  %v2963_v6 = vunpack.i.l.bf16 %v2433_v47  ;;  %v644_v15 = vsel %vm636_vm0, %v638_v36, %v643_v1  ;;  %v2984_v20 = vunpack.i.h.bf16 %v2433_v47 }
  0x9f   : > { %v2366_v53 = vpop.trf.xlu1  ;;  %v552_v24 = vrot.slane %v2926_v46, 7  ;;  %v2488_v26 = vpack.i.bf16 %v646_v16, %v644_v15  ;;  %v649_v34 = vrot.slane %v2926_v46, 1  ;;  %v674_v12 = vsel %vm636_vm0, %v3779_v19, %v3776_v8 }
  0xa0   : > { %2474 = vrot.lane.b32.xlu1 %v2473_v49, %s2709_s16  ;;  %v2959_v3 = vunpack.i.l.bf16 %v2366_v53  ;;  %v647_v21 = vrot.slane %v2963_v6, 1  ;;  %v2991_v29 = vunpack.i.h.bf16 %v2366_v53  ;;  %v2493_v33 = vpack.i.bf16 %v2963_v6, %v2939_v52 }
  0xa1   : > { %v2438_v54 = vpop.trf.xlu0  ;;  %v650_v49 = vsel %vm636_vm0, %v645_v2, %v649_v34 }
  0xa2   : > { %v2989_v25 = vunpack.i.l.bf16 %v2438_v54  ;;  %v2993_v31 = vunpack.i.h.bf16 %v2438_v54  ;;  %v648_v39 = vsel %vm636_vm0, %v643_v1, %v647_v21  ;;  %v653_v50 = vrot.slane %v2959_v3, 1 }
  0xa3   : > { %v2371_v0 = vpop.trf.xlu1  ;;  %v556_v54 = vrot.slane %v2959_v3, 7 }
  0xa4   : > { %v2961_v4 = vunpack.i.l.bf16 %v2371_v0  ;;  %v3006_v40 = vunpack.i.h.bf16 %v2371_v0  ;;  %v651_v43 = vrot.slane %v2989_v25, 1  ;;  %v3778_v0 = vrot.slane %v2937_v51, 1 }
  0xa5   : > { %v2443_v5 = vpop.trf.xlu0  ;;  %v654_v62 = vsel %vm636_vm0, %v649_v34, %v653_v50  ;;  %v3148_v23 = vsel %vm539_vm1, %v552_v24, %v556_v54 }
  0xa6   : > { %v2478_v11 = vpack.i.bf16 %v2961_v4, %v2959_v3  ;;  %v3012_v44 = vunpack.i.l.bf16 %v2443_v5  ;;  %v3025_v1 = vunpack.i.h.bf16 %v2443_v5  ;;  %v3777_v5 = vrot.slane %v2954_v63, 1 }
  0xa7   : > { %v2376_v14 = vpop.trf.xlu1  ;;  %v560_v53 = vrot.slane %v2961_v4, 7  ;;  %v657_v16 = vrot.slane %v2961_v4, 1  ;;  %v3783_v4 = vrot.slane %v2969_v10, 1 }
  0xa8   : > { %2479 = vrot.lane.b32.xlu1 %v2478_v11, %s2709_s16  ;;  %v2998_v35 = vunpack.i.l.bf16 %v2376_v14  ;;  %v3027_v11 = vunpack.i.h.bf16 %v2376_v14  ;;  %v655_v14 = vrot.slane %v3012_v44, 1 }
  0xa9   : > { %v2448_v18 = vpop.trf.xlu0  ;;  %v658_v8 = vsel %vm636_vm0, %v653_v50, %v657_v16  ;;  %v3155_v45 = vsel %vm539_vm1, %v556_v54, %v560_v53 }
  0xaa   : > { %v3029_v2 = vunpack.i.l.bf16 %v2448_v18 }
  0xab   : > { %v2381_v32 = vpop.trf.xlu1 }
  0xac   : > { %v3000_v36 = vunpack.i.l.bf16 %v2381_v32  ;;  %2489 = vrot.lane.b32.xlu1 %v2488_v26, %s2710_s19  ;;  %v3051_v22 = vunpack.i.h.bf16 %v2381_v32  ;;  %v2508_v32 = vpack.i.bf16 %v3012_v44, %v2989_v25 }
  0xad   : > { %v2453_v37 = vpop.trf.xlu0 }
  0xae   : > { %v3003_v38 = vunpack.i.l.bf16 %v2453_v37  ;;  %v2483_v41 = vpack.i.bf16 %v3000_v36, %v2998_v35  ;;  %v665_v42 = vrot.slane %v3000_v36, 1  ;;  %v568_v19 = vrot.slane %v3000_v36, 7 }
  0xb0   : > { %v663_v47 = vrot.slane %v3003_v38, 1  ;;  %2484 = vrot.lane.b32.xlu0 %v2483_v41, %s2709_s16  ;;  %2494 = vrot.lane.b32.xlu1 %v2493_v33, %s2709_s16  ;;  %v702_v59 = vsel %vm636_vm0, %v665_v42, 0.0  ;;  %v2498_v33 = vpack.i.bf16 %v650_v49, %v648_v39  ;;  %v652_v41 = vsel %vm636_vm0, %v647_v21, %v651_v43 }
  0xb1   : > { %v3780_v39 = vrot.slane %v2993_v31, 1  ;;  %v3782_v21 = vrot.slane %v2991_v29, 1  ;;  %v3047_v49 = vunpack.i.h.bf16 %v2448_v18  ;;  %v676_v18 = vsel %vm636_vm0, %v3778_v0, %v3777_v5 }
  0xb2   : > { %v701_v15 = vsel %vm636_vm0, %v663_v47, 0.0  ;;  %v598_v0 = vrot.slane %v3051_v22, 7  ;;  %v566_v30 = vrot.slane %v3003_v38, 7 }
  0xb3   : > { %v2538_v26 = vpack.i.bf16 %v702_v59, %v701_v15  ;;  %v659_v59 = vrot.slane %v3029_v2, 1  ;;  %v661_v15 = vrot.slane %v2998_v35, 1 }
  0xb4   : > { %2499 = vrot.lane.b32.xlu1 %v2498_v33, %s2710_s19  ;;  %v3781_v33 = vrot.slane %v2984_v20, 1 }
  0xb5   : > { %2539 = vrot.lane.b32.xlu0 %v2538_v26, %s2710_s19  ;;  %v2503_v26 = vpack.i.bf16 %v654_v62, %v652_v41  ;;  %v656_v62 = vsel %vm636_vm0, %v651_v43, %v655_v14  ;;  %v564_v41 = vrot.slane %v2998_v35, 7  ;;  %v684_v35 = vsel %vm636_vm0, %v3783_v4, %v3782_v21 }
  0xb6   : > { %v682_v5 = vsel %vm636_vm0, %v3781_v33, %v3780_v39  ;;  %v3085_v43 = vunpack.i.h.bf16 %v2453_v37  ;;  %v662_v50 = vsel %vm636_vm0, %v657_v16, %v661_v15  ;;  %v2553_v39 = vpack.i.bf16 %v676_v18, %v674_v12 }
  0xb7   : > { %v689_v33 = vrot.slane %v3047_v49, 1  ;;  %v2513_v34 = vpack.i.bf16 %v658_v8, %v656_v62  ;;  %v2573_v60 = vpack.i.bf16 %v684_v35, %v682_v5  ;;  %v2583_v37 = vpack.i.bf16 %v3006_v40, %v2991_v29 }
  0xb8   : > { %2504 = vrot.lane.b32.xlu1 %v2503_v26, %s2710_s19  ;;  %v660_v26 = vsel %vm636_vm0, %v655_v14, %v659_v59  ;;  %v2523_v21 = vpack.i.bf16 %v3003_v38, %v3029_v2  ;;  %v685_v14 = vrot.slane %v3025_v1, 1  ;;  %v687_v4 = vrot.slane %v3006_v40, 1 }
  0xb9   : > { %2544 = vrot.lane.b32.xlu0 %v2543_v7, %s2709_s16  ;;  %v2563_v7 = vpack.i.bf16 %v2969_v10, %v2954_v63  ;;  %v2518_v16 = vpack.i.bf16 %v662_v50, %v660_v26  ;;  %v544_v12 = vrot.slane %v2898_v28, 7  ;;  %v691_v8 = vrot.slane %v3027_v11, 1 }
  0xba   : > { %v664_v5 = vsel %vm636_vm0, %v659_v59, %v663_v47  ;;  %v666_v18 = vsel %vm636_vm0, %v661_v15, %v665_v42  ;;  %v690_v28 = vsel %vm636_vm0, %v685_v14, %v689_v33  ;;  %v3139_v59 = vsel %vm539_vm1, %v548_v17, %v552_v24 }
  0xbb   : > { %v3123_v47 = vsel %vm539_vm1, %v541_v57, %v544_v12  ;;  %v3132_v42 = vsel %vm539_vm1, %v544_v12, %v548_v17  ;;  %v546_v15 = vrot.slane %v2939_v52, 7  ;;  %v554_v52 = vrot.slane %v2989_v25, 7 }
  0xbc   : > { %2509 = vrot.lane.b32.xlu1 %v2508_v32, %s2709_s16  ;;  %v550_v32 = vrot.slane %v2963_v6, 7  ;;  %v3160_v6 = vsel %vm539_vm1, %v560_v53, %v564_v41  ;;  %v3171_v3 = vsel %vm539_vm1, %v564_v41, %v568_v19  ;;  %v562_v24 = vrot.slane %v3029_v2, 7 }
  0xbd   : > { %2554 = vrot.lane.b32.xlu0 %v2553_v39, %s2710_s19  ;;  %v543_v39 = vsel %vm539_vm1, %v540_v58, %v542_v9  ;;  %v3165_v46 = vsel %vm539_vm1, %v542_v9, %v546_v15  ;;  %v692_v9 = vsel %vm636_vm0, %v687_v4, %v691_v8  ;;  %v3784_v2 = vrot.slane %v2930_v48, 7 }
  0xbe   : > { %v3127_v36 = vpack.c.bf16 %v543_v39, %v540_v58  ;;  %v558_v58 = vrot.slane %v3012_v44, 7  ;;  %v3168_v17 = vsel %vm539_vm1, %v546_v15, %v550_v32  ;;  %v3177_v44 = vsel %vm539_vm1, %v550_v32, %v554_v52 }
  0xbf   : > { %v971_v25 = vpack.c.bf16 %v3168_v17, %v3165_v46  ;;  %v3203_v38 = vsel %vm539_vm1, %v562_v24, %v566_v30  ;;  %v570_v62 = vrot.slane %v2943_v55, 7  ;;  %v3785_v41 = vrot.slane %v2954_v63, 7 }
  0xc0   : > { %2514 = vrot.lane.b32.xlu1 %v2513_v34, %s2710_s19  ;;  %v3180_v53 = vsel %vm539_vm1, %v554_v52, %v558_v58  ;;  %v3191_v54 = vsel %vm539_vm1, %v558_v58, %v562_v24  ;;  %v3198_v34 = vsel %vm539_vm1, %v3784_v2, %v574_v61  ;;  %v580_v12 = vrot.slane %v2984_v20, 7 }
  0xc1   : > { %2564 = vrot.lane.b32.xlu0 %v2563_v7, %s2709_s16  ;;  %v3211_v35 = vsel %vm539_vm1, %v574_v61, %v3785_v41  ;;  %v3786_v7 = vrot.slane %v2969_v10, 7  ;;  %v3787_v26 = vmov %v3785_v41  ;;  %v3788_v39 = vrot.slane %v2991_v29, 7 }
  0xc2   : > { %v3790_v32 = vrot.slane %v2945_v56, 7  ;;  %v3791_v58 = vrot.slane %v3006_v40, 7  ;;  %v584_v2 = vrot.slane %v2993_v31, 7  ;;  %v588_v41 = vrot.slane %v3025_v1, 7 }
  0xc3   : > { %v3789_v15 = vmov %v3786_v7  ;;  %v3792_v24 = vmov %v3788_v39 }
  0xc4   : > { %2519 = vrot.lane.b32.xlu1 %v2518_v16, %s2710_s19  ;;  %v576_v16 = vrot.slane %v2974_v13, 7  ;;  %v3229_v61 = vsel %vm539_vm1, %v3789_v15, %v3788_v39  ;;  %v573_v52 = vsel %vm539_vm1, %v570_v62, %v3790_v32  ;;  %v3239_v30 = vsel %vm539_vm1, %v3792_v24, %v3791_v58 }
  0xc5   : > { %2574 = vrot.lane.b32.xlu0 %v2573_v60, %s2710_s19  ;;  %v3218_v60 = vsel %vm539_vm1, %v3787_v26, %v3786_v7  ;;  %v3243_v7 = vpack.c.bf16 %v573_v52, %v570_v62  ;;  %v3793_v26 = vmov %v3790_v32  ;;  %v3794_v32 = vrot.slane %v3027_v11, 7 }
  0xc6   : > { %v3248_v39 = vsel %vm539_vm1, %v3793_v26, %v576_v16  ;;  %v3251_v15 = vsel %vm539_vm1, %v576_v16, %v580_v12  ;;  %v3795_v50 = vmov %v3791_v58  ;;  %v3265_v52 = vsel %vm539_vm1, %v580_v12, %v584_v2 }
  0xc7   : > { %v3258_v58 = vsel %vm539_vm1, %v3795_v50, %v3794_v32  ;;  %v3268_v16 = vsel %vm539_vm1, %v584_v2, %v588_v41  ;;  %v592_v24 = vrot.slane %v3047_v49, 7  ;;  %v596_v50 = vrot.slane %v3085_v43, 7 }
  0xc8   : > { %2524 = vrot.lane.b32.xlu1 %v2523_v21, %s2709_s16  ;;  %v2528_v12 = vpack.i.bf16 %v666_v18, %v664_v5  ;;  %v667_v2 = vrot.slane %v2943_v55, 1  ;;  %v670_v5 = vrot.slane %v2930_v48, 1  ;;  %v2603_v18 = vpack.i.bf16 %v3051_v22, %v3027_v11 }
  0xc9   : > { %2584 = vrot.lane.b32.xlu0 %v2583_v37, %s2709_s16  ;;  %v3796_v37 = vmov %v3794_v32  ;;  %v2593_v32 = vpack.i.bf16 %v692_v9, %v690_v28  ;;  %v3282_v62 = vsel %vm539_vm1, %v588_v41, %v592_v24  ;;  %v3286_v19 = vsel %vm539_vm1, %v592_v24, %v596_v50 }
  0xca   : > { %v3278_v21 = vsel %vm539_vm1, %v3796_v37, %v598_v0  ;;  %v693_v37 = vrot.slane %v3085_v43, 1  ;;  %v695_v28 = vrot.slane %v3051_v22, 1  ;;  %v2533_v9 = vpack.i.bf16 %v2945_v56, %v2943_v55 }
  0xcb   : > { %v3797_v50 = vrot.slane %v2945_v56, 1  ;;  %v2558_v55 = vpack.i.bf16 %v2984_v20, %v2974_v13  ;;  %v3799_v56 = vrot.slane %v2984_v20, 1 }
  0xcc   : > { %2529 = vrot.lane.b32.xlu1 %v2528_v12, %s2710_s19  ;;  %v703_v41 = vsel %vm636_vm0, %v693_v37, 0.0  ;;  %v704_v24 = vsel %vm636_vm0, %v695_v28, 0.0  ;;  %v3798_v12 = vrot.slane %v2937_v51, 1  ;;  %v696_v40 = vsel %vm636_vm0, %v691_v8, %v695_v28 }
  0xcd   : > { %2594 = vrot.lane.b32.xlu0 %v2593_v32, %s2710_s19  ;;  %v669_v32 = vsel %vm636_vm0, %v667_v2, %v3797_v50  ;;  %v2613_v22 = vpack.i.bf16 %v704_v24, %v703_v41  ;;  %v3800_v2 = vrot.slane %v2974_v13, 1  ;;  %v3803_v13 = vrot.slane %v2993_v31, 1 }
  0xce   : > { %v672_v0 = vsel %vm636_vm0, %v670_v5, %v3798_v12  ;;  %v3801_v5 = vrot.slane %v2969_v10, 1  ;;  %v2598_v24 = vpack.i.bf16 %v3085_v43, %v3047_v49  ;;  %v633_v49 = vsel %vm539_vm1, 0.0, %v541_v57 }
  0xcf   : > { %v2548_v26 = vpack.i.bf16 %v672_v0, %v669_v32  ;;  %v678_v51 = vsel %vm636_vm0, %v3800_v2, %v3799_v56  ;;  %v686_v20 = vsel %vm636_vm0, %v3803_v13, %v685_v14 }
  0xd0   : > { %2534 = vrot.lane.b32.xlu1 %v2533_v9, %s2709_s16 }
  0xd1   : > { %2604 = vrot.lane.b32.xlu0 %v2603_v18, %s2709_s16  ;;  %v3802_v18 = vrot.slane %v2954_v63, 1  ;;  %v3804_v63 = vrot.slane %v2991_v29, 1 }
  0xd3   : > { %v680_v9 = vsel %vm636_vm0, %v3802_v18, %v3801_v5  ;;  %v688_v10 = vsel %vm636_vm0, %v3804_v63, %v687_v4 }
  0xd4   : > { %2549 = vrot.lane.b32.xlu1 %v2548_v26, %s2710_s19  ;;  %v2568_v0 = vpack.i.bf16 %v680_v9, %v678_v51  ;;  %v2578_v26 = vpack.i.bf16 %v3025_v1, %v2993_v31  ;;  %v2588_v41 = vpack.i.bf16 %v688_v10, %v686_v20  ;;  %v694_v31 = vsel %vm636_vm0, %v689_v33, %v693_v37 }
  0xd5   : > { %2614 = vrot.lane.b32.xlu0 %v2613_v22, %s2710_s19  ;;  %v2608_v29 = vpack.i.bf16 %v696_v40, %v694_v31 }
  0xd8   : > { %2559 = vrot.lane.b32.xlu1 %v2558_v55, %s2709_s16 }
  0xdc   : > { %2569 = vrot.lane.b32.xlu1 %v2568_v0, %s2710_s19 }
  0xe0   : > { %2579 = vrot.lane.b32.xlu1 %v2578_v26, %s2709_s16 }
  0xe4   : > { %2589 = vrot.lane.b32.xlu1 %v2588_v41, %s2710_s19 }
  0xe8   : > { %2599 = vrot.lane.b32.xlu1 %v2598_v24, %s2709_s16  ;;  %s276_s16 = scalar_lea.vmem %s3773_s6, %s3817_s22 }
  0xec   : > { %2609 = vrot.lane.b32.xlu1 %v2608_v29, %s2710_s19 }
 0x10a   : > { %v2460_v1 = vpop.permute.xlu1 %2459 }
 0x10b   : > { %v2461_v57 = vunpack.i.l.bf16 %v2460_v1  ;;  %v2462_v22 = vunpack.i.h.bf16 %v2460_v1 }
 0x10e   : > { %v2465_v4 = vpop.permute.xlu1 %2464 }
 0x10f   : > { %v2467_v14 = vunpack.i.h.bf16 %v2465_v4  ;;  %v2466_v50 = vunpack.i.l.bf16 %v2465_v4  ;;  %v2470_v27 = vpop.permute.xlu0 %2469 }
 0x110   : > { %v2472_v32 = vunpack.i.h.bf16 %v2470_v27  ;;  %v2471_v12 = vunpack.i.l.bf16 %v2470_v27 }
 0x111   : > { %v935_v11 = vsel %vm769_vm2, %v633_v49, %v2466_v50  ;;  %v936_v33 = vsel %vm769_vm2, %v3123_v47, %v2467_v14  ;;  %v770_v47 = vsel %vm769_vm2, %v2466_v50, %v2461_v57  ;;  %v771_v51 = vsel %vm769_vm2, %v2467_v14, %v2462_v22 }
 0x112   : > { %v968_v43 = vpack.c.bf16 %v936_v33, %v935_v11  ;;  %v2475_v37 = vpop.permute.xlu1 %2474  ;;  %v887_v5 = vsel %vm886_vm6, %v2471_v12, %v2472_v32  ;;  %v951_v18 = vsel %vm886_vm6, %v770_v47, %v2471_v12 }
 0x113   : > { %v2477_v4 = vunpack.i.h.bf16 %v2475_v37  ;;  %v2476_v14 = vunpack.i.l.bf16 %v2475_v37 }
 0x114   : > { %1242 = vmatprep.mubr.bf16.mxu0 %v968_v43 }
 0x115   : > { %2121 = vmatmul.mubr.msk.bf16.vlgmr.msra.gmra.mxu0 %vm3356_vm5, %v3127_v36 }
 0x11a   : > { %v3363_v28 = vpop.permute.xlu1 %2479 }
 0x11e   : > { %v2490_v55 = vpop.permute.xlu1 %2489 }
 0x11f   : > { %v2492_v56 = vunpack.i.h.bf16 %v2490_v55  ;;  %v2491_v2 = vunpack.i.l.bf16 %v2490_v55 }
 0x121   : > { %v888_v36 = vsel %vm886_vm6, %v2491_v2, %v2492_v56  ;;  %v952_v9 = vsel %vm886_vm6, %v771_v51, %v2491_v2 }
 0x122   : > { %v2495_v0 = vpop.permute.xlu1 %2494  ;;  %v970_v26 = vpack.c.bf16 %v888_v36, %v887_v5  ;;  %v969_v13 = vpack.c.bf16 %v952_v9, %v951_v18  ;;  %v3371_v10 = vpop.permute.xlu0 %2484  ;;  %v2482_v36 = vunpack.i.h.bf16 %v3363_v28  ;;  %v2481_v18 = vunpack.i.l.bf16 %v3363_v28 }
 0x123   : > { %v2497_v20 = vunpack.i.h.bf16 %v2495_v0  ;;  %v2496_v63 = vunpack.i.l.bf16 %v2495_v0 }
 0x124   : > { %2126 = vmatprep.mubr.msk.bf16.mxu1 %vm1185_vm7, %v970_v26  ;;  %v3807_v26 = vpack.c.bf16 %v3180_v53, %v3177_v44 }
 0x125   : > { %1340 = vmatmul.mubr.bf16.vlgmr.msra.gmra.mxu1 %v969_v13  ;;  %v937_v41 = vsel %vm769_vm2, %v3132_v42, %v2496_v63  ;;  %v938_v24 = vsel %vm769_vm2, %v3139_v59, %v2497_v20  ;;  %v772_v42 = vsel %vm769_vm2, %v2496_v63, %v2476_v14  ;;  %v773_v59 = vsel %vm769_vm2, %v2497_v20, %v2477_v4 }
 0x126   : > { %v2500_v31 = vpop.permute.xlu1 %2499  ;;  %v972_v40 = vpack.c.bf16 %v938_v24, %v937_v41  ;;  %v2487_v4 = vunpack.i.h.bf16 %v3371_v10 }
 0x127   : > { %v2502_v29 = vunpack.i.h.bf16 %v2500_v31  ;;  %v2501_v1 = vunpack.i.l.bf16 %v2500_v31  ;;  %v3381_v50 = vpop.permute.xlu0 %2539 }
 0x128   : > { %1250 = vmatprep.mubr.bf16.mxu0 %v972_v40  ;;  %v2542_v44 = vunpack.i.h.bf16 %v3381_v50 }
 0x129   : > { %1251 = vmatmul.mubr.bf16.gmra.mxu0 %v971_v25  ;;  %v889_v43 = vsel %vm886_vm6, %v2501_v1, %v2502_v29  ;;  %v953_v57 = vsel %vm886_vm6, %v772_v42, %v2501_v1  ;;  %v2486_v42 = vunpack.i.l.bf16 %v3371_v10 }
 0x12a   : > { %v2505_v49 = vpop.permute.xlu1 %2504 }
 0x12b   : > { %v2507_v11 = vunpack.i.h.bf16 %v2505_v49  ;;  %v2506_v33 = vunpack.i.l.bf16 %v2505_v49  ;;  %v3389_v22 = vpop.permute.xlu0 %2544  ;;  %v2541_v49 = vunpack.i.l.bf16 %v3381_v50 }
 0x12d   : > { %v890_v27 = vsel %vm886_vm6, %v2506_v33, %v2507_v11  ;;  %v954_v46 = vsel %vm886_vm6, %v773_v59, %v2506_v33 }
 0x12e   : > { %v974_v17 = vpack.c.bf16 %v890_v27, %v889_v43  ;;  %v2510_v25 = vpop.permute.xlu1 %2509  ;;  %v973_v37 = vpack.c.bf16 %v954_v46, %v953_v57  ;;  %v894_v57 = vsel %vm886_vm6, %v2541_v49, %v2542_v44 }
 0x12f   : > { %v2512_v32 = vunpack.i.h.bf16 %v2510_v25  ;;  %v2511_v12 = vunpack.i.l.bf16 %v2510_v25  ;;  %v3398_v9 = vpop.permute.xlu0 %2554 }
 0x130   : > { %2127 = vmatprep.mubr.msk.bf16.mxu1 %vm1185_vm7, %v974_v17 }
 0x131   : > { %1348 = vmatmul.mubr.bf16.gmra.mxu1 %v973_v37  ;;  %v939_v47 = vsel %vm769_vm2, %v3148_v23, %v2511_v12  ;;  %v940_v56 = vsel %vm769_vm2, %v3155_v45, %v2512_v32  ;;  %v774_v20 = vsel %vm769_vm2, %v2511_v12, %v2481_v18  ;;  %v775_v45 = vsel %vm769_vm2, %v2512_v32, %v2482_v36 }
 0x132   : > { %v2515_v55 = vpop.permute.xlu1 %2514  ;;  %v976_v2 = vpack.c.bf16 %v940_v56, %v939_v47 }
 0x133   : > { %v2517_v51 = vunpack.i.h.bf16 %v2515_v55  ;;  %v2516_v5 = vunpack.i.l.bf16 %v2515_v55  ;;  %v3411_v14 = vpop.permute.xlu0 %2564 }
 0x134   : > { %1258 = vmatprep.mubr.bf16.mxu0 %v976_v2  ;;  %v2547_v2 = vunpack.i.h.bf16 %v3389_v22  ;;  %v2567_v44 = vunpack.i.h.bf16 %v3411_v14 }
 0x135   : > { %1259 = vmatmul.mubr.bf16.gmra.mxu0 %v3807_v26  ;;  %v891_v63 = vsel %vm886_vm6, %v2516_v5, %v2517_v51  ;;  %v955_v28 = vsel %vm886_vm6, %v774_v20, %v2516_v5  ;;  %v3809_v51 = vrot.slane %v2930_v48, 7 }
 0x136   : > { %v2520_v0 = vpop.permute.xlu1 %2519 }
 0x137   : > { %v2522_v23 = vunpack.i.h.bf16 %v2520_v0  ;;  %v2521_v13 = vunpack.i.l.bf16 %v2520_v0  ;;  %v2575_v37 = vpop.permute.xlu0 %2574  ;;  %v635_v5 = vsel %vm539_vm1, 0.0, %v3809_v51  ;;  %v2546_v0 = vunpack.i.l.bf16 %v3389_v22 }
 0x139   : > { %v892_v41 = vsel %vm886_vm6, %v2521_v13, %v2522_v23  ;;  %v956_v24 = vsel %vm886_vm6, %v775_v45, %v2521_v13 }
 0x13a   : > { %v978_v31 = vpack.c.bf16 %v892_v41, %v891_v63  ;;  %v2525_v40 = vpop.permute.xlu1 %2524  ;;  %v977_v29 = vpack.c.bf16 %v956_v24, %v955_v28 }
 0x13b   : > { %v2527_v53 = vunpack.i.h.bf16 %v2525_v40  ;;  %v2526_v1 = vunpack.i.l.bf16 %v2525_v40  ;;  %v2585_v45 = vpop.permute.xlu0 %2584 }
 0x13c   : > { %2128 = vmatprep.mubr.msk.bf16.mxu1 %vm1185_vm7, %v978_v31 }
 0x13d   : > { %1356 = vmatmul.mubr.bf16.gmra.mxu1 %v977_v29  ;;  %v941_v11 = vsel %vm769_vm2, %v3160_v6, %v2526_v1  ;;  %v942_v33 = vsel %vm769_vm2, %v3171_v3, %v2527_v53  ;;  %v777_v59 = vsel %vm769_vm2, %v2527_v53, %v2487_v4  ;;  %v776_v25 = vsel %vm769_vm2, %v2526_v1, %v2486_v42 }
 0x13e   : > { %v2530_v43 = vpop.permute.xlu1 %2529  ;;  %v980_v27 = vpack.c.bf16 %v942_v33, %v941_v11  ;;  %v3808_v6 = vpack.c.bf16 %v3203_v38, %v3191_v54  ;;  %v958_v10 = vsel %vm886_vm6, %v777_v59, %v2541_v49  ;;  %v2557_v54 = vunpack.i.h.bf16 %v3398_v9 }
 0x13f   : > { %v2532_v46 = vunpack.i.h.bf16 %v2530_v43  ;;  %v2531_v17 = vunpack.i.l.bf16 %v2530_v43  ;;  %v2556_v38 = vunpack.i.l.bf16 %v3398_v9  ;;  %v2577_v53 = vunpack.i.h.bf16 %v2575_v37  ;;  %v2595_v49 = vpop.permute.xlu0 %2594 }
 0x140   : > { %1266 = vmatprep.mubr.bf16.mxu0 %v980_v27  ;;  %v2576_v1 = vunpack.i.l.bf16 %v2575_v37  ;;  %v2566_v4 = vunpack.i.l.bf16 %v3411_v14 }
 0x141   : > { %v893_v50 = vsel %vm886_vm6, %v2531_v17, %v2532_v46  ;;  %1267 = vmatmul.mubr.bf16.gmra.mxu0 %v3808_v6  ;;  %v957_v3 = vsel %vm886_vm6, %v776_v25, %v2531_v17  ;;  %v896_v9 = vsel %vm886_vm6, %v2556_v38, %v2557_v54 }
 0x142   : > { %v982_v32 = vpack.c.bf16 %v894_v57, %v893_v50  ;;  %v2535_v12 = vpop.permute.xlu1 %2534  ;;  %v981_v47 = vpack.c.bf16 %v958_v10, %v957_v3  ;;  %v898_v57 = vsel %vm886_vm6, %v2576_v1, %v2577_v53  ;;  %v2587_v10 = vunpack.i.h.bf16 %v2585_v45 }
 0x143   : > { %v2537_v55 = vunpack.i.h.bf16 %v2535_v12  ;;  %v2536_v56 = vunpack.i.l.bf16 %v2535_v12  ;;  %v2605_v37 = vpop.permute.xlu0 %2604  ;;  %v2596_v12 = vunpack.i.l.bf16 %v2595_v49 }
 0x144   : > { %2129 = vmatprep.mubr.msk.bf16.mxu1 %vm1185_vm7, %v982_v32  ;;  %v2597_v32 = vunpack.i.h.bf16 %v2595_v49  ;;  %v2691_v49 = vld [vmem:[%s3770_s3 + $0x20] sm:$0xff]  }
 0x145   : > { %1364 = vmatmul.mubr.bf16.gmra.mxu1 %v981_v47  ;;  %v943_v36 = vsel %vm769_vm2, %v635_v5, %v2536_v56  ;;  %v944_v18 = vsel %vm769_vm2, %v3198_v34, %v2537_v55  ;;  %v779_v26 = vsel %vm769_vm2, %v2537_v55, %v2547_v2  ;;  %v778_v63 = vsel %vm769_vm2, %v2536_v56, %v2546_v0 }
 0x146   : > { %v2550_v23 = vpop.permute.xlu1 %2549  ;;  %v984_v13 = vpack.c.bf16 %v944_v18, %v943_v36  ;;  %v960_v22 = vsel %vm886_vm6, %v779_v26, %v2556_v38  ;;  %v2586_v47 = vunpack.i.l.bf16 %v2585_v45  ;;  %v900_v38 = vsel %vm886_vm6, %v2596_v12, %v2597_v32 }
 0x147   : > { %v2552_v20 = vunpack.i.h.bf16 %v2550_v23  ;;  %v2551_v48 = vunpack.i.l.bf16 %v2550_v23  ;;  %v2615_v0 = vpop.permute.xlu0 %2614  ;;  %v2607_v45 = vunpack.i.h.bf16 %v2605_v37 }
 0x148   : > { %1274 = vmatprep.mubr.bf16.mxu0 %v984_v13 }
 0x149   : > { %v895_v41 = vsel %vm886_vm6, %v2551_v48, %v2552_v20  ;;  %2125 = vmatmul.mubr.msk.bf16.gmra.mxu0 %vm3356_vm5, %v3243_v7  ;;  %v959_v34 = vsel %vm886_vm6, %v778_v63, %v2551_v48  ;;  %v2617_v63 = vunpack.i.h.bf16 %v2615_v0 }
 0x14a   : > { %v986_v28 = vpack.c.bf16 %v896_v9, %v895_v41  ;;  %v2560_v24 = vpop.permute.xlu1 %2559  ;;  %v985_v31 = vpack.c.bf16 %v960_v22, %v959_v34  ;;  %v2616_v9 = vunpack.i.l.bf16 %v2615_v0  ;;  %v2606_v41 = vunpack.i.l.bf16 %v2605_v37  ;;  %v2699_v37 = vld [vmem:[%s3770_s3 + $0x40] sm:$0xff]  }
 0x14b   : > { %v2562_v40 = vunpack.i.h.bf16 %v2560_v24  ;;  %v2561_v29 = vunpack.i.l.bf16 %v2560_v24 }
 0x14c   : > { %2130 = vmatprep.mubr.msk.bf16.mxu1 %vm1185_vm7, %v986_v28 }
 0x14d   : > { %1372 = vmatmul.mubr.bf16.gmra.mxu1 %v985_v31  ;;  %v945_v8 = vsel %vm769_vm2, %v3211_v35, %v2561_v29  ;;  %v946_v7 = vsel %vm769_vm2, %v3218_v60, %v2562_v40  ;;  %v781_v11 = vsel %vm769_vm2, %v2562_v40, %v2567_v44  ;;  %v780_v27 = vsel %vm769_vm2, %v2561_v29, %v2566_v4  ;;  %v2689_v4 = vld [vmem:[%s3770_s3 + $0x30] sm:$0xff]  }
 0x14e   : > { %v2570_v33 = vpop.permute.xlu1 %2569  ;;  %v988_v42 = vpack.c.bf16 %v946_v7, %v945_v8  ;;  %v3810_v35 = vpack.c.bf16 %v3251_v15, %v3248_v39  ;;  %v962_v14 = vsel %vm886_vm6, %v781_v11, %v2576_v1  ;;  %v902_v29 = vsel %vm886_vm6, %v2616_v9, %v2617_v63  ;;  %v2688_v7 = vld [vmem:[%s3770_s3 + $0x38] sm:$0xff]  }
 0x14f   : > { %v2572_v59 = vunpack.i.h.bf16 %v2570_v33  ;;  %v2571_v43 = vunpack.i.l.bf16 %v2570_v33  ;;  %1733 = vmatpush1.bf16.msra.mxu0 %v2688_v7  ;;  %2312 = vmatpush1.bf16.msra.mxu1 %v2688_v7  ;;  %v2692_v11 = vld [vmem:[%s3770_s3 + $0x18] sm:$0xff]   ;;  %v2693_v33 = vld [vmem:[%s3770_s3 + $0x10] sm:$0xff]  }
 0x150   : > { %1282 = vmatprep.mubr.bf16.mxu0 %v988_v42  ;;  %v2694_v42 = vld [vmem:[%s3770_s3 + $0x8] sm:$0xff]  }
 0x151   : > { %v897_v46 = vsel %vm886_vm6, %v2571_v43, %v2572_v59  ;;  %1283 = vmatmul.mubr.bf16.gmra.mxu0 %v3810_v35  ;;  %v961_v60 = vsel %vm886_vm6, %v780_v27, %v2571_v43  ;;  %v2695_v59 = vld [vmem:[%s3770_s3] sm:$0xff]   ;;  %v2696_v43 = vld [vmem:[%s3770_s3 + $0x58] sm:$0xff]   ;;  %v2697_v27 = vld [vmem:[%s3770_s3 + $0x50] sm:$0xff]  }
 0x152   : > { %v990_v17 = vpack.c.bf16 %v898_v57, %v897_v46  ;;  %v2580_v25 = vpop.permute.xlu1 %2579  ;;  %v989_v50 = vpack.c.bf16 %v962_v14, %v961_v60  ;;  %v2698_v46 = vld [vmem:[%s3770_s3 + $0x48] sm:$0xff]  }
 0x153   : > { %v2582_v6 = vunpack.i.h.bf16 %v2580_v25  ;;  %v2581_v3 = vunpack.i.l.bf16 %v2580_v25  ;;  %v3552_v25 = vld [vmem:[%s3769_s2] ss:$0 sm:$0xff] }
 0x154   : > { %2131 = vmatprep.mubr.msk.bf16.mxu1 %vm1185_vm7, %v990_v17 }
 0x155   : > { %1380 = vmatmul.mubr.bf16.gmra.mxu1 %v989_v50  ;;  %v947_v39 = vsel %vm769_vm2, %v3229_v61, %v2581_v3  ;;  %v948_v15 = vsel %vm769_vm2, %v3239_v30, %v2582_v6  ;;  %v783_v55 = vsel %vm769_vm2, %v2582_v6, %v2587_v10  ;;  %v782_v54 = vsel %vm769_vm2, %v2581_v3, %v2586_v47 }
 0x156   : > { %v2590_v56 = vpop.permute.xlu1 %2589  ;;  %v992_v2 = vpack.c.bf16 %v948_v15, %v947_v39  ;;  %v3811_v61 = vpack.c.bf16 %v3268_v16, %v3265_v52  ;;  %v964_v18 = vsel %vm886_vm6, %v783_v55, %v2596_v12 }
 0x157   : > { %v2592_v51 = vunpack.i.h.bf16 %v2590_v56  ;;  %v2591_v5 = vunpack.i.l.bf16 %v2590_v56 }
 0x158   : > { %1290 = vmatprep.mubr.bf16.mxu0 %v992_v2 }
 0x159   : > { %v899_v36 = vsel %vm886_vm6, %v2591_v5, %v2592_v51  ;;  %1291 = vmatmul.mubr.bf16.gmra.mxu0 %v3811_v61  ;;  %v963_v30 = vsel %vm886_vm6, %v782_v54, %v2591_v5 }
 0x15a   : > { %v994_v26 = vpack.c.bf16 %v900_v38, %v899_v36  ;;  %v2600_v23 = vpop.permute.xlu1 %2599  ;;  %v993_v13 = vpack.c.bf16 %v964_v18, %v963_v30 }
 0x15b   : > { %v2602_v20 = vunpack.i.h.bf16 %v2600_v23  ;;  %v2601_v48 = vunpack.i.l.bf16 %v2600_v23 }
 0x15c   : > { %2132 = vmatprep.mubr.msk.bf16.mxu1 %vm1185_vm7, %v994_v26 }
 0x15d   : > { %1388 = vmatmul.mubr.bf16.gmra.mxu1 %v993_v13  ;;  %v949_v52 = vsel %vm769_vm2, %v3258_v58, %v2601_v48  ;;  %v950_v16 = vsel %vm769_vm2, %v3278_v21, %v2602_v20  ;;  %v785_v34 = vsel %vm769_vm2, %v2602_v20, %v2607_v45  ;;  %v784_v40 = vsel %vm769_vm2, %v2601_v48, %v2606_v41 }
 0x15e   : > { %v2610_v22 = vpop.permute.xlu1 %2609  ;;  %v996_v28 = vpack.c.bf16 %v950_v16, %v949_v52  ;;  %v3812_v58 = vpack.c.bf16 %v3286_v19, %v3282_v62  ;;  %v966_v53 = vsel %vm886_vm6, %v785_v34, %v2616_v9  ;;  %v3813_v19 = vmov 0   ;;  %v2690_v62 = vld [vmem:[%s3770_s3 + $0x28] sm:$0xff]  }
 0x15f   : > { %v2612_v24 = vunpack.i.h.bf16 %v2610_v22  ;;  %v2611_v31 = vunpack.i.l.bf16 %v2610_v22  ;;  %1734 = vmatprep.subr.bf16.mxu0 %v3813_v19  ;;  %2301 = vmatprep.subr.bf16.mxu1 %v3813_v19 }
 0x160   : > { %1298 = vmatprep.mubr.bf16.mxu0 %v996_v28  ;;  %1735 = vmatpush1.bf16.msra.mxu0 %v2689_v4 }
 0x161   : > { %v901_v44 = vsel %vm886_vm6, %v2611_v31, %v2612_v24  ;;  %1299 = vmatmul.mubr.bf16.gmra.mxu0 %v3812_v58  ;;  %v965_v21 = vsel %vm886_vm6, %v784_v40, %v2611_v31  ;;  %2313 = vmatpush1.bf16.msra.mxu1 %v2689_v4 }
 0x162   : > { %v998_v1 = vpack.c.bf16 %v902_v29, %v901_v44  ;;  %v997_v8 = vpack.c.bf16 %v966_v53, %v965_v21  ;;  %1736 = vmatprep.subr.bf16.mxu0 %v3813_v19  ;;  %2302 = vmatprep.subr.bf16.mxu1 %v3813_v19 }
 0x164   : > { %2133 = vmatprep.mubr.msk.bf16.mxu1 %vm1185_vm7, %v998_v1  ;;  %1737 = vmatpush1.bf16.msra.mxu0 %v2690_v62 }
 0x165   : > { %1396 = vmatmul.mubr.bf16.gmra.mxu1 %v997_v8  ;;  %1738 = vmatprep.subr.bf16.mxu0 %v3813_v19 }
 0x166   : > { %2314 = vmatpush1.bf16.msra.mxu1 %v2690_v62 }
 0x167   : > { %2303 = vmatprep.subr.bf16.mxu1 %v3813_v19 }
 0x168   : > { %1739 = vmatpush1.bf16.msra.mxu0 %v2691_v49 }
 0x169   : > { %1740 = vmatprep.subr.bf16.mxu0 %v3813_v19 }
 0x16a   : > { %2315 = vmatpush1.bf16.msra.mxu1 %v2691_v49 }
 0x16b   : > { %2304 = vmatprep.subr.bf16.mxu1 %v3813_v19 }
 0x16c   : > { %1741 = vmatpush1.bf16.msra.mxu0 %v2692_v11 }
 0x16d   : > { %1742 = vmatprep.subr.bf16.mxu0 %v3813_v19 }
 0x16e   : > { %2316 = vmatpush1.bf16.msra.mxu1 %v2692_v11 }
 0x16f   : > { %2305 = vmatprep.subr.bf16.mxu1 %v3813_v19 }
 0x170   : > { %1743 = vmatpush1.bf16.msra.mxu0 %v2693_v33 }
 0x171   : > { %1744 = vmatprep.subr.bf16.mxu0 %v3813_v19 }
 0x172   : > { %2317 = vmatpush1.bf16.msra.mxu1 %v2693_v33 }
 0x173   : > { %2306 = vmatprep.subr.bf16.mxu1 %v3813_v19 }
 0x174   : > { %1745 = vmatpush1.bf16.msra.mxu0 %v2694_v42 }
 0x175   : > { %1746 = vmatprep.subr.bf16.mxu0 %v3813_v19 }
 0x176   : > { %2318 = vmatpush1.bf16.msra.mxu1 %v2694_v42 }
 0x177   : > { %2307 = vmatprep.subr.bf16.mxu1 %v3813_v19 }
 0x178   : > { %1747 = vmatpush1.bf16.msra.mxu0 %v2695_v59 }
 0x179   : > { %1756 = vmatprep.subr.bf16.mxu0 %v3813_v19 }
 0x17a   : > { %2319 = vmatpush1.bf16.msra.mxu1 %v2695_v59 }
 0x17b   : > { %2308 = vmatprep.subr.bf16.mxu1 %v3813_v19 }
 0x17c   : > { %1757 = vmatpush2.bf16.msra.mxu0 %v2696_v43 }
 0x17d   : > { %1758 = vmatprep.subr.bf16.mxu0 %v3813_v19 }
 0x17e   : > { %2320 = vmatpush2.bf16.msra.mxu1 %v2696_v43 }
 0x17f   : > { %2309 = vmatprep.subr.bf16.mxu1 %v3813_v19 }
 0x180   : > { %1759 = vmatpush2.bf16.msra.mxu0 %v2697_v27 }
 0x181   : > { %1760 = vmatprep.subr.bf16.mxu0 %v3813_v19 }
 0x182   : > { %2321 = vmatpush2.bf16.msra.mxu1 %v2697_v27 }
 0x183   : > { %2310 = vmatprep.subr.bf16.mxu1 %v3813_v19 }
 0x184   : > { %1761 = vmatpush2.bf16.msra.mxu0 %v2698_v46 }
 0x185   : > { %1762 = vmatprep.subr.bf16.mxu0 %v3813_v19 }
 0x186   : > { %2322 = vmatpush2.bf16.msra.mxu1 %v2698_v46 }
 0x187   : > { %2311 = vmatprep.subr.bf16.mxu1 %v3813_v19 }
 0x188   : > { %1763 = vmatpush2.bf16.msra.mxu0 %v2699_v37 }
 0x18a   : > { %2323 = vmatpush2.bf16.msra.mxu1 %v2699_v37 }
 0x1d5   : > { %v2252_v57 = vpop.f32.mrf.mxu0 }
 0x1d7   : > { %v2253_v35 = vpop.f32.mrf.mxu0 }
 0x1d8   : > { %v2254_v14 = vadd.f32 %v2253_v35, %v2252_v57 }
 0x1d9   : > { %v2255_v60 = vpop.f32.mrf.mxu0 }
 0x1da   : > { %v1245_v6 = vadd.f32 %v2254_v14, %v3552_v25 }
 0x1db   : > { %v2256_v17 = vpop.f32.mrf.mxu0 }
 0x1dc   : > { %v2257_v50 = vadd.f32 %v2256_v17, %v2255_v60 }
 0x1de   : > { %v1248_v12 = vadd.f32 %v2257_v50, %v3552_v25 }
 0x1e5   : > { %v1341_v3 = vpop.f32.mrf.mxu1 }
 0x1e6   : > { %v1342_v10 = vadd.f32 %v1341_v3, %v1245_v6 }
 0x1e7   : > { %v1343_v32 = vpop.f32.mrf.mxu1 }
 0x1e8   : > { %v3559_v47 = vmax.f32 %v1342_v10, 0.0 }
 0x1e9   : > { %v2258_v39 = vpop.f32.mrf.mxu0  ;;  %v1344_v15 = vpop.f32.mrf.mxu1 }
 0x1ea   : > { %v1345_v55 = vadd.f32 %v1344_v15, %v1248_v12  ;;  %v1460_v38 = vrot.slane %v3559_v47, 7  ;;  %v1508_v52 = vrot.slane %v3559_v47, 1 }
 0x1eb   : > { %v2259_v56 = vpop.f32.mrf.mxu0  ;;  %v1346_v2 = vpop.f32.mrf.mxu1 }
 0x1ec   : > { %v1405_v51 = vmax.f32 %v1345_v55, 0.0  ;;  %v2260_v5 = vadd.f32 %v2259_v56, %v2258_v39 }
 0x1ed   : > { %v2261_v54 = vpop.f32.mrf.mxu0 }
 0x1ee   : > { %v1461_v36 = vrot.slane %v1405_v51, 7  ;;  %v2618_v61 = vpack.i.bf16 %v1405_v51, %v3559_v47  ;;  %v1253_v0 = vadd.f32 %v2260_v5, %v3552_v25  ;;  %v1509_v48 = vrot.slane %v1405_v51, 1 }
 0x1ef   : > { %v2262_v30 = vpop.f32.mrf.mxu0 }
 0x1f0   : > { %v2263_v18 = vadd.f32 %v2262_v30, %v2261_v54  ;;  %2619 = vrot.lane.b32.xlu1 %v2618_v61, %s2710_s19  ;;  %v3568_v26 = vsel %vm539_vm1, %v1460_v38, %v1461_v36  ;;  %v1510_v31 = vsel %vm636_vm0, %v1508_v52, %v1509_v48 }
 0x1f1   : > { %v1349_v23 = vpop.f32.mrf.mxu1 }
 0x1f2   : > { %v1350_v13 = vadd.f32 %v1349_v23, %v1253_v0  ;;  %v1256_v63 = vadd.f32 %v2263_v18, %v3552_v25 }
 0x1f3   : > { %v1351_v20 = vpop.f32.mrf.mxu1 }
 0x1f4   : > { %v1406_v45 = vmax.f32 %v1350_v13, 0.0 }
 0x1f5   : > { %v1352_v9 = vpop.f32.mrf.mxu1  ;;  %v2264_v22 = vpop.f32.mrf.mxu0 }
 0x1f6   : > { %v1463_v16 = vrot.slane %v1406_v45, 7  ;;  %v1511_v41 = vrot.slane %v1406_v45, 1  ;;  %v1353_v34 = vadd.f32 %v1352_v9, %v1256_v63 }
 0x1f7   : > { %v1354_v28 = vpop.f32.mrf.mxu1  ;;  %v2265_v44 = vpop.f32.mrf.mxu0 }
 0x1f8   : > { %v1407_v24 = vmax.f32 %v1353_v34, 0.0  ;;  %v1512_v40 = vsel %vm636_vm0, %v1509_v48, %v1511_v41  ;;  %v3575_v29 = vsel %vm539_vm1, %v1461_v36, %v1463_v16  ;;  %v2266_v1 = vadd.f32 %v2265_v44, %v2264_v22 }
 0x1f9   : > { %v1621_v58 = vpack.c.bf16 %v1512_v40, %v1510_v31  ;;  %v2267_v7 = vpop.f32.mrf.mxu0 }
 0x1fa   : > { %v1465_v21 = vrot.slane %v1407_v24, 7  ;;  %v1513_v53 = vrot.slane %v1407_v24, 1  ;;  %v2623_v8 = vpack.i.bf16 %v1407_v24, %v1406_v45  ;;  %v1261_v4 = vadd.f32 %v2266_v1, %v3552_v25 }
 0x1fb   : > { %2146 = vmatprep.mubr.msk.bf16.mxu0 %vm886_vm6, %v1621_v58  ;;  %v2268_v49 = vpop.f32.mrf.mxu0 }
 0x1fc   : > { %2624 = vrot.lane.b32.xlu0 %v2623_v8, %s2710_s19  ;;  %v3581_v19 = vsel %vm636_vm0, %v1511_v41, %v1513_v53  ;;  %v3584_v62 = vsel %vm539_vm1, %v1463_v16, %v1465_v21  ;;  %v2269_v33 = vadd.f32 %v2268_v49, %v2267_v7 }
 0x1fd   : > { %v1357_v11 = vpop.f32.mrf.mxu1 }
 0x1fe   : > { %v1358_v42 = vadd.f32 %v1357_v11, %v1261_v4  ;;  %v1264_v27 = vadd.f32 %v2269_v33, %v3552_v25 }
 0x1ff   : > { %v1359_v59 = vpop.f32.mrf.mxu1 }
 0x200   : > { %v1408_v43 = vmax.f32 %v1358_v42, 0.0 }
 0x201   : > { %v2270_v57 = vpop.f32.mrf.mxu0  ;;  %v1360_v46 = vpop.f32.mrf.mxu1 }
 0x202   : > { %v1467_v35 = vrot.slane %v1408_v43, 7  ;;  %v1515_v60 = vrot.slane %v1408_v43, 1  ;;  %v1361_v14 = vadd.f32 %v1360_v46, %v1264_v27 }
 0x203   : > { %v2271_v17 = vpop.f32.mrf.mxu0  ;;  %v1362_v50 = vpop.f32.mrf.mxu1 }
 0x204   : > { %v1409_v6 = vmax.f32 %v1361_v14, 0.0  ;;  %v2272_v3 = vadd.f32 %v2271_v17, %v2270_v57  ;;  %v3588_v10 = vsel %vm636_vm0, %v1513_v53, %v1515_v60  ;;  %v3591_v37 = vsel %vm539_vm1, %v1465_v21, %v1467_v35 }
 0x205   : > { %v2273_v32 = vpop.f32.mrf.mxu0  ;;  %v1365_v12 = vpop.f32.mrf.mxu1  ;;  %v1623_v39 = vpack.c.bf16 %v3588_v10, %v3581_v19 }
 0x206   : > { %v1469_v15 = vrot.slane %v1409_v6, 7  ;;  %v1517_v55 = vrot.slane %v1409_v6, 1  ;;  %v1269_v56 = vadd.f32 %v2272_v3, %v3552_v25  ;;  %v2628_v2 = vpack.i.bf16 %v1409_v6, %v1408_v43 }
 0x207   : > { %v2274_v51 = vpop.f32.mrf.mxu0  ;;  %v1367_v5 = vpop.f32.mrf.mxu1 }
 0x208   : > { %v1366_v54 = vadd.f32 %v1365_v12, %v1269_v56  ;;  %v2275_v36 = vadd.f32 %v2274_v51, %v2273_v32  ;;  %2629 = vrot.lane.b32.xlu1 %v2628_v2, %s2710_s19  ;;  %v3598_v61 = vsel %vm636_vm0, %v1515_v60, %v1517_v55  ;;  %v3601_v30 = vsel %vm539_vm1, %v1467_v35, %v1469_v15 }
 0x209   : > { %v2276_v18 = vpop.f32.mrf.mxu0  ;;  %v1368_v0 = vpop.f32.mrf.mxu1 }
 0x20a   : > { %v1410_v23 = vmax.f32 %v1366_v54, 0.0  ;;  %v1272_v13 = vadd.f32 %v2275_v36, %v3552_v25 }
 0x20b   : > { %v2277_v20 = vpop.f32.mrf.mxu0  ;;  %v1370_v48 = vpop.f32.mrf.mxu1 }
 0x20c   : > { %v1471_v45 = vrot.slane %v1410_v23, 7  ;;  %v1519_v63 = vrot.slane %v1410_v23, 1  ;;  %v1369_v9 = vadd.f32 %v1368_v0, %v1272_v13  ;;  %v2278_v52 = vadd.f32 %v2277_v20, %v2276_v18 }
 0x20d   : > { %v2279_v16 = vpop.f32.mrf.mxu0  ;;  %v1373_v41 = vpop.f32.mrf.mxu1 }
 0x20e   : > { %v1411_v34 = vmax.f32 %v1369_v9, 0.0  ;;  %v1277_v22 = vadd.f32 %v2278_v52, %v3552_v25  ;;  %v3606_v28 = vsel %vm636_vm0, %v1517_v55, %v1519_v63  ;;  %v3609_v24 = vsel %vm539_vm1, %v1469_v15, %v1471_v45 }
 0x20f   : > { %v2280_v31 = vpop.f32.mrf.mxu0  ;;  %v1375_v40 = vpop.f32.mrf.mxu1  ;;  %v1625_v44 = vpack.c.bf16 %v3606_v28, %v3598_v61 }
 0x210   : > { %v1473_v58 = vrot.slane %v1411_v34, 7  ;;  %v1521_v21 = vrot.slane %v1411_v34, 1  ;;  %v1374_v53 = vadd.f32 %v1373_v41, %v1277_v22  ;;  %v2281_v1 = vadd.f32 %v2280_v31, %v2279_v16 }
 0x211   : > { %v2282_v8 = vpop.f32.mrf.mxu0  ;;  %v1376_v7 = vpop.f32.mrf.mxu1  ;;  %v2633_v4 = vpack.i.bf16 %v1411_v34, %v1410_v23 }
 0x212   : > { %v3614_v49 = vsel %vm636_vm0, %v1521_v21, 0.0  ;;  %v1280_v11 = vadd.f32 %v2281_v1, %v3552_v25  ;;  %v3618_v33 = vsel %vm636_vm0, %v1519_v63, %v1521_v21  ;;  %v3620_v42 = vmax.f32 %v1374_v53, 0.0 }
 0x213   : > { %2634 = vrot.lane.b32.xlu0 %v2633_v4, %s2710_s19  ;;  %v2283_v59 = vpop.f32.mrf.mxu0  ;;  %v1378_v43 = vpop.f32.mrf.mxu1  ;;  %v1627_v27 = vpack.c.bf16 %v3614_v49, %v3618_v33  ;;  %v3626_v57 = vsel %vm539_vm1, %v1471_v45, %v1473_v58 }
 0x214   : > { %v1377_v46 = vadd.f32 %v1376_v7, %v1280_v11  ;;  %v2284_v35 = vadd.f32 %v2283_v59, %v2282_v8  ;;  %v1475_v6 = vrot.slane %v3620_v42, 7  ;;  %v1523_v3 = vrot.slane %v3620_v42, 1 }
 0x215   : > { %v2285_v60 = vpop.f32.mrf.mxu0  ;;  %v1381_v14 = vpop.f32.mrf.mxu1 }
 0x216   : > { %v1413_v17 = vmax.f32 %v1377_v46, 0.0  ;;  %v1285_v50 = vadd.f32 %v2284_v35, %v3552_v25 }
 0x217   : > { %v2286_v32 = vpop.f32.mrf.mxu0  ;;  %v1383_v12 = vpop.f32.mrf.mxu1 }
 0x218   : > { %v1476_v15 = vrot.slane %v1413_v17, 7  ;;  %v1524_v55 = vrot.slane %v1413_v17, 1  ;;  %v1382_v56 = vadd.f32 %v1381_v14, %v1285_v50  ;;  %v2287_v2 = vadd.f32 %v2286_v32, %v2285_v60 }
 0x219   : > { %v2288_v51 = vpop.f32.mrf.mxu0  ;;  %v1384_v5 = vpop.f32.mrf.mxu1  ;;  %v2638_v54 = vpack.i.bf16 %v1413_v17, %v3620_v42 }
 0x21a   : > { %v1414_v36 = vmax.f32 %v1382_v56, 0.0  ;;  %v1288_v18 = vadd.f32 %v2287_v2, %v3552_v25  ;;  %v3634_v0 = vsel %vm636_vm0, %v1523_v3, %v1524_v55  ;;  %v3639_v23 = vsel %vm539_vm1, %v1475_v6, %v1476_v15 }
 0x21b   : > { %2639 = vrot.lane.b32.xlu1 %v2638_v54, %s2710_s19  ;;  %v2289_v13 = vpop.f32.mrf.mxu0  ;;  %v1386_v20 = vpop.f32.mrf.mxu1 }
 0x21c   : > { %v1478_v48 = vrot.slane %v1414_v36, 7  ;;  %v1526_v45 = vrot.slane %v1414_v36, 1  ;;  %v1385_v63 = vadd.f32 %v1384_v5, %v1288_v18  ;;  %v2290_v9 = vadd.f32 %v2289_v13, %v2288_v51 }
 0x21d   : > { %v2291_v52 = vpop.f32.mrf.mxu0  ;;  %v1389_v16 = vpop.f32.mrf.mxu1 }
 0x21e   : > { %v1415_v41 = vmax.f32 %v1385_v63, 0.0  ;;  %v1293_v34 = vadd.f32 %v2290_v9, %v3552_v25  ;;  %v3644_v22 = vsel %vm636_vm0, %v1524_v55, %v1526_v45  ;;  %v3647_v31 = vsel %vm539_vm1, %v1476_v15, %v1478_v48 }
 0x21f   : > { %v2292_v40 = vpop.f32.mrf.mxu0  ;;  %v1391_v58 = vpop.f32.mrf.mxu1  ;;  %v1629_v21 = vpack.c.bf16 %v3644_v22, %v3634_v0 }
 0x220   : > { %v1480_v53 = vrot.slane %v1415_v41, 7  ;;  %v1528_v1 = vrot.slane %v1415_v41, 1  ;;  %v1390_v8 = vadd.f32 %v1389_v16, %v1293_v34  ;;  %v2293_v7 = vadd.f32 %v2292_v40, %v2291_v52 }
 0x221   : > { %v2294_v4 = vpop.f32.mrf.mxu0  ;;  %v1392_v11 = vpop.f32.mrf.mxu1  ;;  %v2643_v59 = vpack.i.bf16 %v1415_v41, %v1414_v36 }
 0x222   : > { %v1416_v43 = vmax.f32 %v1390_v8, 0.0  ;;  %v1296_v46 = vadd.f32 %v2293_v7, %v3552_v25  ;;  %v3653_v35 = vsel %vm636_vm0, %v1526_v45, %v1528_v1  ;;  %v3656_v60 = vsel %vm539_vm1, %v1478_v48, %v1480_v53 }
 0x223   : > { %2644 = vrot.lane.b32.xlu0 %v2643_v59, %s2710_s19  ;;  %v2295_v14 = vpop.f32.mrf.mxu0  ;;  %v1394_v17 = vpop.f32.mrf.mxu1 }
 0x224   : > { %v1482_v50 = vrot.slane %v1416_v43, 7  ;;  %v1530_v3 = vrot.slane %v1416_v43, 1  ;;  %v1393_v32 = vadd.f32 %v1392_v11, %v1296_v46  ;;  %v2296_v12 = vadd.f32 %v2295_v14, %v2294_v4 }
 0x225   : > { %v2297_v15 = vpop.f32.mrf.mxu0  ;;  %v1397_v55 = vpop.f32.mrf.mxu1 }
 0x226   : > { %v1417_v56 = vmax.f32 %v1393_v32, 0.0  ;;  %v1301_v2 = vadd.f32 %v2296_v12, %v3552_v25  ;;  %v3661_v51 = vsel %vm636_vm0, %v1528_v1, %v1530_v3  ;;  %v3664_v5 = vsel %vm539_vm1, %v1480_v53, %v1482_v50 }
 0x227   : > { %v2298_v54 = vpop.f32.mrf.mxu0  ;;  %v1399_v36 = vpop.f32.mrf.mxu1  ;;  %v1631_v18 = vpack.c.bf16 %v3661_v51, %v3653_v35 }
 0x228   : > { %v1484_v13 = vrot.slane %v1417_v56, 7  ;;  %v1398_v20 = vadd.f32 %v1397_v55, %v1301_v2  ;;  %v2299_v48 = vadd.f32 %v2298_v54, %v2297_v15  ;;  %v2648_v63 = vpack.i.bf16 %v1417_v56, %v1416_v43 }
 0x229   : > { %v1400_v45 = vpop.f32.mrf.mxu1  ;;  %v1532_v9 = vrot.slane %v1417_v56, 1  ;;  %v1506_v15 = vsel %vm539_vm1, 0.0, %v1460_v38 }
 0x22a   : > { %v1418_v52 = vmax.f32 %v1398_v20, 0.0  ;;  %v1304_v16 = vadd.f32 %v2299_v48, %v3552_v25  ;;  %v3670_v41 = vsel %vm539_vm1, %v1482_v50, %v1484_v13  ;;  %2649 = vrot.lane.b32.xlu1 %v2648_v63, %s2710_s19 }
 0x22b   : > { %v1402_v34 = vpop.f32.mrf.mxu1  ;;  %v1533_v8 = vsel %vm636_vm0, %v1530_v3, %v1532_v9 }
 0x22c   : > { %v1486_v40 = vrot.slane %v1418_v52, 7  ;;  %v1534_v58 = vrot.slane %v1418_v52, 1  ;;  %v1401_v53 = vadd.f32 %v1400_v45, %v1304_v16 }
 0x22e   : > { %v1419_v1 = vmax.f32 %v1401_v53, 0.0  ;;  %v1535_v7 = vsel %vm636_vm0, %v1532_v9, %v1534_v58  ;;  %v3676_v4 = vsel %vm539_vm1, %v1484_v13, %v1486_v40 }
 0x22f   : > { %v1633_v11 = vpack.c.bf16 %v1535_v7, %v1533_v8 }
 0x230   : > { %v1488_v59 = vrot.slane %v1419_v1, 7  ;;  %v1536_v25 = vrot.slane %v1419_v1, 1  ;;  %v2653_v43 = vpack.i.bf16 %v1419_v1, %v1418_v52 }
 0x231   : > { %2152 = vmatprep.mubr.msk.bf16.mxu1 %vm886_vm6, %v1633_v11 }
 0x232   : > { %v1555_v46 = vsel %vm636_vm0, %v1536_v25, 0.0  ;;  %2654 = vrot.lane.b32.xlu0 %v2653_v43, %s2710_s19  ;;  %v1537_v14 = vsel %vm636_vm0, %v1534_v58, %v1536_v25  ;;  %v3683_v17 = vsel %vm539_vm1, %v1486_v40, %v1488_v59  ;;  %s2172_s19 = sshll.u32 %s3815_s23, 5 }
 0x233   : > { %v1635_v50 = vpack.c.bf16 %v1555_v46, %v1537_v14  ;;  %s3746_s11 = scalar_lea.vmem %s3771_s4, %s2172_s19 }
 0x262   : > { %v2620_v3 = vpop.permute.xlu1 %2619 }
 0x263   : > { %v2622_v32 = vunpack.i.h.bf16 %v2620_v3  ;;  %v2621_v12 = vunpack.i.l.bf16 %v2620_v3 }
 0x265   : > { %v1604_v55 = vsel %vm886_vm6, %v1506_v15, %v2621_v12  ;;  %v1605_v56 = vsel %vm886_vm6, %v3568_v26, %v2622_v32 }
 0x266   : > { %v1620_v2 = vpack.c.bf16 %v1605_v56, %v1604_v55 }
 0x268   : > { %1765 = vmatmul.mubr.bf16.vlgmr.msra.gmra.mxu0 %v1620_v2 }
 0x269   : > { %2147 = vmatprep.mubr.msk.bf16.mxu0 %vm886_vm6, %v1623_v39 }
 0x26e   : > { %v2625_v54 = vpop.permute.xlu0 %2624 }
 0x26f   : > { %v2627_v36 = vunpack.i.h.bf16 %v2625_v54  ;;  %v2626_v13 = vunpack.i.l.bf16 %v2625_v54 }
 0x271   : > { %v1606_v47 = vsel %vm886_vm6, %v3575_v29, %v2626_v13  ;;  %v1607_v38 = vsel %vm886_vm6, %v3584_v62, %v2627_v36 }
 0x272   : > { %v1622_v20 = vpack.c.bf16 %v1607_v38, %v1606_v47 }
 0x274   : > { %1773 = vmatmul.mubr.bf16.gmra.mxu0 %v1622_v20 }
 0x275   : > { %2148 = vmatprep.mubr.msk.bf16.mxu0 %vm886_vm6, %v1625_v44 }
 0x27a   : > { %v2630_v26 = vpop.permute.xlu1 %2629 }
 0x27b   : > { %v2632_v19 = vunpack.i.h.bf16 %v2630_v26  ;;  %v2631_v10 = vunpack.i.l.bf16 %v2630_v26 }
 0x27d   : > { %v1608_v39 = vsel %vm886_vm6, %v3591_v37, %v2631_v10  ;;  %v1609_v48 = vsel %vm886_vm6, %v3601_v30, %v2632_v19 }
 0x27e   : > { %v1624_v29 = vpack.c.bf16 %v1609_v48, %v1608_v39 }
 0x280   : > { %1781 = vmatmul.mubr.bf16.gmra.mxu0 %v1624_v29 }
 0x281   : > { %2149 = vmatprep.mubr.msk.bf16.mxu0 %vm886_vm6, %v1627_v27  ;;  %v1507_v27 = vsel %vm539_vm1, 0.0, %v1475_v6 }
 0x285   : > { %v2635_v62 = vpop.permute.xlu0 %2634 }
 0x286   : > { %v2637_v61 = vunpack.i.h.bf16 %v2635_v62  ;;  %v2636_v28 = vunpack.i.l.bf16 %v2635_v62 }
 0x288   : > { %v1610_v44 = vsel %vm886_vm6, %v3609_v24, %v2636_v28  ;;  %v1611_v45 = vsel %vm886_vm6, %v3626_v57, %v2637_v61 }
 0x289   : > { %v1626_v37 = vpack.c.bf16 %v1611_v45, %v1610_v44 }
 0x28b   : > { %1789 = vmatmul.mubr.bf16.gmra.mxu0 %v1626_v37 }
 0x28c   : > { %2150 = vmatprep.mubr.msk.bf16.mxu0 %vm886_vm6, %v1629_v21 }
 0x28d   : > { %v2640_v30 = vpop.permute.xlu1 %2639 }
 0x28e   : > { %v2642_v49 = vunpack.i.h.bf16 %v2640_v30  ;;  %v2641_v33 = vunpack.i.l.bf16 %v2640_v30 }
 0x290   : > { %v1612_v63 = vsel %vm886_vm6, %v1507_v27, %v2641_v33  ;;  %v1613_v24 = vsel %vm886_vm6, %v3639_v23, %v2642_v49 }
 0x291   : > { %v1628_v57 = vpack.c.bf16 %v1613_v24, %v1612_v63 }
 0x293   : > { %1797 = vmatmul.mubr.bf16.gmra.mxu0 %v1628_v57 }
 0x294   : > { %2151 = vmatprep.mubr.msk.bf16.mxu0 %vm886_vm6, %v1631_v18 }
 0x295   : > { %v2645_v0 = vpop.permute.xlu0 %2644 }
 0x296   : > { %v2647_v22 = vunpack.i.h.bf16 %v2645_v0  ;;  %v2646_v21 = vunpack.i.l.bf16 %v2645_v0 }
 0x298   : > { %v1614_v42 = vsel %vm886_vm6, %v3647_v31, %v2646_v21  ;;  %v1615_v6 = vsel %vm886_vm6, %v3656_v60, %v2647_v22 }
 0x299   : > { %v1630_v9 = vpack.c.bf16 %v1615_v6, %v1614_v42 }
 0x29b   : > { %1805 = vmatmul.mubr.bf16.gmra.mxu0 %v1630_v9 }
 0x29c   : > { %v2650_v52 = vpop.permute.xlu1 %2649 }
 0x29d   : > { %v2652_v23 = vunpack.i.h.bf16 %v2650_v52  ;;  %v2651_v16 = vunpack.i.l.bf16 %v2650_v52 }
 0x29f   : > { %v1617_v35 = vsel %vm886_vm6, %v3670_v41, %v2652_v23  ;;  %v1616_v51 = vsel %vm886_vm6, %v3664_v5, %v2651_v16 }
 0x2a0   : > { %v1632_v18 = vpack.c.bf16 %v1617_v35, %v1616_v51 }
 0x2a2   : > { %1813 = vmatmul.mubr.bf16.vlgmr.msra.gmra.mxu1 %v1632_v18 }
 0x2a3   : > { %2153 = vmatprep.mubr.msk.bf16.mxu1 %vm886_vm6, %v1635_v50 }
 0x2a4   : > { %v2655_v31 = vpop.permute.xlu0 %2654 }
 0x2a5   : > { %v2657_v34 = vunpack.i.h.bf16 %v2655_v31  ;;  %v2656_v40 = vunpack.i.l.bf16 %v2655_v31 }
 0x2a7   : > { %v1618_v60 = vsel %vm886_vm6, %v3676_v4, %v2656_v40  ;;  %v1619_v58 = vsel %vm886_vm6, %v3683_v17, %v2657_v34 }
 0x2a8   : > { %v1634_v53 = vpack.c.bf16 %v1619_v58, %v1618_v60 }
 0x2aa   : > { %1821 = vmatmul.mubr.bf16.gmra.mxu1 %v1634_v53 }
 0x328   : > { %v1766_v1 = vpop.f32.mrf.mxu0 }
 0x329   : > { %v1851_v36 = vmul.f32 %v1766_v1, %v1766_v1 }
 0x32a   : > { %v1768_v41 = vpop.f32.mrf.mxu0 }
 0x32c   : > { %v1769_v5 = vpop.f32.mrf.mxu0 }
 0x32d   : > { %v2192_v8 = vpack.c.bf16 %v1769_v5, %v1766_v1  ;;  %v1852_v2 = vmul.f32 %v1769_v5, %v1769_v5  ;;  %v1829_v13 = vadd.f32 %v1769_v5, %v1766_v1 }
 0x32e   : > { %v1771_v7 = vpop.f32.mrf.mxu0 }
 0x32f   : > { %2193 = vst [vmem:[%s3746_s11] sm:$0xff] %v2192_v8   ;;  %v1867_v20 = vadd.f32 %v1852_v2, %v1851_v36 }
 0x334   : > { %v1774_v4 = vpop.f32.mrf.mxu0 }
 0x335   : > { %v1853_v47 = vmul.f32 %v1774_v4, %v1774_v4  ;;  %v1830_v26 = vadd.f32 %v1829_v13, %v1774_v4 }
 0x336   : > { %v1776_v11 = vpop.f32.mrf.mxu0 }
 0x337   : > { %v1868_v39 = vadd.f32 %v1867_v20, %v1853_v47 }
 0x338   : > { %v1777_v59 = vpop.f32.mrf.mxu0 }
 0x339   : > { %v2197_v25 = vpack.c.bf16 %v1777_v59, %v1774_v4  ;;  %v1854_v19 = vmul.f32 %v1777_v59, %v1777_v59  ;;  %v1831_v48 = vadd.f32 %v1830_v26, %v1777_v59 }
 0x33a   : > { %v1779_v43 = vpop.f32.mrf.mxu0 }
 0x33b   : > { %2229 = vst [vmem:[%s3746_s11 + $0x8] sm:$0xff] %v2197_v25   ;;  %v1869_v28 = vadd.f32 %v1868_v39, %v1854_v19 }
 0x340   : > { %v1782_v46 = vpop.f32.mrf.mxu0 }
 0x341   : > { %v1855_v29 = vmul.f32 %v1782_v46, %v1782_v46  ;;  %v1832_v44 = vadd.f32 %v1831_v48, %v1782_v46 }
 0x342   : > { %v1784_v14 = vpop.f32.mrf.mxu0 }
 0x343   : > { %v1870_v30 = vadd.f32 %v1869_v28, %v1855_v29 }
 0x344   : > { %v1785_v17 = vpop.f32.mrf.mxu0 }
 0x345   : > { %v2202_v50 = vpack.c.bf16 %v1785_v17, %v1782_v46  ;;  %v1856_v45 = vmul.f32 %v1785_v17, %v1785_v17  ;;  %v1833_v49 = vadd.f32 %v1832_v44, %v1785_v17 }
 0x346   : > { %v1787_v3 = vpop.f32.mrf.mxu0 }
 0x347   : > { %2230 = vst [vmem:[%s3746_s11 + $0x10] sm:$0xff] %v2202_v50   ;;  %v1871_v63 = vadd.f32 %v1870_v30, %v1856_v45 }
 0x34b   : > { %v1790_v32 = vpop.f32.mrf.mxu0 }
 0x34c   : > { %v1857_v33 = vmul.f32 %v1790_v32, %v1790_v32  ;;  %v1834_v24 = vadd.f32 %v1833_v49, %v1790_v32 }
 0x34d   : > { %v1792_v12 = vpop.f32.mrf.mxu0 }
 0x34e   : > { %v1872_v22 = vadd.f32 %v1871_v63, %v1857_v33 }
 0x34f   : > { %v1793_v15 = vpop.f32.mrf.mxu0 }
 0x350   : > { %v2207_v55 = vpack.c.bf16 %v1793_v15, %v1790_v32  ;;  %v1858_v57 = vmul.f32 %v1793_v15, %v1793_v15  ;;  %v1835_v21 = vadd.f32 %v1834_v24, %v1793_v15 }
 0x351   : > { %v1795_v56 = vpop.f32.mrf.mxu0 }
 0x352   : > { %2231 = vst [vmem:[%s3746_s11 + $0x18] sm:$0xff] %v2207_v55   ;;  %v1873_v52 = vadd.f32 %v1872_v22, %v1858_v57 }
 0x353   : > { %v1798_v54 = vpop.f32.mrf.mxu0 }
 0x354   : > { %v1859_v42 = vmul.f32 %v1798_v54, %v1798_v54  ;;  %v1836_v23 = vadd.f32 %v1835_v21, %v1798_v54 }
 0x355   : > { %v1800_v38 = vpop.f32.mrf.mxu0 }
 0x356   : > { %v1874_v51 = vadd.f32 %v1873_v52, %v1859_v42 }
 0x357   : > { %v1801_v10 = vpop.f32.mrf.mxu0 }
 0x358   : > { %v2212_v62 = vpack.c.bf16 %v1801_v10, %v1798_v54  ;;  %v1860_v16 = vmul.f32 %v1801_v10, %v1801_v10  ;;  %v1837_v18 = vadd.f32 %v1836_v23, %v1801_v10 }
 0x359   : > { %v1803_v61 = vpop.f32.mrf.mxu0 }
 0x35a   : > { %2232 = vst [vmem:[%s3746_s11 + $0x20] sm:$0xff] %v2212_v62   ;;  %v1875_v40 = vadd.f32 %v1874_v51, %v1860_v16 }
 0x35b   : > { %v1806_v37 = vpop.f32.mrf.mxu0 }
 0x35c   : > { %v1861_v31 = vmul.f32 %v1806_v37, %v1806_v37  ;;  %v1838_v60 = vadd.f32 %v1837_v18, %v1806_v37 }
 0x35d   : > { %v1808_v27 = vpop.f32.mrf.mxu0 }
 0x35e   : > { %v1876_v1 = vadd.f32 %v1875_v40, %v1861_v31 }
 0x35f   : > { %v1809_v0 = vpop.f32.mrf.mxu0 }
 0x360   : > { %v2217_v6 = vpack.c.bf16 %v1809_v0, %v1806_v37  ;;  %v1862_v58 = vmul.f32 %v1809_v0, %v1809_v0  ;;  %v1839_v41 = vadd.f32 %v1838_v60, %v1809_v0 }
 0x361   : > { %v1811_v9 = vpop.f32.mrf.mxu0 }
 0x362   : > { %2233 = vst [vmem:[%s3746_s11 + $0x28] sm:$0xff] %v2217_v6   ;;  %v1814_v35 = vpop.f32.mrf.mxu1  ;;  %v1877_v4 = vadd.f32 %v1876_v1, %v1862_v58 }
 0x363   : > { %v1863_v5 = vmul.f32 %v1814_v35, %v1814_v35  ;;  %v1840_v11 = vadd.f32 %v1839_v41, %v1814_v35 }
 0x364   : > { %v1816_v34 = vpop.f32.mrf.mxu1 }
 0x365   : > { %v1878_v43 = vadd.f32 %v1877_v4, %v1863_v5 }
 0x366   : > { %v1817_v53 = vpop.f32.mrf.mxu1 }
 0x367   : > { %v2222_v8 = vpack.c.bf16 %v1817_v53, %v1814_v35  ;;  %v1864_v59 = vmul.f32 %v1817_v53, %v1817_v53  ;;  %v1841_v46 = vadd.f32 %v1840_v11, %v1817_v53 }
 0x368   : > { %v1819_v7 = vpop.f32.mrf.mxu1 }
 0x369   : > { %2234 = vst [vmem:[%s3746_s11 + $0x30] sm:$0xff] %v2222_v8   ;;  %v1879_v50 = vadd.f32 %v1878_v43, %v1864_v59 }
 0x36a   : > { %v1822_v25 = vpop.f32.mrf.mxu1 }
 0x36b   : > { %v1865_v14 = vmul.f32 %v1822_v25, %v1822_v25  ;;  %v1842_v3 = vadd.f32 %v1841_v46, %v1822_v25 }
 0x36c   : > { %v1824_v17 = vpop.f32.mrf.mxu1 }
 0x36d   : > { %v1880_v12 = vadd.f32 %v1879_v50, %v1865_v14 }
 0x36e   : > { %v1825_v32 = vpop.f32.mrf.mxu1 }
 0x36f   : > { %v1843_v15 = vadd.f32 %v1842_v3, %v1825_v32  ;;  %v1866_v55 = vmul.f32 %v1825_v32, %v1825_v32  ;;  %v2227_v56 = vpack.c.bf16 %v1825_v32, %v1822_v25 }
 0x370   : > { %v1827_v2 = vpop.f32.mrf.mxu1 }
 0x371   : > { %v1844_v54 = vrot.slane %v1843_v15, 4  ;;  %v1881_v36 = vadd.f32 %v1880_v12, %v1866_v55  ;;  %2235 = vst [vmem:[%s3746_s11 + $0x38] sm:$0xff] %v2227_v56  }
 0x373   : > { %v1845_v13 = vadd.f32 %v1844_v54, %v1843_v15  ;;  %v1882_v47 = vrot.slane %v1881_v36, 4 }
 0x375   : > { %v1846_v38 = vrot.slane %v1845_v13, 2  ;;  %v1883_v20 = vadd.f32 %v1882_v47, %v1881_v36 }
 0x377   : > { %v1847_v26 = vadd.f32 %v1846_v38, %v1845_v13  ;;  %v1884_v19 = vrot.slane %v1883_v20, 2 }
 0x379   : > { %v1848_v10 = vrot.slane %v1847_v26, 1  ;;  %v1885_v39 = vadd.f32 %v1884_v19, %v1883_v20 }
 0x37b   : > { %v1849_v48 = vadd.f32 %v1848_v10, %v1847_v26  ;;  %v1886_v29 = vrot.slane %v1885_v39, 1 }
 0x37d   : > { %1850 = vst [vmem:[%s273_s13] sm:$0x1] %v1849_v48  ;;  %v1887_v62 = vadd.f32 %v1886_v29, %v1885_v39 }
 0x37f   : > { %1888 = vst [vmem:[%s276_s16] sm:$0x1] %v1887_v62 }
 0x380 PF: > { %s17_s21 = sadd.s32 1, %s2706_s21  }
 0x381   : > { %p14_p5 = scmp.ge.s32.totalorder %s17_s21, 6  }
 0x383   :  { %16 = sbr.rel (!%p14_p5) target bundleno = 1 (0x1), region = 90 }

// kernel: encoder_forward.3
= control target key start
LH: loop header
LB: loop body
LE: loop exit
PB: predicated region body
PF: predicated region fallthrough
CT: control target
= control target key end

     0   :  { %s4569_s21 = smov 0   ;;  %s8328_s0 = inlined_call_operand.vmem [shape: bf16[8,64,128], index: 0, kind: input, shape index: {}]   ;;  %s8329_s1 = inlined_call_operand.vmem [shape: f32[1,128], index: 1, kind: input, shape index: {}]   ;;  %s8330_s2 = inlined_call_operand.vmem [shape: f32[1,128], index: 2, kind: input, shape index: {}]   ;;  %s8331_s3 = inlined_call_operand.vmem [shape: bf16[384,256], index: 3, kind: input, shape index: {}]   ;;  %s8332_s4 = inlined_call_operand.vmem [shape: f32[1,256], index: 4, kind: input, shape index: {}]   ;;  %s8333_s5 = inlined_call_operand.vmem [shape: f32[8,256,31], index: 5, kind: output, shape index: {0}]   ;;  %s8334_s6 = inlined_call_operand.vmem [shape: s32[8,256,31], index: 6, kind: output, shape index: {1}]  }
   0x1 LB: > { %s4309_s22 = sadd.s32 4294967295, %s4525_s21   ;;  %p4313_p0 = scmp.ge.s32.totalorder %s4525_s21, 1  ;;  %s4525_s21 = sphi %s4569_s21, %s17_s21  }
   0x2   : > { %p217_p1 = scmp.lt.s32.totalorder %s4525_s21, 5 }
   0x4   : > { %p218_p2 = pnand %p4313_p0, %p217_p1 }
   0x6   : > { %221 = sbr.rel (%p218_p2) target bundleno = 826 (0x33a), region = 40 }
   0xb   : > { %v4447_v0 = vld [vmem:[%s8331_s3 + $0x74] ss:$8 sps:$4 sm:$0xff]   ;;  %v4449_v1 = vld [vmem:[%s8331_s3 + $0x70] ss:$8 sps:$4 sm:$0xff]   ;;  %v4527_v2 = vmov 0   ;;  %s4314_s27 = sshll.u32 %s4309_s22, 1 }
   0xc   : > { %954 = vmatprep.mubr.bf16.mxu1 %v4527_v2  ;;  %809 = vmatprep.subr.bf16.mxu0 %v4447_v0  ;;  %v4450_v3 = vld [vmem:[%s8331_s3 + $0x64] ss:$8 sps:$4 sm:$0xff]   ;;  %v4452_v4 = vld [vmem:[%s8331_s3 + $0x60] ss:$8 sps:$4 sm:$0xff]   ;;  %v4453_v5 = vld [vmem:[%s8331_s3 + $0x54] ss:$8 sps:$4 sm:$0xff]  }
   0xd   : > { %810 = vmatpush1.bf16.msra.mxu0 %v4449_v1  ;;  %v4455_v6 = vld [vmem:[%s8331_s3 + $0x50] ss:$8 sps:$4 sm:$0xff]   ;;  %v4456_v7 = vld [vmem:[%s8331_s3 + $0x44] ss:$8 sps:$4 sm:$0xff]   ;;  %v4458_v8 = vld [vmem:[%s8331_s3 + $0x40] ss:$8 sps:$4 sm:$0xff]  }
   0xe   : > { %811 = vmatprep.subr.bf16.mxu0 %v4450_v3  ;;  %v4470_v9 = vld [vmem:[%s8331_s3 + $0x174] ss:$8 sps:$4 sm:$0xff]   ;;  %v4473_v10 = vld [vmem:[%s8331_s3 + $0x170] ss:$8 sps:$4 sm:$0xff]   ;;  %v4476_v12 = vld [vmem:[%s8331_s3 + $0x164] ss:$8 sps:$4 sm:$0xff]  }
   0xf   : > { %v4459_v11 = vld [vmem:[%s8331_s3 + $0x34] ss:$8 sps:$4 sm:$0xff]   ;;  %922 = vmatprep.subr.bf16.mxu1 %v4470_v9  ;;  %v4479_v13 = vld [vmem:[%s8331_s3 + $0x160] ss:$8 sps:$4 sm:$0xff]   ;;  %v4461_v14 = vld [vmem:[%s8331_s3 + $0x30] ss:$8 sps:$4 sm:$0xff]  }
  0x10   : > { %923 = vmatpush1.bf16.msra.mxu1 %v4473_v10  ;;  %v4462_v15 = vld [vmem:[%s8331_s3 + $0x24] ss:$8 sps:$4 sm:$0xff]   ;;  %v4482_v16 = vld [vmem:[%s8331_s3 + $0x154] ss:$8 sps:$4 sm:$0xff]   ;;  %p256_p3 = scmp.lt.s32.totalorder %s4314_s27, 7  ;;  %vm485_vm0 = vcmask 1046528  }
  0x11   : > { %812 = vmatpush1.bf16.msra.mxu0 %v4452_v4  ;;  %924 = vmatprep.subr.bf16.mxu1 %v4476_v12  ;;  %v4485_v17 = vld [vmem:[%s8331_s3 + $0x150] ss:$8 sps:$4 sm:$0xff]   ;;  %v4464_v18 = vld [vmem:[%s8331_s3 + $0x20] ss:$8 sps:$4 sm:$0xff]   ;;  %v4488_v19 = vld [vmem:[%s8331_s3 + $0x144] ss:$8 sps:$4 sm:$0xff]  }
  0x12   : > { %813 = vmatprep.subr.bf16.mxu0 %v4453_v5  ;;  %v4465_v20 = vld [vmem:[%s8331_s3 + $0x14] ss:$8 sps:$4 sm:$0xff]   ;;  %s9418_s27 = smov (!%p256_p3, %s4314_s27), 7  ;;  %v4467_v21 = vld [vmem:[%s8331_s3 + $0x10] ss:$8 sps:$4 sm:$0xff]   ;;  %vm436_vm1 = vcmask 1040384  }
  0x13   : > { %v4491_v22 = vld [vmem:[%s8331_s3 + $0x140] ss:$8 sps:$4 sm:$0xff]   ;;  %v4494_v23 = vld [vmem:[%s8331_s3 + $0x134] ss:$8 sps:$4 sm:$0xff]   ;;  %v4468_v24 = vld [vmem:[%s8331_s3 + $0x4] ss:$8 sps:$4 sm:$0xff]  }
  0x14   : > { %925 = vmatpush1.bf16.msra.mxu1 %v4479_v13  ;;  %s4389_s28 = sshll.u32 %s9418_s27, 5  ;;  %v4497_v25 = vld [vmem:[%s8331_s3 + $0x130] ss:$8 sps:$4 sm:$0xff]   ;;  %v4472_v26 = vld [vmem:[%s8331_s3] ss:$8 sps:$4 sm:$0xff]   ;;  %vm4373_vm2 = vmneg %vm436_vm1  ;;  %vm4528_vm3 = vmmov 1  }
  0x15   : > { %814 = vmatpush1.bf16.msra.mxu0 %v4455_v6  ;;  %926 = vmatprep.subr.bf16.mxu1 %v4482_v16  ;;  %v4500_v27 = vld [vmem:[%s8331_s3 + $0x124] ss:$8 sps:$4 sm:$0xff]   ;;  %v4474_v28 = vld [vmem:[%s8331_s3 + $0xf4] ss:$8 sps:$4 sm:$0xff]   ;;  %s4668_s14 = scalar_lea.vmem %s8328_s0, %s4389_s28  ;;  %v4478_v29 = vld [vmem:[%s8331_s3 + $0xf0] ss:$8 sps:$4 sm:$0xff]  }
  0x16   : > { %815 = vmatprep.subr.bf16.mxu0 %v4456_v7  ;;  %v4503_v30 = vld [vmem:[%s8331_s3 + $0x120] ss:$8 sps:$4 sm:$0xff]   ;;  %v4506_v31 = vld [vmem:[%s8331_s3 + $0x114] ss:$8 sps:$4 sm:$0xff]   ;;  %v4480_v33 = vld [vmem:[%s8331_s3 + $0xe4] ss:$8 sps:$4 sm:$0xff]  }
  0x17   : > { %v4393_v32 = vld [vmem:[%s4668_s14] sm:$0xff]   ;;  %v4424_v36 = vld [vmem:[%s4668_s14 + $0x8] sm:$0xff]   ;;  %v4425_v41 = vld [vmem:[%s4668_s14 + $0x10] sm:$0xff]   ;;  %vm1449_vm6 = vcmask 1042434   ;;  %vm1451_vm7 = vcmask 1044484   ;;  %vm1453_vm8 = vcmask 1046534  }
  0x18   : > { %927 = vmatpush1.bf16.msra.mxu1 %v4485_v17  ;;  %v4394_v34 = vunpack.c.l.bf16 %v4393_v32  ;;  %v4395_v35 = vunpack.c.h.bf16 %v4393_v32  ;;  %v4687_v37 = vld [vmem:[%s8329_s1] ss:$0 sm:$0xff]  ;;  %v4398_v38 = vunpack.c.l.bf16 %v4424_v36  ;;  %v4399_v40 = vunpack.c.h.bf16 %v4424_v36  ;;  %v4509_v42 = vld [vmem:[%s8331_s3 + $0x110] ss:$8 sps:$4 sm:$0xff]   ;;  %v4512_v49 = vld [vmem:[%s8331_s3 + $0x104] ss:$8 sps:$4 sm:$0xff]  }
  0x19   : > { %816 = vmatpush1.bf16.msra.mxu0 %v4458_v8  ;;  %928 = vmatprep.subr.bf16.mxu1 %v4488_v19  ;;  %v4692_v39 = vld [vmem:[%s8330_s2] ss:$0 sm:$0xff]  ;;  %v4402_v45 = vunpack.c.l.bf16 %v4425_v41  ;;  %v4403_v46 = vunpack.c.h.bf16 %v4425_v41  ;;  %v4426_v47 = vld [vmem:[%s4668_s14 + $0x18] sm:$0xff]   ;;  %v4492_v5 = vld [vmem:[%s8331_s3 + $0xc4] ss:$8 sps:$4 sm:$0xff]   ;;  %s4390_s18 = sshll.u32 %s9418_s27, 8 }
  0x1a   : > { %817 = vmatprep.subr.bf16.mxu0 %v4459_v11  ;;  %v316_v43 = vmul.f32 %v4394_v34, %v4687_v37  ;;  %v317_v44 = vmul.f32 %v4395_v35, %v4687_v37  ;;  %v4484_v48 = vld [vmem:[%s8331_s3 + $0xe0] ss:$8 sps:$4 sm:$0xff]   ;;  %v318_v50 = vmul.f32 %v4398_v38, %v4687_v37  ;;  %v319_v51 = vmul.f32 %v4399_v40, %v4687_v37  ;;  %v4486_v53 = vld [vmem:[%s8331_s3 + $0xd4] ss:$8 sps:$4 sm:$0xff]   ;;  %v4490_v0 = vld [vmem:[%s8331_s3 + $0xd0] ss:$8 sps:$4 sm:$0xff]   ;;  %s7292_s23 = scalar_lea.vmem %s8333_s5, %s4390_s18  ;;  %s7906_s26 = scalar_lea.vmem %s8334_s6, %s4390_s18 }
  0x1b   : > { %v4406_v52 = vunpack.c.l.bf16 %v4426_v47  ;;  %v320_v56 = vmul.f32 %v4402_v45, %v4687_v37  ;;  %v4515_v59 = vld [vmem:[%s8331_s3 + $0x100] ss:$8 sps:$4 sm:$0xff]   ;;  %v321_v63 = vmul.f32 %v4403_v46, %v4687_v37  ;;  %v4407_v13 = vunpack.c.h.bf16 %v4426_v47  ;;  %v4498_v19 = vld [vmem:[%s8331_s3 + $0xb4] ss:$8 sps:$4 sm:$0xff]   ;;  %vm4810_vm4 = vmpackc.low %vm4528_vm3, %vm4373_vm2 }
  0x1c   : > { %929 = vmatpush1.bf16.msra.mxu1 %v4491_v22  ;;  %v339_v54 = vadd.f32 %v4692_v39, %v316_v43  ;;  %v340_v55 = vadd.f32 %v4692_v39, %v317_v44  ;;  %v341_v57 = vadd.f32 %v4692_v39, %v318_v50  ;;  %v342_v58 = vadd.f32 %v4692_v39, %v319_v51  ;;  %v4502_v22 = vld [vmem:[%s8331_s3 + $0xb0] ss:$8 sps:$4 sm:$0xff]   ;;  %v4510_v35 = vld [vmem:[%s8331_s3 + $0x94] ss:$8 sps:$4 sm:$0xff]   ;;  %vm4833_vm5 = vmpackc.low %vm485_vm0, %vm4528_vm3 }
  0x1d   : > { %818 = vmatpush1.bf16.msra.mxu0 %v4461_v14  ;;  %930 = vmatprep.subr.bf16.mxu1 %v4494_v23  ;;  %v343_v62 = vadd.f32 %v4692_v39, %v320_v56  ;;  %v322_v4 = vmul.f32 %v4406_v52, %v4687_v37  ;;  %v344_v12 = vadd.f32 %v4692_v39, %v321_v63  ;;  %v4496_v14 = vld [vmem:[%s8331_s3 + $0xc0] ss:$8 sps:$4 sm:$0xff]   ;;  %v4514_v43 = vld [vmem:[%s8331_s3 + $0x90] ss:$8 sps:$4 sm:$0xff]   ;;  %vm5110_vm9 = vmor %vm436_vm1, %vm1449_vm6 }
  0x1e   : > { %819 = vmatprep.subr.bf16.mxu0 %v4462_v15  ;;  %v4720_v60 = vmax.f32 %v339_v54, 0.0  ;;  %v4722_v61 = vmax.f32 %v340_v55, 0.0  ;;  %v4729_v1 = vmax.f32 %v341_v57, 0.0  ;;  %v4731_v3 = vmax.f32 %v342_v58, 0.0  ;;  %vm5136_vm10 = vmor %vm5110_vm9, %vm1451_vm7 }
  0x1f   : > { %v4742_v10 = vmax.f32 %v343_v62, 0.0  ;;  %vm5168_vm11 = vmor %vm5136_vm10, %vm1453_vm8 }
  0x20   : > { %931 = vmatpush1.bf16.msra.mxu1 %v4497_v25  ;;  %v486_v6 = vrot.slane %v4720_v60, 1  ;;  %v487_v7 = vrot.slane %v4722_v61, 1  ;;  %v535_v8 = vpack.c.bf16 %v4722_v61, %v4720_v60  ;;  %v489_v9 = vrot.slane %v4729_v1, 1 }
  0x21   : > { %820 = vmatpush1.bf16.msra.mxu0 %v4464_v18  ;;  %932 = vmatprep.subr.bf16.mxu1 %v4500_v27  ;;  %v491_v16 = vrot.slane %v4731_v3, 1  ;;  %v493_v17 = vrot.slane %v4742_v10, 1  ;;  %v345_v18 = vadd.f32 %v4692_v39, %v322_v4  ;;  %v4763_v25 = vmax.f32 %v344_v12, 0.0  ;;  %v4504_v27 = vld [vmem:[%s8331_s3 + $0xa4] ss:$8 sps:$4 sm:$0xff]  }
  0x22   : > { %821 = vmatprep.subr.bf16.mxu0 %v4465_v20  ;;  %v488_v11 = vsel %vm485_vm0, %v486_v6, %v487_v7  ;;  %841 = vmatprep.mubr.bf16.mxu0 %v535_v8  ;;  %v490_v15 = vsel %vm485_vm0, %v487_v7, %v489_v9  ;;  %v437_v41 = vrot.slane %v4720_v60, 7  ;;  %v440_v62 = vrot.slane %v4729_v1, 7  ;;  %v4430_v8 = vld [vmem:[%s4668_s14 + $0x38] sm:$0xff]  }
  0x23   : > { %v536_v20 = vpack.c.bf16 %v490_v15, %v488_v11  ;;  %v492_v23 = vsel %vm485_vm0, %v489_v9, %v491_v16  ;;  %v495_v32 = vrot.slane %v4763_v25, 1  ;;  %v442_v63 = vrot.slane %v4731_v3, 7 }
  0x24   : > { %933 = vmatpush1.bf16.msra.mxu1 %v4503_v30  ;;  %v4427_v30 = vld [vmem:[%s4668_s14 + $0x20] sm:$0xff]   ;;  %v538_v4 = vpack.c.bf16 %v4731_v3, %v4729_v1 }
  0x25   : > { %822 = vmatpush1.bf16.msra.mxu0 %v4467_v21  ;;  %934 = vmatprep.subr.bf16.mxu1 %v4506_v31  ;;  %v323_v21 = vmul.f32 %v4407_v13, %v4687_v37  ;;  %v4508_v31 = vld [vmem:[%s8331_s3 + $0xa0] ss:$8 sps:$4 sm:$0xff]   ;;  %v4410_v38 = vunpack.c.l.bf16 %v4427_v30  ;;  %v4411_v40 = vunpack.c.h.bf16 %v4427_v30  ;;  %v496_v44 = vsel %vm485_vm0, %v493_v17, %v495_v32 }
  0x26   : > { %823 = vmatprep.subr.bf16.mxu0 %v4468_v24  ;;  %v494_v24 = vsel %vm485_vm0, %v491_v16, %v493_v17  ;;  %v443_v3 = vsel %vm436_vm1, %v440_v62, %v442_v63 }
  0x27   : > { %v346_v34 = vadd.f32 %v4692_v39, %v323_v21  ;;  %v324_v50 = vmul.f32 %v4410_v38, %v4687_v37  ;;  %v325_v51 = vmul.f32 %v4411_v40, %v4687_v37 }
  0x28   : > { %935 = vmatpush1.bf16.msra.mxu1 %v4509_v42  ;;  %v438_v42 = vrot.slane %v4722_v61, 7 }
  0x29   : > { %824 = vmatpush1.bf16.msra.mxu0 %v4472_v26  ;;  %936 = vmatprep.subr.bf16.mxu1 %v4512_v49  ;;  %v4765_v26 = vmax.f32 %v345_v18, 0.0  ;;  %v4789_v46 = vmax.f32 %v346_v34, 0.0  ;;  %v4429_v49 = vld [vmem:[%s4668_s14 + $0x30] sm:$0xff]   ;;  %v347_v58 = vadd.f32 %v4692_v39, %v324_v50 }
  0x2a   : > { %825 = vmatprep.subr.bf16.mxu0 %v4474_v28  ;;  %v4428_v28 = vld [vmem:[%s4668_s14 + $0x28] sm:$0xff]   ;;  %v439_v54 = vsel %vm436_vm1, %v437_v41, %v438_v42  ;;  %v4418_v57 = vunpack.c.l.bf16 %v4429_v49  ;;  %v441_v1 = vsel %vm436_vm1, %v438_v42, %v440_v62  ;;  %v4419_v21 = vunpack.c.h.bf16 %v4429_v49 }
  0x2b   : > { %v4414_v36 = vunpack.c.l.bf16 %v4428_v28  ;;  %v499_v55 = vrot.slane %v4789_v46, 1  ;;  %v4415_v60 = vunpack.c.h.bf16 %v4428_v28  ;;  %v4375_v61 = vpack.c.bf16 %v439_v54, %v437_v41 }
  0x2c   : > { %937 = vmatpush1.bf16.msra.mxu1 %v4515_v59  ;;  %v348_v59 = vadd.f32 %v4692_v39, %v325_v51  ;;  %v328_v7 = vmul.f32 %v4418_v57, %v4687_v37  ;;  %v4822_v9 = vmax.f32 %v347_v58, 0.0  ;;  %v4423_v41 = vunpack.c.h.bf16 %v4430_v8 }
  0x2d   : > { %826 = vmatpush2.bf16.msra.mxu0 %v4478_v29  ;;  %v539_v29 = vpack.c.bf16 %v494_v24, %v492_v23  ;;  %v326_v47 = vmul.f32 %v4414_v36, %v4687_v37  ;;  %v327_v12 = vmul.f32 %v4415_v60, %v4687_v37  ;;  %v541_v23 = vpack.c.bf16 %v4763_v25, %v4742_v10 }
  0x2e   : > { %827 = vmatprep.subr.bf16.mxu0 %v4480_v33  ;;  %v497_v33 = vrot.slane %v4765_v26, 1  ;;  %v4824_v11 = vmax.f32 %v348_v59, 0.0  ;;  %v501_v16 = vrot.slane %v4822_v9, 1  ;;  %v444_v24 = vrot.slane %v4742_v10, 7 }
  0x2f   : > { %955 = vmatmul.mubr.bf16.vlgmr.msra.gmra.mxu1 %v536_v20  ;;  %v349_v56 = vadd.f32 %v4692_v39, %v326_v47  ;;  %v350_v20 = vadd.f32 %v4692_v39, %v327_v12  ;;  %v331_v51 = vmul.f32 %v4423_v41, %v4687_v37  ;;  %v452_v57 = vrot.slane %v4822_v9, 7 }
  0x30   : > { %964 = vmatprep.mubr.bf16.mxu1 %v4527_v2  ;;  %v498_v45 = vsel %vm485_vm0, %v495_v32, %v497_v33  ;;  %v502_v17 = vrot.slane %v4824_v11, 1  ;;  %v445_v10 = vsel %vm436_vm1, %v442_v63, %v444_v24  ;;  %v547_v58 = vpack.c.bf16 %v4824_v11, %v4822_v9 }
  0x31   : > { %828 = vmatpush2.bf16.msra.mxu0 %v4484_v48  ;;  %v4516_v48 = vld [vmem:[%s8331_s3 + $0x84] ss:$8 sps:$4 sm:$0xff]   ;;  %v542_v52 = vpack.c.bf16 %v498_v45, %v496_v44  ;;  %v4818_v6 = vmax.f32 %v349_v56, 0.0  ;;  %v4854_v32 = vmax.f32 %v350_v20, 0.0  ;;  %v448_v44 = vrot.slane %v4765_v26, 7 }
  0x32   : > { %829 = vmatprep.subr.bf16.mxu0 %v4486_v53  ;;  %v4518_v53 = vld [vmem:[%s8331_s3 + $0x80] ss:$8 sps:$4 sm:$0xff]   ;;  %v503_v28 = vsel %vm485_vm0, %v501_v16, %v502_v17  ;;  %v450_v45 = vrot.slane %v4789_v46, 7 }
  0x33   : > { %v504_v18 = vrot.slane %v4818_v6, 1 }
  0x35   : > { %830 = vmatpush2.bf16.msra.mxu0 %v4490_v0 }
  0x36   : > { %831 = vmatprep.subr.bf16.mxu0 %v4492_v5  ;;  %v500_v5 = vsel %vm485_vm0, %v497_v33, %v499_v55  ;;  %v329_v33 = vmul.f32 %v4419_v21, %v4687_v37 }
  0x37   : > { %965 = vmatmul.mubr.bf16.gmra.mxu1 %v539_v29  ;;  %v4382_v13 = vpack.c.bf16 %v499_v55, %v500_v5  ;;  %v505_v29 = vsel %vm485_vm0, %v502_v17, %v504_v18  ;;  %v550_v5 = vpack.c.bf16 %v4854_v32, %v4818_v6 }
  0x38   : > { %974 = vmatprep.mubr.bf16.mxu1 %v4527_v2  ;;  %v352_v40 = vadd.f32 %v4692_v39, %v329_v33 }
  0x39   : > { %832 = vmatpush2.bf16.msra.mxu0 %v4496_v14  ;;  %v4422_v14 = vunpack.c.l.bf16 %v4430_v8  ;;  %v457_v8 = vrot.slane %v4854_v32, 7 }
  0x3a   : > { %833 = vmatprep.subr.bf16.mxu0 %v4498_v19  ;;  %v351_v19 = vadd.f32 %v4692_v39, %v328_v7  ;;  %v368_v50 = vmax.f32 %v352_v40, 0.0  ;;  %v455_v7 = vrot.slane %v4818_v6, 7 }
  0x3c   : > { %v4851_v30 = vmax.f32 %v351_v19, 0.0  ;;  %v510_v54 = vrot.slane %v368_v50, 1 }
  0x3d   : > { %834 = vmatpush2.bf16.msra.mxu0 %v4502_v22  ;;  %v537_v22 = vpack.c.bf16 %v443_v3, %v441_v1  ;;  %v458_v1 = vsel %vm436_vm1, %v455_v7, %v457_v8 }
  0x3e   : > { %835 = vmatprep.subr.bf16.mxu0 %v4504_v27  ;;  %v446_v27 = vrot.slane %v4763_v25, 7  ;;  %v548_v25 = vpack.c.bf16 %v505_v29, %v503_v28  ;;  %v508_v36 = vrot.slane %v4851_v30, 1  ;;  %v553_v6 = vpack.c.bf16 %v368_v50, %v4851_v30 }
  0x3f   : > { %975 = vmatmul.mubr.bf16.gmra.mxu1 %v542_v52 }
  0x40   : > { %984 = vmatprep.mubr.bf16.mxu1 %v4527_v2  ;;  %v447_v34 = vsel %vm436_vm1, %v444_v24, %v446_v27  ;;  %v511_v59 = vsel %vm485_vm0, %v508_v36, %v510_v54 }
  0x41   : > { %836 = vmatpush2.bf16.msra.mxu0 %v4508_v31  ;;  %v330_v31 = vmul.f32 %v4422_v14, %v4687_v37  ;;  %v540_v42 = vpack.c.bf16 %v447_v34, %v445_v10  ;;  %v453_v37 = vrot.slane %v4824_v11, 7  ;;  %v4531_v10 = vmov 1983009808  }
  0x42   : > { %837 = vmatprep.subr.bf16.mxu0 %v4510_v35  ;;  %v506_v35 = vrot.slane %v4854_v32, 1 }
  0x43   : > { %v353_v38 = vadd.f32 %v4692_v39, %v330_v31  ;;  %v456_v12 = vsel %vm436_vm1, %v453_v37, %v455_v7 }
  0x44   : > { %v507_v47 = vsel %vm485_vm0, %v504_v18, %v506_v35  ;;  %v549_v3 = vpack.c.bf16 %v458_v1, %v456_v12 }
  0x45   : > { %838 = vmatpush2.bf16.msra.mxu0 %v4514_v43  ;;  %v544_v43 = vpack.c.bf16 %v4789_v46, %v4765_v26  ;;  %v369_v49 = vmax.f32 %v353_v38, 0.0  ;;  %v451_v26 = vsel %vm436_vm1, %v448_v44, %v450_v45  ;;  %v354_v46 = vadd.f32 %v4692_v39, %v331_v51 }
  0x46   : > { %839 = vmatprep.subr.bf16.mxu0 %v4516_v48  ;;  %v509_v48 = vsel %vm485_vm0, %v506_v35, %v508_v36  ;;  %v454_v39 = vsel %vm436_vm1, %v452_v57, %v453_v37 }
  0x47   : > { %4383 = vmatmul.mubr.msk.bf16.gmra.mxu1 %vm4833_vm5, %v4382_v13  ;;  %v551_v52 = vpack.c.bf16 %v509_v48, %v507_v47  ;;  %v512_v55 = vrot.slane %v369_v49, 1  ;;  %v459_v13 = vrot.slane %v4851_v30, 7  ;;  %v463_v18 = vrot.slane %v369_v49, 7 }
  0x48   : > { %994 = vmatprep.mubr.bf16.mxu1 %v4527_v2 }
  0x49   : > { %840 = vmatpush2.bf16.msra.mxu0 %v4518_v53  ;;  %v449_v53 = vsel %vm436_vm1, %v446_v27, %v448_v44  ;;  %v513_v60 = vsel %vm485_vm0, %v510_v54, %v512_v55  ;;  %v460_v0 = vsel %vm436_vm1, %v457_v8, %v459_v13  ;;  %v4530_v27 = vmov 842150450   ;;  %v419_v44 = vld [vmem:[%s8332_s4] sm:$0x3] }
  0x4a   : > { %v543_v56 = vpack.c.bf16 %v451_v26, %v449_v53  ;;  %v554_v62 = vpack.c.bf16 %v513_v60, %v511_v59  ;;  %v1912_v28 = vunpack.c.l.s4 %v4530_v27  ;;  %v4533_v60 = vmov 1987475062  }
  0x4c   : > { %4376 = vmatmul.mubr.msk.bf16.vlgmr.msra.gmra.mxu0 %vm4810_vm4, %v4375_v61  ;;  %v370_v61 = vmax.f32 %v354_v46, 0.0  ;;  %v1913_v32 = vunpack.c.0.s8 %v1912_v28 }
  0x4d   : > { %851 = vmatprep.mubr.bf16.mxu0 %v538_v4  ;;  %v4379_v4 = vpack.c.bf16 %v454_v39, %v452_v57 }
  0x4e   : > { %v514_v63 = vrot.slane %v370_v61, 1  ;;  %v556_v17 = vpack.c.bf16 %v370_v61, %v369_v49  ;;  %v465_v19 = vrot.slane %v370_v61, 7  ;;  %v1926_v61 = vunpack.c.l.s4 %v4533_v60 }
  0x4f   : > { %995 = vmatmul.mubr.bf16.gmra.mxu1 %v548_v25  ;;  %v1102_v25 = vunpack.c.l.s4 %v4531_v10 }
  0x50   : > { %1004 = vmatprep.mubr.bf16.mxu1 %v4527_v2  ;;  %v515_v9 = vsel %vm485_vm0, %v512_v55, %v514_v63  ;;  %v466_v20 = vsel %vm436_vm1, %v463_v18, %v465_v19 }
  0x51   : > { %v4385_v11 = vpack.c.bf16 %v514_v63, %v515_v9  ;;  %v1103_v45 = vunpack.c.0.s8 %v1102_v25 }
  0x54   : > { %852 = vmatmul.mubr.bf16.gmra.mxu0 %v537_v22  ;;  %v559_v22 = vlaneseq }
  0x55   : > { %861 = vmatprep.mubr.bf16.mxu0 %v541_v23  ;;  %v4529_v23 = vmov 269488144  }
  0x56   : > { %v1905_v24 = vunpack.c.l.s4 %v4529_v23  ;;  %v4900_v29 = vshrl.u32 %v559_v22, 7 }
  0x57   : > { %1005 = vmatmul.mubr.bf16.gmra.mxu1 %v551_v52 }
  0x58   : > { %1014 = vmatprep.mubr.bf16.mxu1 %v4527_v2  ;;  %v4903_v30 = vmul.u32 2, %v4900_v29  ;;  %v1906_v31 = vunpack.c.0.s8 %v1905_v24  ;;  %v1707_v33 = vadd.s32 8, %v4900_v29  ;;  %v4913_v36 = vsub.s32 %v1913_v32, %v4900_v29 }
  0x59   : > { %v1708_v38 = vadd.s32 16, %v4900_v29  ;;  %v1709_v54 = vadd.s32 24, %v4900_v29  ;;  %v4989_v12 = vsub.s32 3, %v4900_v29 }
  0x5a   : > { %v4907_v34 = vadd.s32 1, %v4903_v30  ;;  %v4910_v35 = vsub.s32 %v1906_v31, %v4900_v29  ;;  %8736 = vst [vmem:[#allocation2_spill] sm:$0xff] %v4913_v36  ;;  %v4918_v41 = vmul.u32 2, %v1707_v33  ;;  %v4932_v48 = vadd.s32 2, %v4903_v30 }
  0x5b   : > { %v4942_v51 = vmul.u32 2, %v1708_v38  ;;  %v4948_v53 = vrot.slane %v4903_v30, %v4913_v36 }
  0x5c   : > { %862 = vmatmul.mubr.bf16.gmra.mxu0 %v540_v42  ;;  %v561_v42 = vsub.s32 0, %v4900_v29  ;;  %v4929_v47 = vrot.slane %v4907_v34, %v4910_v35  ;;  %v4936_v49 = vrot.slane %v4907_v34, %v4913_v36  ;;  %v4951_v26 = vadd.s32 1, %v4918_v41 }
  0x5d   : > { %871 = vmatprep.mubr.bf16.mxu0 %v544_v43  ;;  %v4922_v43 = vsub.s32 1, %v4900_v29  ;;  %8740 = vst [vmem:[#allocation6_spill] sm:$0xff] %v4942_v51  ;;  %8741 = vst [vmem:[#allocation7_spill] sm:$0xff] %v4948_v53  ;;  %v4964_v37 = vrot.slane %v4932_v48, %v4910_v35  ;;  %v4967_v59 = vadd.s32 2, %v4918_v41  ;;  %v4993_v1 = vrot.slane %v4918_v41, %v4910_v35 }
  0x5e   : > { %8737 = vst [vmem:[#allocation3_spill] sm:$0xff] %v4929_v47  ;;  %8738 = vst [vmem:[#allocation4_spill] sm:$0xff] %v4936_v49  ;;  %v4954_v55 = vrot.slane %v419_v44, %v561_v42  ;;  %v4980_v8 = vrot.slane %v4951_v26, %v4910_v35  ;;  %v4984_v9 = vrot.slane %v4951_v26, %v4913_v36 }
  0x5f   : > { %1015 = vmatmul.mubr.bf16.gmra.mxu1 %v554_v62  ;;  %v4957_v46 = vrot.slane %v419_v44, %v4922_v43  ;;  %8745 = vst [vmem:[#allocation11_spill] sm:$0xff] %v4964_v37  ;;  %8749 = vst [vmem:[#allocation15_spill] sm:$0xff] %v4993_v1  ;;  %v5021_v19 = vrot.slane %v4942_v51, %v4910_v35  ;;  %v5029_v22 = vrot.slane %v4942_v51, %v4913_v36 }
  0x60   : > { %1024 = vmatprep.mubr.bf16.mxu1 %v4527_v2  ;;  %v461_v2 = vrot.slane %v368_v50, 7  ;;  %v4940_v50 = vrot.slane %v4903_v30, %v4910_v35  ;;  %8742 = vst [vmem:[#allocation8_spill] sm:$0xff] %v4954_v55  ;;  %8746 = vst [vmem:[#allocation12_spill] sm:$0xff] %v4980_v8 }
  0x61   : > { %8743 = vst [vmem:[#allocation9_spill] sm:$0xff] %v4957_v46  ;;  %8747 = vst [vmem:[#allocation13_spill] sm:$0xff] %v4984_v9 }
  0x62   : > { %v462_v14 = vsel %vm436_vm1, %v459_v13, %v461_v2  ;;  %v464_v15 = vsel %vm436_vm1, %v461_v2, %v463_v18  ;;  %8739 = vst [vmem:[#allocation5_spill] sm:$0xff] %v4940_v50  ;;  %v5001_v2 = vrot.slane %v4918_v41, %v4913_v36  ;;  %8756 = vst [vmem:[#allocation22_spill] sm:$0xff] %v5021_v19 }
  0x63   : > { %v552_v16 = vpack.c.bf16 %v462_v14, %v460_v0  ;;  %v555_v21 = vpack.c.bf16 %v466_v20, %v464_v15  ;;  %v5005_v0 = vrot.slane %v4967_v59, %v4910_v35  ;;  %v1927_v14 = vunpack.c.0.s8 %v1926_v61  ;;  %8757 = vst [vmem:[#allocation23_spill] sm:$0xff] %v5029_v22 }
  0x64   : > { %872 = vmatmul.mubr.bf16.gmra.mxu0 %v543_v56  ;;  %v4532_v56 = vmov 1414812756   ;;  %8751 = vst [vmem:[#allocation17_spill] sm:$0xff] %v5001_v2 }
  0x65   : > { %881 = vmatprep.mubr.bf16.mxu0 %v547_v58  ;;  %v1919_v57 = vunpack.c.l.s4 %v4532_v56  ;;  %v4960_v58 = vsub.s32 %v1103_v45, %v4900_v29  ;;  %8752 = vst [vmem:[#allocation18_spill] sm:$0xff] %v5005_v0  ;;  %v5050_v38 = vsub.s32 %v1927_v14, %v4900_v29 }
  0x67   : > { %4386 = vmatmul.mubr.msk.bf16.gmra.mxu1 %vm4833_vm5, %v4385_v11  ;;  %8744 = vst [vmem:[#allocation10_spill] sm:$0xff] %v4960_v58  ;;  %v4986_v11 = vmul.u32 2, %v1709_v54  ;;  %8762 = vst [vmem:[#allocation28_spill] sm:$0xff] %v5050_v38  ;;  %v5122_v10 = vrot.slane %v4932_v48, %v5050_v38 }
  0x69   : > { %8748 = vst [vmem:[#allocation14_spill] sm:$0xff] %v4986_v11  ;;  %v5032_v23 = vadd.s32 1, %v4986_v11  ;;  %v5068_v45 = vadd.s32 2, %v4986_v11  ;;  %v5089_v56 = vrot.slane %v4986_v11, %v4910_v35  ;;  %8777 = vst [vmem:[#allocation41_spill] sm:$0xff] %v5122_v10 }
  0x6b   : > { %8758 = vst [vmem:[#allocation24_spill] sm:$0xff] %v5032_v23  ;;  %8764 = vst [vmem:[#allocation30_spill] sm:$0xff] %v5068_v45 }
  0x6c   : > { %4380 = vmatmul.mubr.msk.bf16.gmra.mxu0 %vm4810_vm4, %v4379_v4  ;;  %v4973_v4 = vadd.s32 1, %v4942_v51  ;;  %8769 = vst [vmem:[#allocation35_spill] sm:$0xff] %v5089_v56  ;;  %v8792_v56 = vrot.slane %v4940_v50, 7 }
  0x6d   : > { %891 = vmatprep.mubr.bf16.mxu0 %v550_v5 }
  0x6e   : > { %v5017_v18 = vrot.slane %v4973_v4, %v4913_v36 }
  0x70   : > { %8755 = vst [vmem:[#allocation21_spill] sm:$0xff] %v5017_v18 }
  0x74   : > { %892 = vmatmul.mubr.bf16.gmra.mxu0 %v549_v3  ;;  %v4996_v3 = vadd.s32 2, %v4942_v51 }
  0x75   : > { %901 = vmatprep.mubr.bf16.mxu0 %v553_v6  ;;  %v1920_v6 = vunpack.c.0.s8 %v1919_v57 }
  0x76   : > { %8750 = vst [vmem:[#allocation16_spill] sm:$0xff] %v4996_v3  ;;  %v5037_v28 = vrot.slane %v4996_v3, %v4910_v35  ;;  %v5041_v31 = vrot.slane %v4996_v3, %v4913_v36 }
  0x77   : > { %v5044_v32 = vsub.s32 %v1920_v6, %v4900_v29  ;;  %v5063_v29 = vrot.slane %v5032_v23, %v4910_v35  ;;  %v5081_v6 = vrot.slane %v4907_v34, %v5050_v38 }
  0x78   : > { %8759 = vst [vmem:[#allocation25_spill] sm:$0xff] %v5037_v28  ;;  %8760 = vst [vmem:[#allocation26_spill] sm:$0xff] %v5041_v31 }
  0x79   : > { %8761 = vst [vmem:[#allocation27_spill] sm:$0xff] %v5044_v32  ;;  %8763 = vst [vmem:[#allocation29_spill] sm:$0xff] %v5063_v29  ;;  %v5085_v54 = vrot.slane %v4903_v30, %v5044_v32  ;;  %v5106_v20 = vrot.slane %v4932_v48, %v5044_v32  ;;  %v5150_v62 = vrot.slane %v4918_v41, %v5044_v32 }
  0x7a   : > { %8767 = vst [vmem:[#allocation33_spill] sm:$0xff] %v5081_v6  ;;  %v8810_v6 = vrot.slane %v4993_v1, 7 }
  0x7b   : > { %8768 = vst [vmem:[#allocation34_spill] sm:$0xff] %v5085_v54  ;;  %8773 = vst [vmem:[#allocation39_spill] sm:$0xff] %v5106_v20 }
  0x7c   : > { %902 = vmatmul.mubr.bf16.gmra.mxu0 %v552_v16  ;;  %v5009_v16 = vrot.slane %v4967_v59, %v4913_v36  ;;  %8782 = vst [vmem:[#allocation44_spill] sm:$0xff] %v5150_v62 }
  0x7d   : > { %911 = vmatprep.mubr.bf16.mxu0 %v556_v17  ;;  %v5013_v17 = vrot.slane %v4973_v4, %v4910_v35 }
  0x7e   : > { %8753 = vst [vmem:[#allocation19_spill] sm:$0xff] %v5009_v16 }
  0x7f   : > { %8754 = vst [vmem:[#allocation20_spill] sm:$0xff] %v5013_v17 }
  0x84   : > { %912 = vmatmul.mubr.bf16.gmra.mxu0 %v555_v21 }
  0xef   : > { %v4916_v40 = vpop.f32.mrf.mxu1 }
  0xf1   : > { %v4944_v52 = vpop.f32.mrf.mxu1 }
  0xf3   : > { %v4975_v5 = vpop.f32.mrf.mxu1 }
  0xf5   : > { %v5023_v15 = vpop.f32.mrf.mxu1 }
  0xf7   : > { %v5058_v61 = vpop.f32.mrf.mxu1 }
  0xf9   : > { %v968_v21 = vpop.f32.mrf.mxu1 }
 0x10c   : > { %v843_v24 = vpop.f32.mrf.mxu0 }
 0x10d   : > { %v844_v33 = vadd.f32 %v843_v24, %v4954_v55 }
 0x10e   : > { %v845_v42 = vpop.f32.mrf.mxu0 }
 0x10f   : > { %v957_v57 = vadd.f32 %v4916_v40, %v844_v33  ;;  %v846_v60 = vadd.f32 %v845_v42, %v4957_v46  ;;  %v5072_v40 = vrot.slane %v4907_v34, %v5044_v32  ;;  %v5077_v42 = vrot.slane %v5032_v23, %v4913_v36 }
 0x110   : > { %v847_v14 = vpop.f32.mrf.mxu0  ;;  %v5101_v34 = vrot.slane %v4932_v48, %v4913_v36 }
 0x111   : > { %8765 = vst [vmem:[#allocation31_spill] sm:$0xff] %v5072_v40  ;;  %v959_v33 = vadd.f32 %v4944_v52, %v846_v60  ;;  %8766 = vst [vmem:[#allocation32_spill] sm:$0xff] %v5077_v42  ;;  %v5093_v52 = vrot.slane %v4986_v11, %v4913_v36  ;;  %v5097_v60 = vrot.slane %v4903_v30, %v5050_v38  ;;  %v1035_v44 = vmax.f32 %v957_v57, 0.0 }
 0x112   : > { %v849_v24 = vpop.f32.mrf.mxu0  ;;  %8772 = vst [vmem:[#allocation38_spill] sm:$0xff] %v5101_v34  ;;  %v5117_v57 = vrot.slane %v5068_v45, %v4910_v35  ;;  %v848_v36 = vadd.f32 %v847_v14, %v4954_v55  ;;  %v5146_v35 = vrot.slane %v4951_v26, %v5050_v38  ;;  %v5180_v45 = vrot.slane %v4967_v59, %v5050_v38 }
 0x113   : > { %8770 = vst [vmem:[#allocation36_spill] sm:$0xff] %v5093_v52  ;;  %8771 = vst [vmem:[#allocation37_spill] sm:$0xff] %v5097_v60  ;;  %v1036_v25 = vmax.f32 %v959_v33, 0.0  ;;  %v850_v30 = vadd.f32 %v849_v24, %v4957_v46  ;;  %v5131_v33 = vrot.slane %v4951_v26, %v5044_v32 }
 0x114   : > { %v853_v39 = vpop.f32.mrf.mxu0  ;;  %8776 = vst [vmem:[#allocation40_spill] sm:$0xff] %v5117_v57  ;;  %8781 = vst [vmem:[#allocation43_spill] sm:$0xff] %v5146_v35 }
 0x115   : > { %v1099_v7 = vcombine.low %v1035_v44, %v1036_v25  ;;  %v1100_v13 = vcombine.high %v1035_v44, %v1036_v25  ;;  %8778 = vst [vmem:[#allocation42_spill] sm:$0xff] %v5131_v33  ;;  %v5141_v44 = vpop.f32.mrf.mxu1  ;;  %v963_v27 = vadd.f32 %v5023_v15, %v850_v30  ;;  %v854_v52 = vadd.f32 %v853_v39, %v4954_v55 }
 0x116   : > { %v855_v24 = vpop.f32.mrf.mxu0  ;;  %v8785_v39 = vmov 0  ;;  %v961_v15 = vadd.f32 %v4975_v5, %v848_v36  ;;  %8789 = vst [vmem:[#allocation49_spill] sm:$0xff] %v5180_v45 }
 0x117   : > { %v1107_v25 = vrot.slane %v1099_v7, %v4960_v58  ;;  %v5157_v7 = vrot.slane %v4918_v41, %v5050_v38  ;;  %v5160_v14 = vrot.slane %v1100_v13, %v4960_v58  ;;  %v856_v29 = vadd.f32 %v855_v24, %v4957_v46  ;;  %v972_v11 = vpop.f32.mrf.mxu1 }
 0x118   : > { %v857_v63 = vpop.f32.mrf.mxu0  ;;  %v8786_v39 = vsel %vm5168_vm11, 4294967295, %v8785_v39  ;;  %v5176_v13 = vrot.slane %v4967_v59, %v5044_v32  ;;  %v1038_v5 = vmax.f32 %v963_v27, 0.0  ;;  %v967_v41 = vadd.f32 %v5058_v61, %v854_v52 }
 0x119   : > { %8783 = vst [vmem:[#allocation45_spill] sm:$0xff] %v5157_v7  ;;  %v5162_v26 = vcombine.high %v1107_v25, %v1107_v25  ;;  %v1455_v42 = vrot.slane %v1107_v25, 7  ;;  %8787 = vst [vmem:[#allocation47_spill] sm:$0xff] %v8786_v39  ;;  %v5191_v59 = vcombine.high %v5160_v14, %v5160_v14  ;;  %v1460_v23 = vrot.slane %v5160_v14, 7 }
 0x11a   : > { %v859_v30 = vpop.f32.mrf.mxu0  ;;  %8788 = vst [vmem:[#allocation48_spill] sm:$0xff] %v5176_v13  ;;  %v969_v35 = vadd.f32 %v968_v21, %v856_v29  ;;  %v1037_v27 = vmax.f32 %v961_v15, 0.0  ;;  %v8793_v7 = vrot.slane %v4929_v47, 7  ;;  %v5211_v21 = vrot.slane %v4973_v4, %v5044_v32 }
 0x11b   : > { %8784 = vst [vmem:[#allocation46_spill] sm:$0xff] %v5162_v26  ;;  %v1456_v24 = vrot.slane %v1455_v42, 2  ;;  %v5183_v48 = vrot.slane %v5162_v26, 7  ;;  %vm1776_vm12 = vcmp.gt.f32.partialorder %v1107_v25, %v1455_v42  ;;  %8791 = vst [vmem:[#allocation51_spill] sm:$0xff] %v5191_v59  ;;  %v5215_v29 = vrot.slane %v4973_v4, %v5050_v38 }
 0x11c   : > { %v863_v57 = vpop.f32.mrf.mxu0  ;;  %v5199_v36 = vsel %vm1776_vm12, %v1107_v25, %v1455_v42  ;;  %v2160_v33 = vsel %vm1776_vm12, %v8793_v7, %v8792_v56  ;;  %8794 = vst [vmem:[#allocation52_spill] sm:$0xff] %v5211_v21  ;;  %v8796_v42 = vrot.slane %v4964_v37, 7  ;;  %v1117_v56 = vcombine.low %v1037_v27, %v1038_v5 }
 0x11d   : > { %8790 = vst [vmem:[#allocation50_spill] sm:$0xff] %v5183_v48  ;;  %v5196_v3 = vsel %vm5168_vm11, %v1456_v24, %v5183_v48  ;;  %v976_v24 = vpop.f32.mrf.mxu1  ;;  %8795 = vst [vmem:[#allocation53_spill] sm:$0xff] %v5215_v29  ;;  %v1118_v7 = vcombine.high %v1037_v27, %v1038_v5  ;;  %v5226_v15 = vrot.slane %v4942_v51, %v5044_v32  ;;  %v1462_v52 = vrot.slane %v1460_v23, 2 }
 0x11e   : > { %vm2222_vm13 = vcmp.gt.f32.partialorder %v5196_v3, %v5199_v36  ;;  %v865_v62 = vpop.f32.mrf.mxu0  ;;  %v5229_v61 = vrot.slane %v5191_v59, 7  ;;  %v1039_v21 = vmax.f32 %v967_v41, 0.0  ;;  %v1040_v4 = vmax.f32 %v969_v35, 0.0 }
 0x11f   : > { %v5222_v25 = vsel %vm2222_vm13, %v8796_v42, %v2160_v33  ;;  %8798 = vst [vmem:[#allocation55_spill] sm:$0xff] %v5226_v15  ;;  %v858_v29 = vadd.f32 %v857_v63, %v4954_v55  ;;  %v860_v38 = vadd.f32 %v859_v30, %v4957_v46  ;;  %v864_v45 = vadd.f32 %v863_v57, %v4954_v55  ;;  %v978_v42 = vpop.f32.mrf.mxu1 }
 0x120   : > { %8797 = vst [vmem:[#allocation54_spill] sm:$0xff] %v5222_v25  ;;  %8799 = vst [vmem:[#allocation56_spill] sm:$0xff] %v5229_v61  ;;  %v866_v33 = vadd.f32 %v865_v62, %v4957_v46  ;;  %vm8442_vm14 = vcmp.gt.f32.partialorder %v5162_v26, %v5183_v48  ;;  %vm1778_vm15 = vcmp.gt.f32.partialorder %v5160_v14, %v1460_v23  ;;  %v1459_v32 = vrot.slane %v5183_v48, 2 }
 0x121   : > { %v1135_v5 = vcombine.low %v1039_v21, %v1040_v4  ;;  %v1136_v27 = vcombine.high %v1039_v21, %v1040_v4  ;;  %v5240_v35 = vrot.slane %v1117_v56, %v4960_v58  ;;  %v973_v63 = vadd.f32 %v972_v11, %v860_v38  ;;  %v867_v4 = vpop.f32.mrf.mxu0 }
 0x122   : > { %v979_v41 = vadd.f32 %v978_v42, %v866_v33  ;;  %v5245_v57 = vsel %vm5168_vm11, %v1462_v52, %v5229_v61  ;;  %v5248_v62 = vrot.slane %v1118_v7, %v4960_v58  ;;  %v5257_v11 = vsel %vm8442_vm14, %v5162_v26, %v5183_v48 }
 0x123   : > { %8800 = vst [vmem:[#allocation57_spill] sm:$0xff] %v5240_v35  ;;  %8801 = vst [vmem:[#allocation58_spill] sm:$0xff] %v5245_v57  ;;  %v1143_v30 = vrot.slane %v1135_v5, %v4960_v58  ;;  %v1150_v21 = vrot.slane %v1136_v27, %v4960_v58  ;;  %v5262_v38 = vsel %vm1778_vm15, %v5160_v14, %v1460_v23  ;;  %v8806_v15 = vrot.slane %v4948_v53, 7  ;;  %v869_v20 = vpop.f32.mrf.mxu0 }
 0x124   : > { %8802 = vst [vmem:[#allocation59_spill] sm:$0xff] %v5248_v62  ;;  %8803 = vst [vmem:[#allocation60_spill] sm:$0xff] %v5257_v11  ;;  %v971_v52 = vadd.f32 %v5141_v44, %v858_v29  ;;  %v977_v56 = vadd.f32 %v976_v24, %v864_v45  ;;  %v5271_v42 = vsel %vm5168_vm11, %v1459_v32, %v1460_v23  ;;  %v8807_v51 = vrot.slane %v4936_v49, 7 }
 0x125   : > { %8804 = vst [vmem:[#allocation61_spill] sm:$0xff] %v5262_v38  ;;  %v1151_v7 = vcombine.high %v1143_v30, %v1143_v30  ;;  %v5265_v33 = vcombine.high %v1150_v21, %v1150_v21  ;;  %v5267_v5 = vrot.slane %v1143_v30, 7  ;;  %v1484_v27 = vrot.slane %v1150_v21, 7  ;;  %8805 = vst [vmem:[#allocation62_spill] sm:$0xff] %v5271_v42  ;;  %v873_v54 = vpop.f32.mrf.mxu0 }
 0x126   : > { %v5279_v13 = vsel %vm1778_vm15, %v8807_v51, %v8806_v15  ;;  %v1042_v44 = vmax.f32 %v973_v63, 0.0  ;;  %v1044_v45 = vmax.f32 %v979_v41, 0.0  ;;  %v5287_v32 = vcombine.high %v5240_v35, %v5240_v35  ;;  %v980_v51 = vpop.f32.mrf.mxu1 }
 0x127   : > { %8808 = vst [vmem:[#allocation63_spill] sm:$0xff] %v5279_v13  ;;  %v1480_v24 = vrot.slane %v5267_v5, 2  ;;  %v1481_v29 = vrot.slane %v1151_v7, 7  ;;  %v1486_v25 = vrot.slane %v1484_v27, 2  ;;  %v5283_v10 = vrot.slane %v5265_v33, 7 }
 0x128   : > { %8809 = vst [vmem:[#allocation64_spill] sm:$0xff] %v5287_v32  ;;  %vm1784_vm0 = vcmp.gt.f32.partialorder %v1143_v30, %v5267_v5  ;;  %vm1786_vm1 = vcmp.gt.f32.partialorder %v1150_v21, %v1484_v27  ;;  %v1041_v23 = vmax.f32 %v971_v52, 0.0  ;;  %v1043_v63 = vmax.f32 %v977_v56, 0.0 }
 0x129   : > { %v1482_v14 = vsel %vm5168_vm11, %v1480_v24, %v1481_v29  ;;  %v5295_v15 = vsel %vm5168_vm11, %v1486_v25, %v5283_v10  ;;  %v868_v41 = vadd.f32 %v867_v4, %v4954_v55  ;;  %v1846_v34 = vsel %vm1784_vm0, %v1143_v30, %v5267_v5 }
 0x12a   : > { %v5300_v13 = vsel %vm1786_vm1, %v1150_v21, %v1484_v27  ;;  %v1153_v37 = vcombine.low %v1041_v23, %v1042_v44  ;;  %v870_v52 = vadd.f32 %v869_v20, %v4957_v46  ;;  %v8811_v24 = vrot.slane %v4980_v8, 7 }
 0x12b   : > { %vm2230_vm2 = vcmp.gt.f32.partialorder %v1482_v14, %v1846_v34  ;;  %v1171_v40 = vcombine.low %v1043_v63, %v1044_v45  ;;  %v1172_v25 = vcombine.high %v1043_v63, %v1044_v45  ;;  %v8812_v56 = vrot.slane %v5001_v2, 7 }
 0x12c   : > { %v2168_v60 = vsel %vm1784_vm0, %v8811_v24, %v8810_v6  ;;  %v8813_v4 = vrot.slane %v4984_v9, 7  ;;  %vm8455_vm3 = vcmp.gt.f32.partialorder %v5295_v15, %v5300_v13  ;;  %v8814_v20 = vrot.slane %v5005_v0, 7  ;;  %v982_v6 = vpop.f32.mrf.mxu1 }
 0x12d   : > { %v1154_v53 = vcombine.high %v1041_v23, %v1042_v44  ;;  %v5324_v45 = vsel %vm2222_vm13, %v5196_v3, %v5199_v36  ;;  %v5327_v21 = vrot.slane %v5240_v35, 7  ;;  %vm1785_vm4 = vcmp.gt.f32.partialorder %v1151_v7, %v1481_v29 }
 0x12e   : > { %v2170_v30 = vsel %vm1786_vm1, %v8813_v4, %v8812_v56  ;;  %v5317_v49 = vsel %vm2230_vm2, %v8814_v20, %v2168_v60  ;;  %v8817_v63 = vrot.slane %v5009_v16, 7  ;;  %v5337_v44 = vrot.slane %v5287_v32, 7  ;;  %v875_v16 = vpop.f32.mrf.mxu0  ;;  %v986_v0 = vpop.f32.mrf.mxu1 }
 0x12f   : > { %8815 = vst [vmem:[#allocation65_spill] sm:$0xff] %v5317_v49  ;;  %8816 = vst [vmem:[#allocation66_spill] sm:$0xff] %v5327_v21  ;;  %v5340_v23 = vrot.slane %v5248_v62, 7  ;;  %v1483_v24 = vrot.slane %v1481_v29, 2  ;;  %v981_v3 = vadd.f32 %v980_v51, %v868_v41  ;;  %v5343_v36 = vrot.slane %v1153_v37, %v4960_v58 }
 0x130   : > { %v5334_v60 = vsel %vm8455_vm3, %v8817_v63, %v2170_v30  ;;  %8819 = vst [vmem:[#allocation68_spill] sm:$0xff] %v5337_v44  ;;  %v1179_v56 = vrot.slane %v1171_v40, %v4960_v58  ;;  %v1186_v4 = vrot.slane %v1172_v25, %v4960_v58  ;;  %v983_v20 = vadd.f32 %v982_v6, %v870_v52 }
 0x131   : > { %8818 = vst [vmem:[#allocation67_spill] sm:$0xff] %v5334_v60  ;;  %8820 = vst [vmem:[#allocation69_spill] sm:$0xff] %v5340_v23  ;;  %v5348_v30 = vsel %vm1785_vm4, %v1151_v7, %v1481_v29  ;;  %v5351_v63 = vsel %vm2230_vm2, %v1482_v14, %v1846_v34  ;;  %v5354_v60 = vrot.slane %v1154_v53, %v4960_v58  ;;  %v1045_v7 = vmax.f32 %v981_v3, 0.0  ;;  %v988_v29 = vpop.f32.mrf.mxu1 }
 0x132   : > { %v874_v51 = vadd.f32 %v873_v54, %v4954_v55  ;;  %v5357_v37 = vcombine.high %v1179_v56, %v1179_v56  ;;  %v5359_v41 = vcombine.high %v1186_v4, %v1186_v4  ;;  %v5361_v40 = vrot.slane %v1179_v56, 7 }
 0x133   : > { %v1508_v52 = vrot.slane %v1186_v4, 7  ;;  %v5365_v25 = vsel %vm5168_vm11, %v1483_v24, %v1484_v27  ;;  %v5370_v34 = vsel %vm1785_vm4, %v4980_v8, %v4993_v1  ;;  %v1046_v53 = vmax.f32 %v983_v20, 0.0  ;;  %v877_v24 = vpop.f32.mrf.mxu0 }
 0x134   : > { %8821 = vst [vmem:[#allocation70_spill] sm:$0xff] %v5357_v37  ;;  %8822 = vst [vmem:[#allocation71_spill] sm:$0xff] %v5359_v41  ;;  %v876_v14 = vadd.f32 %v875_v16, %v4957_v46  ;;  %v1504_v54 = vrot.slane %v5361_v40, 2  ;;  %v5375_v6 = vrot.slane %v5357_v37, 7  ;;  %v5378_v2 = vrot.slane %v5359_v41, 7 }
 0x135   : > { %8823 = vst [vmem:[#allocation72_spill] sm:$0xff] %v5370_v34  ;;  %v1510_v9 = vrot.slane %v1508_v52, 2  ;;  %vm1792_vm5 = vcmp.gt.f32.partialorder %v1179_v56, %v5361_v40  ;;  %vm1794_vm9 = vcmp.gt.f32.partialorder %v1186_v4, %v1508_v52  ;;  %v5385_v16 = vcombine.high %v5343_v36, %v5343_v36 }
 0x136   : > { %8824 = vst [vmem:[#allocation73_spill] sm:$0xff] %v5375_v6  ;;  %v1506_v20 = vsel %vm5168_vm11, %v1504_v54, %v5375_v6  ;;  %v987_v27 = vadd.f32 %v986_v0, %v874_v51  ;;  %v1854_v1 = vsel %vm1792_vm5, %v1179_v56, %v5361_v40  ;;  %v5397_v3 = vsel %vm1794_vm9, %v1186_v4, %v1508_v52 }
 0x137   : > { %v5393_v8 = vsel %vm5168_vm11, %v1510_v9, %v5378_v2  ;;  %v1189_v34 = vcombine.low %v1045_v7, %v1046_v53  ;;  %v989_v48 = vadd.f32 %v988_v29, %v876_v14  ;;  %v8825_v26 = vrot.slane %v5021_v19, 7 }
 0x138   : > { %v8826_v47 = vrot.slane %v5013_v17, 7  ;;  %vm2238_vm10 = vcmp.gt.f32.partialorder %v1506_v20, %v1854_v1  ;;  %v1190_v54 = vcombine.high %v1045_v7, %v1046_v53  ;;  %v878_v41 = vadd.f32 %v877_v24, %v4954_v55 }
 0x139   : > { %v1507_v9 = vrot.slane %v5375_v6, 2  ;;  %v8827_v0 = vrot.slane %v5029_v22, 7  ;;  %v8828_v56 = vrot.slane %v5017_v18, 7  ;;  %vm8443_vm12 = vcmp.gt.f32.partialorder %v5393_v8, %v5397_v3 }
 0x13a   : > { %v2176_v50 = vsel %vm1792_vm5, %v8826_v47, %v8825_v26  ;;  %v8829_v14 = vrot.slane %v5037_v28, 7  ;;  %v990_v47 = vpop.f32.mrf.mxu1  ;;  %v879_v26 = vpop.f32.mrf.mxu0  ;;  %vm8440_vm13 = vcmp.gt.f32.partialorder %v5357_v37, %v5375_v6  ;;  %v8831_v4 = vrot.slane %v5041_v31, 7 }
 0x13b   : > { %v2178_v51 = vsel %vm1794_vm9, %v8828_v56, %v8827_v0  ;;  %v5433_v0 = vrot.slane %v5354_v60, 7  ;;  %v5435_v56 = vsel %vm2238_vm10, %v1506_v20, %v1854_v1  ;;  %v5441_v7 = vrot.slane %v1190_v54, %v4960_v58 }
 0x13c   : > { %v5414_v29 = vsel %vm2238_vm10, %v8829_v14, %v2176_v50  ;;  %v5427_v24 = vsel %vm8443_vm12, %v8831_v4, %v2178_v51  ;;  %v5430_v50 = vrot.slane %v5343_v36, 7  ;;  %8833 = vst [vmem:[#allocation76_spill] sm:$0xff] %v5435_v56  ;;  %v5438_v14 = vrot.slane %v1189_v34, %v4960_v58  ;;  %v992_v34 = vpop.f32.mrf.mxu1 }
 0x13d   : > { %8830 = vst [vmem:[#allocation74_spill] sm:$0xff] %v5414_v29  ;;  %8832 = vst [vmem:[#allocation75_spill] sm:$0xff] %v5427_v24  ;;  %v1047_v53 = vmax.f32 %v987_v27, 0.0  ;;  %v1048_v55 = vmax.f32 %v989_v48, 0.0  ;;  %v880_v31 = vadd.f32 %v879_v26, %v4957_v46  ;;  %v5445_v51 = vrot.slane %v5385_v16, 7 }
 0x13e   : > { %8834 = vst [vmem:[#allocation77_spill] sm:$0xff] %v5441_v7  ;;  %v5449_v4 = vsel %vm5168_vm11, %v1507_v9, %v1508_v52  ;;  %v5456_v1 = vsel %vm8440_vm13, %v5357_v37, %v5375_v6  ;;  %v991_v20 = vadd.f32 %v990_v47, %v878_v41  ;;  %vm8453_vm15 = vcmp.gt.f32.partialorder %v5240_v35, %v5327_v21 }
 0x13f   : > { %v1207_v27 = vcombine.low %v1047_v53, %v1048_v55  ;;  %v1208_v54 = vcombine.high %v1047_v53, %v1048_v55  ;;  %v993_v26 = vadd.f32 %v992_v34, %v880_v31  ;;  %v5466_v9 = vcombine.high %v5438_v14, %v5438_v14 }
 0x140   : > { %v5469_v46 = vrot.slane %v5438_v14, 7  ;;  %v5473_v41 = vcombine.high %v5248_v62, %v5248_v62  ;;  %v5476_v55 = vrot.slane %v5441_v7, 7  ;;  %vm8490_vm0 = vcmp.gt.f32.partialorder %v5271_v42, %v5257_v11 }
 0x141   : > { %v5479_v31 = vrot.slane %v1207_v27, %v4960_v58  ;;  %v5482_v47 = vrot.slane %v1208_v54, %v4960_v58  ;;  %v1050_v53 = vmax.f32 %v993_v26, 0.0  ;;  %v1049_v34 = vmax.f32 %v991_v20, 0.0 }
 0x142   : > { %8835 = vst [vmem:[#allocation78_spill] sm:$0xff] %v5469_v46  ;;  %8836 = vst [vmem:[#allocation79_spill] sm:$0xff] %v5473_v41  ;;  %v1465_v48 = vrot.slane %v5229_v61, 2  ;;  %v1468_v52 = vrot.slane %v5327_v21, 2  ;;  %v1471_v24 = vrot.slane %v5337_v44, 2  ;;  %vm8484_vm1 = vcmp.gt.f32.partialorder %v5245_v57, %v5262_v38 }
 0x143   : > { %8837 = vst [vmem:[#allocation80_spill] sm:$0xff] %v5476_v55  ;;  %8838 = vst [vmem:[#allocation81_spill] sm:$0xff] %v5479_v31  ;;  %v5493_v27 = vcombine.high %v5479_v31, %v5479_v31  ;;  %v5497_v54 = vcombine.high %v5482_v47, %v5482_v47  ;;  %v5500_v26 = vrot.slane %v5479_v31, 7  ;;  %v5503_v20 = vrot.slane %v5482_v47, 7 }
 0x144   : > { %8839 = vst [vmem:[#allocation82_spill] sm:$0xff] %v5482_v47  ;;  %v1225_v28 = vcombine.low %v1049_v34, %v1050_v53  ;;  %v1226_v18 = vcombine.high %v1049_v34, %v1050_v53  ;;  %v1474_v22 = vrot.slane %v5340_v23, 2  ;;  %v5507_v29 = vrot.slane %v5473_v41, 7 }
 0x145   : > { %8840 = vst [vmem:[#allocation83_spill] sm:$0xff] %v5497_v54  ;;  %8841 = vst [vmem:[#allocation84_spill] sm:$0xff] %v5500_v26  ;;  %v1528_v6 = vrot.slane %v5500_v26, 2  ;;  %v5511_v37 = vrot.slane %v5493_v27, 7  ;;  %v1534_v17 = vrot.slane %v5503_v20, 2  ;;  %v5515_v19 = vrot.slane %v5497_v54, 7 }
 0x146   : > { %8842 = vst [vmem:[#allocation85_spill] sm:$0xff] %v5503_v20  ;;  %8843 = vst [vmem:[#allocation86_spill] sm:$0xff] %v5507_v29  ;;  %vm8441_vm2 = vcmp.gt.f32.partialorder %v5479_v31, %v5500_v26  ;;  %vm8450_vm4 = vcmp.gt.f32.partialorder %v5482_v47, %v5503_v20  ;;  %v5522_v53 = vrot.slane %v1225_v28, %v4960_v58  ;;  %vm3098_vm5 = vcmask 1041409  }
 0x147   : > { %8844 = vst [vmem:[#allocation87_spill] sm:$0xff] %v5515_v19  ;;  %v5525_v34 = vrot.slane %v1226_v18, %v4960_v58  ;;  %v5528_v49 = vrot.slane %v5466_v9, 7  ;;  %v5533_v54 = vsel %vm5168_vm11, %v1465_v48, %v5327_v21  ;;  %v5538_v56 = vsel %vm5168_vm11, %v1468_v52, %v5337_v44 }
 0x148   : > { %8845 = vst [vmem:[#allocation88_spill] sm:$0xff] %v5522_v53  ;;  %8847 = vst [vmem:[#allocation90_spill] sm:$0xff] %v5533_v54  ;;  %vm8454_vm9 = vcmp.gt.f32.partialorder %v5191_v59, %v5229_v61  ;;  %v5545_v18 = vsel %vm5168_vm11, %v1528_v6, %v5511_v37  ;;  %v5550_v28 = vsel %vm5168_vm11, %v1534_v17, %v5515_v19  ;;  %vm3101_vm10 = vcmask 1043459  }
 0x149   : > { %8846 = vst [vmem:[#allocation89_spill] sm:$0xff] %v5525_v34  ;;  %8848 = vst [vmem:[#allocation91_spill] sm:$0xff] %v5538_v56  ;;  %v5555_v48 = vsel %vm5168_vm11, %v1471_v24, %v5340_v23  ;;  %v5560_v52 = vsel %vm5168_vm11, %v1474_v22, %v5507_v29  ;;  %v5567_v6 = vsel %vm8441_vm2, %v5479_v31, %v5500_v26  ;;  %v5577_v24 = vrot.slane %v5522_v53, 7 }
 0x14a   : > { %8849 = vst [vmem:[#allocation92_spill] sm:$0xff] %v5550_v28  ;;  %8850 = vst [vmem:[#allocation93_spill] sm:$0xff] %v5555_v48  ;;  %v5574_v17 = vsel %vm8450_vm4, %v5482_v47, %v5503_v20  ;;  %v5580_v22 = vrot.slane %v5525_v34, 7  ;;  %v1477_v58 = vrot.slane %v5507_v29, 2  ;;  %vm8451_vm13 = vcmp.gt.f32.partialorder %v5287_v32, %v5337_v44 }
 0x14b   : > { %8851 = vst [vmem:[#allocation94_spill] sm:$0xff] %v5560_v52  ;;  %8852 = vst [vmem:[#allocation95_spill] sm:$0xff] %v5574_v17  ;;  %vm8452_vm2 = vcmp.gt.f32.partialorder %v5248_v62, %v5340_v23  ;;  %vm1783_vm14 = vcmp.gt.f32.partialorder %v5473_v41, %v5507_v29  ;;  %vm3104_vm12 = vcmask 1045509   ;;  %v5594_v47 = vsel %vm8454_vm9, %v5191_v59, %v5229_v61 }
 0x14c   : > { %8853 = vst [vmem:[#allocation96_spill] sm:$0xff] %v5577_v24  ;;  %8854 = vst [vmem:[#allocation97_spill] sm:$0xff] %v5580_v22  ;;  %v5601_v31 = vsel %vm8453_vm15, %v5240_v35, %v5327_v21  ;;  %v5608_v22 = vsel %vm8451_vm13, %v5287_v32, %v5337_v44  ;;  %v5615_v61 = vsel %vm8452_vm2, %v5248_v62, %v5340_v23  ;;  %vm8529_vm2 = vcmask 1047559  }
 0x14d   : > { %8855 = vst [vmem:[#allocation98_spill] sm:$0xff] %v5594_v47  ;;  %8856 = vst [vmem:[#allocation99_spill] sm:$0xff] %v5601_v31  ;;  %v5620_v59 = vsel %vm5168_vm11, %v1477_v58, %v5267_v5  ;;  %v5627_v21 = vsel %vm1783_vm14, %v5473_v41, %v5507_v29  ;;  %vm8483_vm4 = vcmp.gt.f32.partialorder %v5533_v54, %v5594_v47 }
 0x14e   : > { %8857 = vst [vmem:[#allocation100_spill] sm:$0xff] %v5608_v22  ;;  %8858 = vst [vmem:[#allocation101_spill] sm:$0xff] %v5615_v61  ;;  %vm8482_vm13 = vcmp.gt.f32.partialorder %v5538_v56, %v5601_v31  ;;  %vm8463_vm15 = vcmp.gt.f32.partialorder %v5555_v48, %v5608_v22  ;;  %vm8481_vm9 = vcmp.gt.f32.partialorder %v5560_v52, %v5615_v61 }
 0x14f   : > { %8859 = vst [vmem:[#allocation102_spill] sm:$0xff] %v5620_v59  ;;  %8860 = vst [vmem:[#allocation103_spill] sm:$0xff] %v5627_v21  ;;  %vm8472_vm3 = vcmp.gt.f32.partialorder %v5620_v59, %v5627_v21  ;;  %v2285_v58 = vsel %vm8490_vm0, %v5271_v42, %v5257_v11  ;;  %v2286_v5 = vsel %vm8484_vm1, %v5245_v57, %v5262_v38 }
 0x150   : > { %v2287_v29 = vsel %vm8483_vm4, %v5533_v54, %v5594_v47  ;;  %v2288_v41 = vsel %vm8482_vm13, %v5538_v56, %v5601_v31  ;;  %v2289_v11 = vsel %vm8463_vm15, %v5555_v48, %v5608_v22  ;;  %v2290_v38 = vsel %vm8481_vm9, %v5560_v52, %v5615_v61 }
 0x151   : > { %v2291_v47 = vsel %vm8472_vm3, %v5620_v59, %v5627_v21  ;;  %v2609_v31 = vrot.slane %v5324_v45, %v4989_v12  ;;  %v2617_v56 = vrot.slane %v2285_v58, %v4989_v12  ;;  %vm8486_vm15 = vcmp.gt.f32.partialorder %v5343_v36, %v5430_v50 }
 0x152   : > { %v2625_v22 = vrot.slane %v2286_v5, %v4989_v12  ;;  %v2633_v48 = vrot.slane %v2287_v29, %v4989_v12  ;;  %v2641_v61 = vrot.slane %v2288_v41, %v4989_v12  ;;  %v2649_v52 = vrot.slane %v2289_v11, %v4989_v12 }
 0x153   : > { %v2657_v54 = vrot.slane %v2290_v38, %v4989_v12  ;;  %v2665_v21 = vrot.slane %v2291_v47, %v4989_v12  ;;  %v3109_v59 = vsel %vm3098_vm5, %v2617_v56, %v2609_v31  ;;  %v2605_v57 = vrot.slane %v5324_v45, %v4922_v43 }
 0x154   : > { %vm8509_vm3 = vcmp.gt.f32.partialorder %v5365_v25, %v5348_v30  ;;  %v3110_v42 = vsel %vm1449_vm6, %v2625_v22, %v3109_v59  ;;  %v2613_v23 = vrot.slane %v2285_v58, %v4922_v43  ;;  %v2621_v62 = vrot.slane %v2286_v5, %v4922_v43 }
 0x155   : > { %v2629_v44 = vrot.slane %v2287_v29, %v4922_v43  ;;  %v3111_v32 = vsel %vm3101_vm10, %v2633_v48, %v3110_v42  ;;  %v2637_v35 = vrot.slane %v2288_v41, %v4922_v43  ;;  %v2645_v56 = vrot.slane %v2289_v11, %v4922_v43 }
 0x156   : > { %v2653_v31 = vrot.slane %v2290_v38, %v4922_v43  ;;  %v3112_v45 = vsel %vm1451_vm7, %v2641_v61, %v3111_v32  ;;  %v2661_v20 = vrot.slane %v2291_v47, %v4922_v43  ;;  %v3099_v59 = vsel %vm3098_vm5, %v2613_v23, %v2605_v57 }
 0x157   : > { %v5703_v22 = vcombine.high %v5354_v60, %v5354_v60  ;;  %v3113_v29 = vsel %vm3104_vm12, %v2649_v52, %v3112_v45  ;;  %v3100_v42 = vsel %vm1449_vm6, %v2621_v62, %v3099_v59  ;;  %v1489_v41 = vrot.slane %v5283_v10, 2 }
 0x158   : > { %v1492_v11 = vrot.slane %v5430_v50, 2  ;;  %v3114_v38 = vsel %vm1453_vm8, %v2657_v54, %v3113_v29  ;;  %v3102_v61 = vsel %vm3101_vm10, %v2629_v44, %v3100_v42  ;;  %v1495_v32 = vrot.slane %v5445_v51, 2 }
 0x159   : > { %v1498_v57 = vrot.slane %v5433_v0, 2  ;;  %v3115_v23 = vsel %vm8529_vm2, %v2665_v21, %v3114_v38  ;;  %v3103_v47 = vsel %vm1451_vm7, %v2637_v35, %v3102_v61  ;;  %v5718_v62 = vsel %vm5168_vm11, %v1489_v41, %v5430_v50 }
 0x15a   : > { %v5723_v48 = vsel %vm5168_vm11, %v1492_v11, %v5445_v51  ;;  %3258 = vxpose.xlu1.b32.start [1/4] (short) %v3115_v23, 128  ;;  %v3105_v44 = vsel %vm3104_vm12, %v2645_v56, %v3103_v47  ;;  %v5729_v54 = vsel %vm5168_vm11, %v1495_v32, %v5433_v0  ;;  %v5732_v35 = vrot.slane %v5703_v22, 7 }
 0x15b   : > { %8861 = vst [vmem:[#allocation104_spill] sm:$0xff] %v5723_v48  ;;  %8862 = vst [vmem:[#allocation105_spill] sm:$0xff] %v5729_v54  ;;  %vm8488_vm9 = vcmp.gt.f32.partialorder %v5265_v33, %v5283_v10  ;;  %v3106_v21 = vsel %vm1453_vm8, %v2653_v31, %v3105_v44  ;;  %vm8485_vm13 = vcmp.gt.f32.partialorder %v5385_v16, %v5445_v51 }
 0x15c   : > { %vm8487_vm4 = vcmp.gt.f32.partialorder %v5354_v60, %v5433_v0  ;;  %v5746_v52 = vsel %vm8488_vm9, %v5265_v33, %v5283_v10  ;;  %v3108_v58 = vsel %vm8529_vm2, %v2661_v20, %v3106_v21  ;;  %v5752_v5 = vsel %vm5168_vm11, %v1498_v57, %v5732_v35 }
 0x15d   : > { %8863 = vst [vmem:[#allocation106_spill] sm:$0xff] %v5746_v52  ;;  %8864 = vst [vmem:[#allocation107_spill] sm:$0xff] %v5752_v5  ;;  %v1501_v56 = vrot.slane %v5732_v35, 2  ;;  %vm8489_vm1 = vcmp.gt.f32.partialorder %v5703_v22, %v5732_v35  ;;  %3226 = vxpose.xlu0.b32.start [1/4] (short) %v3108_v58, 128  ;;  %v5762_v31 = vsel %vm8486_vm15, %v5343_v36, %v5430_v50 }
 0x15e   : > { %8865 = vst [vmem:[#allocation108_spill] sm:$0xff] %v5762_v31  ;;  %v5769_v20 = vsel %vm8485_vm13, %v5385_v16, %v5445_v51  ;;  %v5776_v45 = vsel %vm8487_vm4, %v5354_v60, %v5433_v0  ;;  %v5783_v59 = vsel %vm8489_vm1, %v5703_v22, %v5732_v35  ;;  %vm8504_vm13 = vcmp.gt.f32.partialorder %v5718_v62, %v5746_v52 }
 0x15f   : > { %8866 = vst [vmem:[#allocation109_spill] sm:$0xff] %v5769_v20  ;;  %8867 = vst [vmem:[#allocation110_spill] sm:$0xff] %v5776_v45  ;;  %v5788_v29 = vsel %vm5168_vm11, %v1501_v56, %v5361_v40  ;;  %vm8503_vm15 = vcmp.gt.f32.partialorder %v5723_v48, %v5762_v31  ;;  %vm8502_vm4 = vcmp.gt.f32.partialorder %v5729_v54, %v5769_v20 }
 0x160   : > { %8868 = vst [vmem:[#allocation111_spill] sm:$0xff] %v5783_v59  ;;  %8869 = vst [vmem:[#allocation112_spill] sm:$0xff] %v5788_v29  ;;  %vm8491_vm9 = vcmp.gt.f32.partialorder %v5752_v5, %v5776_v45  ;;  %vm8501_vm1 = vcmp.gt.f32.partialorder %v5788_v29, %v5783_v59  ;;  %v2293_v40 = vsel %vm8509_vm3, %v5365_v25, %v5348_v30 }
 0x161   : > { %vm8870_vm0 = vcmp.gt.f32.partialorder %v5295_v15, %v5300_v13  ;;  %v2295_v41 = vsel %vm8504_vm13, %v5718_v62, %v5746_v52  ;;  %v2296_v11 = vsel %vm8503_vm15, %v5723_v48, %v5762_v31  ;;  %v2297_v38 = vsel %vm8502_vm4, %v5729_v54, %v5769_v20 }
 0x162   : > { %v2294_v42 = vsel %vm8870_vm0, %v5295_v15, %v5300_v13  ;;  %v2298_v13 = vsel %vm8491_vm9, %v5752_v5, %v5776_v45  ;;  %vm8505_vm0 = vcmp.gt.f32.partialorder %v5438_v14, %v5469_v46  ;;  %v2299_v15 = vsel %vm8501_vm1, %v5788_v29, %v5783_v59 }
 0x163   : > { %v2681_v61 = vrot.slane %v2293_v40, %v4989_v12  ;;  %v2689_v32 = vrot.slane %v2294_v42, %v4989_v12  ;;  %v2697_v57 = vrot.slane %v2295_v41, %v4989_v12  ;;  %v2705_v23 = vrot.slane %v2296_v11, %v4989_v12 }
 0x164   : > { %v2713_v47 = vrot.slane %v2297_v38, %v4989_v12  ;;  %v2721_v44 = vrot.slane %v2298_v13, %v4989_v12  ;;  %v2729_v21 = vrot.slane %v2299_v15, %v4989_v12  ;;  %vm8524_vm9 = vcmp.gt.f32.partialorder %v5449_v4, %v5456_v1 }
 0x165   : > { %v8871_v58 = vrot.slane %v5351_v63, %v4989_v12  ;;  %v2677_v59 = vrot.slane %v2293_v40, %v4922_v43  ;;  %v2685_v29 = vrot.slane %v2294_v42, %v4922_v43  ;;  %v2693_v45 = vrot.slane %v2295_v41, %v4922_v43 }
 0x166   : > { %v2701_v20 = vrot.slane %v2296_v11, %v4922_v43  ;;  %v2709_v54 = vrot.slane %v2297_v38, %v4922_v43  ;;  %v2717_v31 = vrot.slane %v2298_v13, %v4922_v43  ;;  %v2725_v52 = vrot.slane %v2299_v15, %v4922_v43 }
 0x167   : > { %v3123_v56 = vsel %vm3098_vm5, %v2681_v61, %v8871_v58  ;;  %v8872_v61 = vrot.slane %v5351_v63, %v4922_v43  ;;  %v5865_v42 = vcombine.high %v5441_v7, %v5441_v7  ;;  %v1513_v38 = vrot.slane %v5378_v2, 2  ;;  %v8874_v58 = vld [vmem:[#allocation71_spill] sm:$0xff] }
 0x168   : > { %v3124_v5 = vsel %vm1449_vm6, %v2689_v32, %v3123_v56  ;;  %v1516_v13 = vrot.slane %v5469_v46, 2  ;;  %v1519_v63 = vrot.slane %v5528_v49, 2  ;;  %vm8508_vm1 = vcmp.gt.f32.partialorder %v8874_v58, %v5378_v2 }
 0x169   : > { %v3125_v48 = vsel %vm3101_vm10, %v2697_v57, %v3124_v5  ;;  %v3116_v40 = vsel %vm3098_vm5, %v2677_v59, %v8872_v61  ;;  %v1522_v59 = vrot.slane %v5476_v55, 2  ;;  %vm8506_vm4 = vcmp.gt.f32.partialorder %v5466_v9, %v5528_v49 }
 0x16a   : > { %v3126_v41 = vsel %vm1451_vm7, %v2705_v23, %v3125_v48  ;;  %v3117_v11 = vsel %vm1449_vm6, %v2685_v29, %v3116_v40  ;;  %v5880_v48 = vsel %vm5168_vm11, %v1513_v38, %v5469_v46  ;;  %v5885_v29 = vsel %vm5168_vm11, %v1516_v13, %v5528_v49 }
 0x16b   : > { %v3127_v5 = vsel %vm3104_vm12, %v2713_v47, %v3126_v41  ;;  %v3118_v15 = vsel %vm3101_vm10, %v2693_v45, %v3117_v11  ;;  %8873 = vst [vmem:[#allocation113_spill] sm:$0xff] %v5885_v29  ;;  %v5892_v47 = vsel %vm5168_vm11, %v1519_v63, %v5476_v55  ;;  %vm8507_vm15 = vcmp.gt.f32.partialorder %v5441_v7, %v5476_v55 }
 0x16c   : > { %v3128_v32 = vsel %vm1453_vm8, %v2721_v44, %v3127_v5  ;;  %v3119_v57 = vsel %vm1451_vm7, %v2701_v20, %v3118_v15  ;;  %v5895_v20 = vrot.slane %v5865_v42, 7  ;;  %v5932_v61 = vsel %vm8506_vm4, %v5466_v9, %v5528_v49 }
 0x16d   : > { %v3129_v45 = vsel %vm8529_vm2, %v2729_v21, %v3128_v32  ;;  %v3120_v23 = vsel %vm3104_vm12, %v2709_v54, %v3119_v57  ;;  %v5939_v40 = vsel %vm8507_vm15, %v5441_v7, %v5476_v55  ;;  %vm8522_vm15 = vcmp.gt.f32.partialorder %v5892_v47, %v5932_v61 }
 0x16e   : > { %3259 = vxpose.xlu1.b32.cont [2/4] (short) %v3129_v45, 128  ;;  %v3121_v44 = vsel %vm1453_vm8, %v2717_v31, %v3120_v23  ;;  %v5908_v21 = vsel %vm5168_vm11, %v1522_v59, %v5895_v20  ;;  %v1525_v56 = vrot.slane %v5895_v20, 2  ;;  %vm8510_vm13 = vcmp.gt.f32.partialorder %v5865_v42, %v5895_v20  ;;  %8877 = vst [vmem:[#allocation115_spill] sm:$0xff] %v5939_v40 }
 0x16f   : > { %v3122_v54 = vsel %vm8529_vm2, %v2725_v52, %v3121_v44  ;;  %8875 = vst [vmem:[#allocation71_spill] sm:$0xff] %v5908_v21  ;;  %v5918_v31 = vsel %vm8508_vm1, %v8874_v58, %v5378_v2  ;;  %v5925_v52 = vsel %vm8505_vm0, %v5438_v14, %v5469_v46  ;;  %v5951_v11 = vsel %vm8510_vm13, %v5865_v42, %v5895_v20 }
 0x170   : > { %3227 = vxpose.xlu0.b32.cont [2/4] (short) %v3122_v54, 128  ;;  %8876 = vst [vmem:[#allocation114_spill] sm:$0xff] %v5925_v52  ;;  %v5944_v41 = vsel %vm5168_vm11, %v1525_v56, %v5500_v26  ;;  %vm8523_vm0 = vcmp.gt.f32.partialorder %v5880_v48, %v5918_v31  ;;  %vm8520_vm4 = vcmp.gt.f32.partialorder %v5885_v29, %v5925_v52  ;;  %v8879_v56 = vld [vmem:[#allocation76_spill] sm:$0xff] }
 0x171   : > { %vm8515_vm1 = vcmp.gt.f32.partialorder %v5908_v21, %v5939_v40  ;;  %vm8521_vm3 = vcmp.gt.f32.partialorder %v5944_v41, %v5951_v11  ;;  %v2301_v38 = vsel %vm8524_vm9, %v5449_v4, %v5456_v1  ;;  %vm8878_vm13 = vcmp.gt.f32.partialorder %v5393_v8, %v5397_v3 }
 0x172   : > { %v2302_v13 = vsel %vm8878_vm13, %v5393_v8, %v5397_v3  ;;  %v2303_v5 = vsel %vm8523_vm0, %v5880_v48, %v5918_v31  ;;  %v2304_v15 = vsel %vm8520_vm4, %v5885_v29, %v5925_v52  ;;  %v2305_v63 = vsel %vm8522_vm15, %v5892_v47, %v5932_v61 }
 0x173   : > { %vm8527_vm13 = vcmp.gt.f32.partialorder %v5493_v27, %v5511_v37  ;;  %v2306_v8 = vsel %vm8515_vm1, %v5908_v21, %v5939_v40  ;;  %v2307_v3 = vsel %vm8521_vm3, %v5944_v41, %v5951_v11  ;;  %v2745_v59 = vrot.slane %v2301_v38, %v4989_v12 }
 0x174   : > { %v2753_v32 = vrot.slane %v2302_v13, %v4989_v12  ;;  %v2761_v57 = vrot.slane %v2303_v5, %v4989_v12  ;;  %v2769_v45 = vrot.slane %v2304_v15, %v4989_v12  ;;  %v2777_v23 = vrot.slane %v2305_v63, %v4989_v12 }
 0x175   : > { %v2785_v44 = vrot.slane %v2306_v8, %v4989_v12  ;;  %v2793_v54 = vrot.slane %v2307_v3, %v4989_v12  ;;  %v8880_v26 = vrot.slane %v8879_v56, %v4989_v12  ;;  %v2741_v21 = vrot.slane %v2301_v38, %v4922_v43 }
 0x176   : > { %v2749_v52 = vrot.slane %v2302_v13, %v4922_v43  ;;  %vm2246_vm1 = vcmp.gt.f32.partialorder %v5545_v18, %v5567_v6  ;;  %v2757_v55 = vrot.slane %v2303_v5, %v4922_v43  ;;  %v2765_v7 = vrot.slane %v2304_v15, %v4922_v43 }
 0x177   : > { %v3137_v40 = vsel %vm3098_vm5, %v2745_v59, %v8880_v26  ;;  %v2773_v46 = vrot.slane %v2305_v63, %v4922_v43  ;;  %vm2248_vm4 = vcmp.gt.f32.partialorder %v5550_v28, %v5574_v17  ;;  %v2781_v38 = vrot.slane %v2306_v8, %v4922_v43 }
 0x178   : > { %v3138_v29 = vsel %vm1449_vm6, %v2753_v32, %v3137_v40  ;;  %v2789_v13 = vrot.slane %v2307_v3, %v4922_v43  ;;  %v8881_v59 = vrot.slane %v8879_v56, %v4922_v43  ;;  %v6032_v63 = vcombine.high %v5522_v53, %v5522_v53 }
 0x179   : > { %v3139_v26 = vsel %vm3101_vm10, %v2761_v57, %v3138_v29  ;;  %v1447_v29 = vcombine.high %v5525_v34, %v5525_v34  ;;  %v1531_v32 = vrot.slane %v5511_v37, 2  ;;  %v1537_v57 = vrot.slane %v5515_v19, 2 }
 0x17a   : > { %v3130_v40 = vsel %vm3098_vm5, %v2741_v21, %v8881_v59  ;;  %v3140_v5 = vsel %vm1451_vm7, %v2769_v45, %v3139_v26  ;;  %8882 = vst [vmem:[#allocation76_spill] sm:$0xff] %v6032_v63  ;;  %v6044_v56 = vrot.slane %v6032_v63, 7  ;;  %vm8526_vm15 = vcmp.gt.f32.partialorder %v5522_v53, %v5577_v24 }
 0x17b   : > { %v3131_v15 = vsel %vm1449_vm6, %v2749_v52, %v3130_v40  ;;  %v3141_v8 = vsel %vm3104_vm12, %v2777_v23, %v3140_v5  ;;  %v1540_v52 = vrot.slane %v5577_v24, 2  ;;  %v8884_v23 = vld [vmem:[#allocation85_spill] sm:$0xff] }
 0x17c   : > { %v3132_v3 = vsel %vm3101_vm10, %v2757_v55, %v3131_v15  ;;  %v3142_v21 = vsel %vm1453_vm8, %v2785_v44, %v3141_v8  ;;  %8883 = vst [vmem:[#allocation116_spill] sm:$0xff] %v6044_v56  ;;  %v6051_v55 = vsel %vm5168_vm11, %v1531_v32, %v8884_v23  ;;  %v6056_v44 = vsel %vm5168_vm11, %v1537_v57, %v5577_v24  ;;  %v8911_v23 = vld [vmem:[#allocation66_spill] sm:$0xff] }
 0x17d   : > { %v3133_v45 = vsel %vm1451_vm7, %v2765_v7, %v3132_v3  ;;  %v3143_v26 = vsel %vm8529_vm2, %v2793_v54, %v3142_v21  ;;  %8885 = vst [vmem:[#allocation117_spill] sm:$0xff] %v6056_v44  ;;  %v6062_v40 = vsel %vm5168_vm11, %v1540_v52, %v6044_v56  ;;  %v8887_v54 = vld [vmem:[#allocation97_spill] sm:$0xff]  ;;  %v1547_v8 = vrot.slane %v1447_v29, 7  ;;  %v8888_v3 = vld [vmem:[#allocation83_spill] sm:$0xff] }
 0x17e   : > { %v3134_v59 = vsel %vm3104_vm12, %v2773_v46, %v3133_v45  ;;  %3260 = vxpose.xlu1.b32.cont [3/4] (short) %v3143_v26, 128  ;;  %8886 = vst [vmem:[#allocation118_spill] sm:$0xff] %v6062_v40  ;;  %v1543_v46 = vrot.slane %v6044_v56, 2  ;;  %v1546_v5 = vrot.slane %v8887_v54, 2  ;;  %vm8525_vm3 = vcmp.gt.f32.partialorder %v8888_v3, %v5515_v19 }
 0x17f   : > { %v3135_v7 = vsel %vm1453_vm8, %v2781_v38, %v3134_v59  ;;  %vm8528_vm0 = vcmp.gt.f32.partialorder %v6032_v63, %v6044_v56  ;;  %vm8550_vm9 = vcmp.gt.f32.partialorder %v5525_v34, %v8887_v54  ;;  %v6096_v32 = vsel %vm8525_vm3, %v8888_v3, %v5515_v19  ;;  %v8903_v19 = vld [vmem:[#allocation51_spill] sm:$0xff] }
 0x180   : > { %v3136_v15 = vsel %vm8529_vm2, %v2789_v13, %v3135_v7  ;;  %v6074_v38 = vsel %vm5168_vm11, %v1543_v46, %v8887_v54  ;;  %v6085_v13 = vsel %vm8527_vm13, %v5493_v27, %v5511_v37  ;;  %v6089_v29 = vsel %vm5168_vm11, %v1546_v5, %v1547_v8  ;;  %8892 = vst [vmem:[#allocation122_spill] sm:$0xff] %v6096_v32  ;;  %v8908_v3 = vld [vmem:[#allocation31_spill] sm:$0xff] }
 0x181   : > { %3228 = vxpose.xlu0.b32.cont [3/4] (short) %v3136_v15, 128  ;;  %8889 = vst [vmem:[#allocation119_spill] sm:$0xff] %v6074_v38  ;;  %8890 = vst [vmem:[#allocation120_spill] sm:$0xff] %v6085_v13  ;;  %v6103_v57 = vsel %vm8526_vm15, %v5522_v53, %v5577_v24  ;;  %v6110_v21 = vsel %vm8528_vm0, %v6032_v63, %v6044_v56  ;;  %v6117_v45 = vsel %vm8550_vm9, %v5525_v34, %v8887_v54 }
 0x182   : > { %8891 = vst [vmem:[#allocation121_spill] sm:$0xff] %v6089_v29  ;;  %8893 = vst [vmem:[#allocation123_spill] sm:$0xff] %v6103_v57  ;;  %vm2247_vm3 = vcmp.gt.f32.partialorder %v6051_v55, %v6085_v13  ;;  %vm2249_vm15 = vcmp.gt.f32.partialorder %v6056_v44, %v6096_v32  ;;  %vm2250_vm13 = vcmp.gt.f32.partialorder %v6062_v40, %v6103_v57 }
 0x183   : > { %8894 = vst [vmem:[#allocation124_spill] sm:$0xff] %v6110_v21  ;;  %8895 = vst [vmem:[#allocation125_spill] sm:$0xff] %v6117_v45  ;;  %vm8552_vm0 = vcmp.gt.f32.partialorder %v6074_v38, %v6110_v21  ;;  %vm8548_vm2 = vcmp.gt.f32.partialorder %v6089_v29, %v6117_v45  ;;  %v2308_v52 = vsel %vm2246_vm1, %v5545_v18, %v5567_v6 }
 0x184   : > { %v2309_v26 = vsel %vm2247_vm3, %v6051_v55, %v6085_v13  ;;  %v2310_v59 = vsel %vm2248_vm4, %v5550_v28, %v5574_v17  ;;  %v2311_v7 = vsel %vm2249_vm15, %v6056_v44, %v6096_v32  ;;  %v2312_v46 = vsel %vm2250_vm13, %v6062_v40, %v6103_v57  ;;  %v8898_v28 = vld [vmem:[#allocation46_spill] sm:$0xff] }
 0x185   : > { %v2313_v5 = vsel %vm8552_vm0, %v6074_v38, %v6110_v21  ;;  %v2314_v15 = vsel %vm8548_vm2, %v6089_v29, %v6117_v45  ;;  %v2801_v8 = vrot.slane %v2308_v52, %v4989_v12  ;;  %v2809_v39 = vrot.slane %v2309_v26, %v4989_v12 }
 0x186   : > { %v2817_v54 = vrot.slane %v2310_v59, %v4989_v12  ;;  %v2825_v34 = vrot.slane %v2311_v7, %v4989_v12  ;;  %v2833_v57 = vrot.slane %v2312_v46, %v4989_v12  ;;  %v2841_v40 = vrot.slane %v2313_v5, %v4989_v12 }
 0x187   : > { %v2849_v21 = vrot.slane %v2314_v15, %v4989_v12  ;;  %v3150_v38 = vsel %vm3098_vm5, %v2809_v39, %v2801_v8  ;;  %v2797_v56 = vrot.slane %v2308_v52, %v4922_v43  ;;  %v2805_v45 = vrot.slane %v2309_v26, %v4922_v43  ;;  %v8896_v8 = vld [vmem:[#allocation5_spill] sm:$0xff]  ;;  %v8897_v52 = vld [vmem:[#allocation3_spill] sm:$0xff]  ;;  %v8899_v26 = vld [vmem:[#allocation50_spill] sm:$0xff] }
 0x188   : > { %v2813_v29 = vrot.slane %v2310_v59, %v4922_v43  ;;  %v3151_v63 = vsel %vm1449_vm6, %v2817_v54, %v3150_v38  ;;  %v2821_v32 = vrot.slane %v2311_v7, %v4922_v43  ;;  %v2829_v44 = vrot.slane %v2312_v46, %v4922_v43  ;;  %v8901_v7 = vld [vmem:[#allocation7_spill] sm:$0xff]  ;;  %v8902_v46 = vld [vmem:[#allocation4_spill] sm:$0xff] }
 0x189   : > { %v2837_v24 = vrot.slane %v2313_v5, %v4922_v43  ;;  %v3152_v53 = vsel %vm3101_vm10, %v2825_v34, %v3151_v63  ;;  %v2845_v17 = vrot.slane %v2314_v15, %v4922_v43  ;;  %v3144_v39 = vsel %vm3098_vm5, %v2805_v45, %v2797_v56  ;;  %v8904_v5 = vld [vmem:[#allocation56_spill] sm:$0xff]  ;;  %v8906_v63 = vld [vmem:[#allocation34_spill] sm:$0xff]  ;;  %v8910_v45 = vld [vmem:[#allocation57_spill] sm:$0xff] }
 0x18a   : > { %vm8900_vm2 = vcmp.gt.f32.partialorder %v8898_v28, %v8899_v26  ;;  %v3153_v54 = vsel %vm1451_vm7, %v2833_v57, %v3152_v53  ;;  %v3145_v38 = vsel %vm1449_vm6, %v2813_v29, %v3144_v39  ;;  %vm8905_vm9 = vcmp.gt.f32.partialorder %v8903_v19, %v8904_v5  ;;  %v8913_v29 = vld [vmem:[#allocation64_spill] sm:$0xff]  ;;  %v8916_v19 = vld [vmem:[#allocation37_spill] sm:$0xff] }
 0x18b   : > { %v2161_v59 = vsel %vm8900_vm2, %v8897_v52, %v8896_v8  ;;  %v2163_v34 = vsel %vm8905_vm9, %v8902_v46, %v8901_v7  ;;  %v8907_v15 = vrot.slane %v8906_v63, 7  ;;  %v8909_v56 = vrot.slane %v8908_v3, 7  ;;  %v8914_v57 = vld [vmem:[#allocation68_spill] sm:$0xff]  ;;  %v8918_v5 = vld [vmem:[#allocation33_spill] sm:$0xff]  ;;  %v8920_v7 = vld [vmem:[#allocation59_spill] sm:$0xff] }
 0x18c   : > { %vm8912_vm0 = vcmp.gt.f32.partialorder %v8910_v45, %v8911_v23  ;;  %v3154_v28 = vsel %vm3104_vm12, %v2841_v40, %v3153_v54  ;;  %v3146_v53 = vsel %vm3101_vm10, %v2821_v32, %v3145_v38  ;;  %vm8915_vm2 = vcmp.gt.f32.partialorder %v8913_v29, %v8914_v57  ;;  %v8921_v52 = vld [vmem:[#allocation69_spill] sm:$0xff]  ;;  %v8927_v45 = vld [vmem:[#allocation60_spill] sm:$0xff]  ;;  %v8938_v54 = vld [vmem:[#allocation39_spill] sm:$0xff] }
 0x18d   : > { %v2164_v13 = vsel %vm8912_vm0, %v8909_v56, %v8907_v15  ;;  %v2165_v39 = vsel %vm8915_vm2, %v8908_v3, %v8906_v63  ;;  %v8917_v26 = vrot.slane %v8916_v19, 7  ;;  %v8919_v46 = vrot.slane %v8918_v5, 7  ;;  %v8925_v15 = vld [vmem:[#allocation11_spill] sm:$0xff]  ;;  %v8926_v56 = vld [vmem:[#allocation62_spill] sm:$0xff] }
 0x18e   : > { %vm8922_vm9 = vcmp.gt.f32.partialorder %v8920_v7, %v8921_v52  ;;  %v3155_v23 = vsel %vm1453_vm8, %v2849_v21, %v3154_v28  ;;  %v3147_v40 = vsel %vm1451_vm7, %v2829_v44, %v3146_v53  ;;  %v2167_v38 = vsel %vm1783_vm14, %v8918_v5, %v8916_v19  ;;  %v8929_v52 = vld [vmem:[#allocation63_spill] sm:$0xff]  ;;  %v8930_v7 = vld [vmem:[#allocation38_spill] sm:$0xff]  ;;  %v8933_v28 = vld [vmem:[#allocation61_spill] sm:$0xff] }
 0x18f   : > { %v2166_v8 = vsel %vm8922_vm9, %v8919_v46, %v8917_v26  ;;  %vm8928_vm0 = vcmp.gt.f32.partialorder %v8926_v56, %v8927_v45  ;;  %3261 = vxpose.xlu1.b32.end [4/4] (short) %v3155_v23, 128  ;;  %v3148_v57 = vsel %vm3104_vm12, %v2837_v24, %v3147_v40  ;;  %v8931_v46 = vrot.slane %v8930_v7, 7  ;;  %v8932_v21 = vld [vmem:[#allocation58_spill] sm:$0xff]  ;;  %v8940_v19 = vld [vmem:[#allocation91_spill] sm:$0xff]  ;;  %v8943_v23 = vld [vmem:[#allocation93_spill] sm:$0xff] }
 0x190   : > { %v2479_v29 = vsel %vm8928_vm0, %v8925_v15, %v2161_v59  ;;  %vm8934_vm2 = vcmp.gt.f32.partialorder %v8932_v21, %v8933_v28  ;;  %v8935_v53 = vld [vmem:[#allocation90_spill] sm:$0xff]  ;;  %v8939_v5 = vrot.slane %v8938_v54, 7  ;;  %v8941_v56 = vld [vmem:[#allocation99_spill] sm:$0xff]  ;;  %v3149_v24 = vsel %vm1453_vm8, %v2845_v17, %v3148_v57  ;;  %v8944_v40 = vld [vmem:[#allocation100_spill] sm:$0xff] }
 0x191   : > { %v2480_v44 = vsel %vm8934_vm2, %v8931_v46, %v8929_v52  ;;  %v8936_v26 = vld [vmem:[#allocation98_spill] sm:$0xff]  ;;  %vm8942_vm14 = vcmp.gt.f32.partialorder %v8940_v19, %v8941_v56  ;;  %vm8945_vm0 = vcmp.gt.f32.partialorder %v8943_v23, %v8944_v40  ;;  %v8946_v21 = vld [vmem:[#allocation41_spill] sm:$0xff]  ;;  %3229 = vxpose.xlu0.b32.end [4/4] (short) %v3149_v24, 128  ;;  %v3369_v19 = vrot.slane %v2479_v29, %v4989_v12 }
 0x192   : > { %vm8937_vm9 = vcmp.gt.f32.partialorder %v8935_v53, %v8936_v26  ;;  %v2482_v59 = vsel %vm8942_vm14, %v8939_v5, %v2164_v13  ;;  %v2483_v45 = vsel %vm8945_vm0, %v8938_v54, %v2165_v39  ;;  %v8947_v52 = vrot.slane %v8946_v21, 7  ;;  %v8948_v46 = vld [vmem:[#allocation94_spill] sm:$0xff]  ;;  %v8949_v28 = vld [vmem:[#allocation101_spill] sm:$0xff]  ;;  %v8952_v26 = vld [vmem:[#allocation103_spill] sm:$0xff] }
 0x193   : > { %v2481_v32 = vsel %vm8937_vm9, %v8930_v7, %v2163_v34  ;;  %vm8950_vm2 = vcmp.gt.f32.partialorder %v8948_v46, %v8949_v28  ;;  %v8951_v34 = vld [vmem:[#allocation102_spill] sm:$0xff]  ;;  %v3377_v5 = vrot.slane %v2480_v44, %v4989_v12  ;;  %v3393_v57 = vrot.slane %v2482_v59, %v4989_v12 }
 0x194   : > { %v2484_v53 = vsel %vm8950_vm2, %v8947_v52, %v2166_v8  ;;  %vm8953_vm9 = vcmp.gt.f32.partialorder %v8951_v34, %v8952_v26  ;;  %v8954_v13 = vld [vmem:[#allocation54_spill] sm:$0xff]  ;;  %v3385_v39 = vrot.slane %v2481_v32, %v4989_v12  ;;  %v3401_v56 = vrot.slane %v2483_v45, %v4989_v12 }
 0x195   : > { %v2485_v3 = vsel %vm8953_vm9, %v8946_v21, %v2167_v38  ;;  %v3361_v17 = vrot.slane %v8954_v13, %v4989_v12  ;;  %v3409_v8 = vrot.slane %v2484_v53, %v4989_v12  ;;  %v3357_v24 = vrot.slane %v8954_v13, %v4922_v43 }
 0x196   : > { %v3417_v23 = vrot.slane %v2485_v3, %v4989_v12  ;;  %v3365_v40 = vrot.slane %v2479_v29, %v4922_v43  ;;  %v3373_v52 = vrot.slane %v2480_v44, %v4922_v43  ;;  %v3381_v28 = vrot.slane %v2481_v32, %v4922_v43 }
 0x197   : > { %v3857_v38 = vsel %vm3098_vm5, %v3369_v19, %v3361_v17  ;;  %v3389_v34 = vrot.slane %v2482_v59, %v4922_v43  ;;  %v3397_v26 = vrot.slane %v2483_v45, %v4922_v43  ;;  %v3405_v54 = vrot.slane %v2484_v53, %v4922_v43  ;;  %v8955_v19 = vld [vmem:[#allocation17_spill] sm:$0xff]  ;;  %v8958_v59 = vld [vmem:[#allocation44_spill] sm:$0xff] }
 0x198   : > { %v3858_v46 = vsel %vm1449_vm6, %v3377_v5, %v3857_v38  ;;  %v3413_v17 = vrot.slane %v2485_v3, %v4922_v43  ;;  %v3850_v13 = vsel %vm3098_vm5, %v3365_v40, %v3357_v24  ;;  %v8956_v5 = vld [vmem:[#allocation13_spill] sm:$0xff]  ;;  %vm8957_vm14 = vcmp.gt.f32.partialorder %v5265_v33, %v5283_v10  ;;  %v8960_v38 = vld [vmem:[#allocation42_spill] sm:$0xff]  ;;  %v8966_v24 = vld [vmem:[#allocation43_spill] sm:$0xff] }
 0x199   : > { %v3859_v21 = vsel %vm3101_vm10, %v3385_v39, %v3858_v46  ;;  %v3851_v44 = vsel %vm1449_vm6, %v3373_v52, %v3850_v13  ;;  %v2171_v32 = vsel %vm8957_vm14, %v8956_v5, %v8955_v19  ;;  %v8959_v45 = vrot.slane %v8958_v59, 7  ;;  %v8964_v10 = vld [vmem:[#allocation45_spill] sm:$0xff]  ;;  %v8977_v13 = vld [vmem:[#allocation48_spill] sm:$0xff] }
 0x19a   : > { %v3860_v29 = vsel %vm1451_vm7, %v3393_v57, %v3859_v21  ;;  %v8961_v39 = vrot.slane %v8960_v38, 7  ;;  %vm8962_vm0 = vcmp.gt.f32.partialorder %v5343_v36, %v5430_v50  ;;  %v3852_v21 = vsel %vm3101_vm10, %v3381_v28, %v3851_v44 }
 0x19b   : > { %v3861_v53 = vsel %vm3104_vm12, %v3401_v56, %v3860_v29  ;;  %vm8963_vm2 = vcmp.gt.f32.partialorder %v5385_v16, %v5445_v51  ;;  %v8965_v33 = vrot.slane %v8964_v10, 7  ;;  %v8967_v40 = vrot.slane %v8966_v24, 7  ;;  %v8970_v16 = vld [vmem:[#allocation72_spill] sm:$0xff]  ;;  %v8971_v51 = vld [vmem:[#allocation18_spill] sm:$0xff] }
 0x19c   : > { %v2172_v3 = vsel %vm8962_vm0, %v8961_v39, %v8959_v45  ;;  %v2173_v57 = vsel %vm8963_vm2, %v8960_v38, %v8958_v59  ;;  %vm8968_vm9 = vcmp.gt.f32.partialorder %v5354_v60, %v5433_v0  ;;  %v3862_v36 = vsel %vm1453_vm8, %v3409_v8, %v3861_v53  ;;  %v8974_v0 = vld [vmem:[#allocation19_spill] sm:$0xff]  ;;  %v8975_v8 = vld [vmem:[#allocation106_spill] sm:$0xff]  ;;  %v8985_v39 = vld [vmem:[#allocation49_spill] sm:$0xff] }
 0x19d   : > { %v2174_v52 = vsel %vm8968_vm9, %v8967_v40, %v8965_v33  ;;  %v3853_v50 = vsel %vm1451_vm7, %v3389_v34, %v3852_v21  ;;  %vm8969_vm14 = vcmp.gt.f32.partialorder %v5703_v22, %v5732_v35  ;;  %vm8972_vm0 = vcmp.gt.f32.partialorder %v5365_v25, %v5348_v30  ;;  %v8979_v22 = vld [vmem:[#allocation104_spill] sm:$0xff]  ;;  %v8982_v30 = vld [vmem:[#allocation105_spill] sm:$0xff]  ;;  %v8987_v53 = vld [vmem:[#allocation107_spill] sm:$0xff] }
 0x19e   : > { %v2175_v56 = vsel %vm8969_vm14, %v8966_v24, %v8964_v10  ;;  %v2487_v46 = vsel %vm8972_vm0, %v8971_v51, %v8970_v16  ;;  %vm8973_vm2 = vcmask 1047559   ;;  %v3854_v60 = vsel %vm3104_vm12, %v3397_v26, %v3853_v50  ;;  %v8980_v35 = vld [vmem:[#allocation108_spill] sm:$0xff]  ;;  %v8983_v25 = vld [vmem:[#allocation109_spill] sm:$0xff]  ;;  %v8988_v21 = vld [vmem:[#allocation110_spill] sm:$0xff] }
 0x19f   : > { %v6319_v28 = vsel %vm8973_vm2, %v3417_v23, %v3862_v36  ;;  %vm8976_vm9 = vcmp.gt.f32.partialorder %v5718_v62, %v8975_v8  ;;  %v8978_v29 = vrot.slane %v8977_v13, 7  ;;  %vm8981_vm14 = vcmp.gt.f32.partialorder %v8979_v22, %v8980_v35  ;;  %v8991_v33 = vld [vmem:[#allocation111_spill] sm:$0xff]  ;;  %v8995_v50 = vld [vmem:[#allocation20_spill] sm:$0xff]  ;;  %v8996_v16 = vld [vmem:[#allocation70_spill] sm:$0xff] }
 0x1a0   : > { %v2489_v34 = vsel %vm8976_vm9, %v8974_v0, %v2171_v32  ;;  %v3855_v45 = vsel %vm1453_vm8, %v3405_v54, %v3854_v60  ;;  %vm8984_vm0 = vcmp.gt.f32.partialorder %v8982_v30, %v8983_v25  ;;  %v8986_v26 = vrot.slane %v8985_v39, 7  ;;  %v8990_v32 = vld [vmem:[#allocation112_spill] sm:$0xff]  ;;  %v8994_v54 = vld [vmem:[#allocation22_spill] sm:$0xff]  ;;  %v8997_v60 = vld [vmem:[#allocation73_spill] sm:$0xff] }
 0x1a1   : > { %v2490_v44 = vsel %vm8981_vm14, %v8978_v29, %v2172_v3  ;;  %v2491_v23 = vsel %vm8984_vm0, %v8977_v13, %v2173_v57  ;;  %vm8989_vm2 = vcmp.gt.f32.partialorder %v8987_v53, %v8988_v21  ;;  %vm8992_vm9 = vcmp.gt.f32.partialorder %v8990_v32, %v8991_v33  ;;  %v8993_v3 = vld [vmem:[#allocation65_spill] sm:$0xff]  ;;  %v9001_v35 = vld [vmem:[#allocation67_spill] sm:$0xff]  ;;  %v9004_v13 = vld [vmem:[#allocation6_spill] sm:$0xff] }
 0x1a2   : > { %v2492_v62 = vsel %vm8989_vm2, %v8986_v26, %v2174_v52  ;;  %v2493_v40 = vsel %vm8992_vm9, %v8985_v39, %v2175_v56  ;;  %v3425_v36 = vrot.slane %v8993_v3, %v4989_v12  ;;  %vm8998_vm14 = vcmp.gt.f32.partialorder %v8996_v16, %v8997_v60  ;;  %v9000_v52 = vld [vmem:[#allocation74_spill] sm:$0xff] }
 0x1a3   : > { %v2177_v57 = vsel %vm8998_vm14, %v8995_v50, %v8994_v54  ;;  %vm8999_vm0 = vcmask 1047559   ;;  %v3433_v29 = vrot.slane %v2487_v46, %v4989_v12  ;;  %v3441_v56 = vrot.slane %v9001_v35, %v4989_v12 }
 0x1a4   : > { %v6353_v8 = vsel %vm8999_vm0, %v3413_v17, %v3855_v45  ;;  %v3449_v30 = vrot.slane %v2489_v34, %v4989_v12  ;;  %v3457_v25 = vrot.slane %v2490_v44, %v4989_v12  ;;  %v3465_v26 = vrot.slane %v2491_v23, %v4989_v12  ;;  %vm9009_vm2 = vmmov %vm8999_vm0 }
 0x1a5   : > { %v3473_v53 = vrot.slane %v2492_v62, %v4989_v12  ;;  %v3871_v21 = vsel %vm3098_vm5, %v3433_v29, %v3425_v36  ;;  %v3429_v17 = vrot.slane %v2487_v46, %v4922_v43  ;;  %v3481_v45 = vrot.slane %v2493_v40, %v4989_v12 }
 0x1a6   : > { %v3872_v32 = vsel %vm1449_vm6, %v3441_v56, %v3871_v21  ;;  %v3437_v33 = vrot.slane %v9001_v35, %v4922_v43  ;;  %v3453_v16 = vrot.slane %v2490_v44, %v4922_v43  ;;  %v3445_v22 = vrot.slane %v2489_v34, %v4922_v43  ;;  %v9003_v35 = vld [vmem:[#allocation28_spill] sm:$0xff] }
 0x1a7   : > { %v3873_v60 = vsel %vm3101_vm10, %v3449_v30, %v3872_v32  ;;  %v3461_v39 = vrot.slane %v2491_v23, %v4922_v43  ;;  %v9002_v36 = vrot.slane %v8993_v3, %v4922_v43  ;;  %v3469_v56 = vrot.slane %v2492_v62, %v4922_v43  ;;  %v9006_v32 = vld [vmem:[#allocation52_spill] sm:$0xff] }
 0x1a8   : > { %v3874_v29 = vsel %vm1451_vm7, %v3457_v25, %v3873_v60  ;;  %v6383_v44 = vrot.slane %v9004_v13, %v9003_v35  ;;  %v3477_v34 = vrot.slane %v2493_v40, %v4922_v43  ;;  %v8565_v3 = vrot.slane %v9006_v32, 7  ;;  %v9007_v60 = vld [vmem:[#allocation53_spill] sm:$0xff]  ;;  %v9010_v40 = vld [vmem:[#allocation23_spill] sm:$0xff] }
 0x1a9   : > { %v3864_v46 = vsel %vm3098_vm5, %v3429_v17, %v9002_v36  ;;  %v3875_v30 = vsel %vm3104_vm12, %v3465_v26, %v3874_v29  ;;  %v8563_v62 = vrot.slane %v9007_v60, 7  ;;  %v9008_v36 = vld [vmem:[#allocation55_spill] sm:$0xff]  ;;  %v9011_v29 = vld [vmem:[#allocation21_spill] sm:$0xff]  ;;  %vm9012_vm9 = vcmp.gt.f32.partialorder %v8874_v58, %v5378_v2 }
 0x1aa   : > { %v3865_v21 = vsel %vm1449_vm6, %v3437_v33, %v3864_v46  ;;  %9005 = vst [vmem:[#allocation46_spill] sm:$0xff] %v6383_v44  ;;  %v3876_v17 = vsel %vm1453_vm8, %v3473_v53, %v3875_v30  ;;  %v8566_v33 = vrot.slane %v9008_v36, 7  ;;  %v8564_v26 = vrot.slane %v6383_v44, 7  ;;  %v9019_v58 = vld [vmem:[#allocation25_spill] sm:$0xff] }
 0x1ab   : > { %v3866_v23 = vsel %vm3101_vm10, %v3445_v22, %v3865_v21  ;;  %v6394_v46 = vsel %vm9009_vm2, %v3481_v45, %v3876_v17  ;;  %v2179_v22 = vsel %vm9012_vm9, %v9011_v29, %v9010_v40  ;;  %vm9013_vm14 = vcmp.gt.f32.partialorder %v5466_v9, %v5528_v49  ;;  %v9014_v45 = vld [vmem:[#allocation27_spill] sm:$0xff]  ;;  %v9015_v21 = vld [vmem:[#allocation16_spill] sm:$0xff]  ;;  %v9021_v9 = vld [vmem:[#allocation26_spill] sm:$0xff]  ;;  %v6433_v17 = vpop.f32.mrf.mxu0 }
 0x1ac   : > { %v3867_v25 = vsel %vm1451_vm7, %v3453_v16, %v3866_v23  ;;  %v2181_v16 = vsel %vm9013_vm14, %v9006_v32, %v9008_v36  ;;  %v6411_v30 = vrot.slane %v9015_v21, %v9014_v45  ;;  %vm9018_vm2 = vcmp.gt.f32.partialorder %v5865_v42, %v5895_v20 }
 0x1ad   : > { %v3868_v13 = vsel %vm3104_vm12, %v3461_v39, %v3867_v25  ;;  %v6415_v39 = vrot.slane %v9015_v21, %v9003_v35  ;;  %v2183_v2 = vsel %vm9018_vm2, %v9007_v60, %v6383_v44  ;;  %vm9020_vm9 = vcmp.gt.f32.partialorder %v5449_v4, %v5456_v1 }
 0x1ae   : > { %v3869_v53 = vsel %vm1453_vm8, %v3469_v56, %v3868_v13  ;;  %9016 = vst [vmem:[#allocation50_spill] sm:$0xff] %v6411_v30  ;;  %v2495_v49 = vsel %vm9020_vm9, %v9019_v58, %v2177_v57  ;;  %vm9022_vm14 = vcmp.gt.f32.partialorder %v5880_v48, %v5918_v31  ;;  %vm9024_vm2 = vcmp.gt.f32.partialorder %v5944_v41, %v5951_v11  ;;  %v9025_v48 = vld [vmem:[#allocation78_spill] sm:$0xff]  ;;  %v9028_v31 = vld [vmem:[#allocation80_spill] sm:$0xff]  ;;  %v9030_v11 = vld [vmem:[#allocation113_spill] sm:$0xff] }
 0x1af   : > { %9017 = vst [vmem:[#allocation51_spill] sm:$0xff] %v6415_v39  ;;  %v6418_v23 = vsel %vm8999_vm0, %v3477_v34, %v3869_v53  ;;  %v2497_v56 = vsel %vm9022_vm14, %v9021_v9, %v2179_v22  ;;  %v8561_v34 = vrot.slane %v6411_v30, 7  ;;  %v8562_v25 = vrot.slane %v6415_v39, 7  ;;  %v9031_v57 = vld [vmem:[#allocation114_spill] sm:$0xff]  ;;  %v9034_v22 = vld [vmem:[#allocation115_spill] sm:$0xff] }
 0x1b0   : > { %vm9023_vm0 = vcmp.gt.f32.partialorder %v5892_v47, %v5932_v61  ;;  %v2501_v4 = vsel %vm9024_vm2, %v6415_v39, %v2183_v2  ;;  %v3489_v1 = vrot.slane %v9000_v52, %v4989_v12  ;;  %vm9026_vm9 = vcmp.gt.f32.partialorder %v5438_v14, %v9025_v48  ;;  %v9027_v47 = vld [vmem:[#allocation77_spill] sm:$0xff]  ;;  %v9033_v14 = vld [vmem:[#allocation71_spill] sm:$0xff]  ;;  %v9052_v39 = vld [vmem:[#allocation36_spill] sm:$0xff] }
 0x1b1   : > { %v2499_v42 = vsel %vm9023_vm0, %v6411_v30, %v2181_v16  ;;  %v2180_v20 = vsel %vm9026_vm9, %v8565_v3, %v8566_v33  ;;  %vm9029_vm14 = vcmp.gt.f32.partialorder %v9027_v47, %v9028_v31  ;;  %v3497_v41 = vrot.slane %v2495_v49, %v4989_v12  ;;  %v9036_v16 = vld [vmem:[#allocation75_spill] sm:$0xff]  ;;  %v9039_v3 = vld [vmem:[#allocation40_spill] sm:$0xff] }
 0x1b2   : > { %v2182_v61 = vsel %vm9029_vm14, %v8563_v62, %v8564_v26  ;;  %vm9032_vm0 = vcmp.gt.f32.partialorder %v9030_v11, %v9031_v57  ;;  %vm9035_vm2 = vcmp.gt.f32.partialorder %v9033_v14, %v9034_v22  ;;  %v3505_v21 = vrot.slane %v9036_v16, %v4989_v12  ;;  %v6481_v57 = vpop.f32.mrf.mxu1  ;;  %v9040_v33 = vld [vmem:[#allocation24_spill] sm:$0xff] }
 0x1b3   : > { %v2498_v13 = vsel %vm9032_vm0, %v8561_v34, %v2180_v20  ;;  %v2500_v53 = vsel %vm9035_vm2, %v8562_v25, %v2182_v61  ;;  %v3493_v2 = vrot.slane %v2495_v49, %v4922_v43  ;;  %v3513_v48 = vrot.slane %v2497_v56, %v4989_v12  ;;  %v6479_v20 = vpop.f32.mrf.mxu0  ;;  %v9037_v34 = vld [vmem:[#allocation35_spill] sm:$0xff] }
 0x1b4   : > { %v3521_v47 = vrot.slane %v2498_v13, %v4989_v12  ;;  %v3529_v31 = vrot.slane %v2499_v42, %v4989_v12  ;;  %v3885_v11 = vsel %vm3098_vm5, %v3497_v41, %v3489_v1  ;;  %v3501_v22 = vrot.slane %v9036_v16, %v4922_v43 }
 0x1b5   : > { %v3886_v61 = vsel %vm1449_vm6, %v3505_v21, %v3885_v11  ;;  %v3517_v49 = vrot.slane %v2498_v13, %v4922_v43  ;;  %v3509_v62 = vrot.slane %v2497_v56, %v4922_v43  ;;  %v3525_v26 = vrot.slane %v2499_v42, %v4922_v43 }
 0x1b6   : > { %v3887_v25 = vsel %vm3101_vm10, %v3513_v48, %v3886_v61  ;;  %v9038_v1 = vrot.slane %v9000_v52, %v4922_v43  ;;  %v3537_v21 = vrot.slane %v2500_v53, %v4989_v12  ;;  %v3545_v13 = vrot.slane %v2501_v4, %v4989_v12  ;;  %v887_v61 = vpop.f32.mrf.mxu0  ;;  %v998_v52 = vpop.f32.mrf.mxu1 }
 0x1b7   : > { %v3888_v11 = vsel %vm1451_vm7, %v3521_v47, %v3887_v25  ;;  %v3533_v56 = vrot.slane %v2500_v53, %v4922_v43  ;;  %v6507_v14 = vrot.slane %v9040_v33, %v9014_v45  ;;  %v9042_v25 = vld [vmem:[#allocation14_spill] sm:$0xff]  ;;  %vm9050_vm14 = vcmask 1047559  }
 0x1b8   : > { %v3878_v41 = vsel %vm3098_vm5, %v3493_v2, %v9038_v1  ;;  %v3889_v48 = vsel %vm3104_vm12, %v3529_v31, %v3888_v11  ;;  %v6511_v47 = vrot.slane %v9042_v25, %v9014_v45  ;;  %v9044_v31 = vrot.slane %v9037_v34, 7  ;;  %vm9054_vm0 = vmmov %vm9050_vm14  ;;  %v889_v18 = vpop.f32.mrf.mxu0  ;;  %v1000_v6 = vpop.f32.mrf.mxu1 }
 0x1b9   : > { %v3879_v16 = vsel %vm1449_vm6, %v3501_v22, %v3878_v41  ;;  %v3890_v2 = vsel %vm1453_vm8, %v3537_v21, %v3889_v48  ;;  %9041 = vst [vmem:[#allocation56_spill] sm:$0xff] %v6507_v14  ;;  %v9045_v22 = vld [vmem:[#allocation29_spill] sm:$0xff]  ;;  %v9051_v48 = vld [vmem:[#allocation32_spill] sm:$0xff]  ;;  %v8577_v30 = vrot.slane %v9052_v39, 7  ;;  %v9053_v60 = vrot.slane %v9039_v3, 7 }
 0x1ba   : > { %v3880_v42 = vsel %vm3101_vm10, %v3509_v62, %v3879_v16  ;;  %9043 = vst [vmem:[#allocation57_spill] sm:$0xff] %v6511_v47  ;;  %v9046_v53 = vrot.slane %v9045_v22, 7  ;;  %v9047_v41 = vld [vmem:[#allocation81_spill] sm:$0xff]  ;;  %v9048_v62 = vld [vmem:[#allocation84_spill] sm:$0xff]  ;;  %v6521_v21 = vsel %vm9050_vm14, %v3545_v13, %v3890_v2  ;;  %vm9055_vm2 = vcmp.gt.f32.partialorder %v5493_v27, %v5511_v37  ;;  %v9056_v13 = vld [vmem:[#allocation2_spill] sm:$0xff] }
 0x1bb   : > { %v3881_v1 = vsel %vm1451_vm7, %v3517_v49, %v3880_v42  ;;  %vm9049_vm9 = vcmp.gt.f32.partialorder %v9047_v41, %v9048_v62  ;;  %v3541_v49 = vrot.slane %v2501_v4, %v4922_v43  ;;  %v8576_v42 = vrot.slane %v9051_v48, 7  ;;  %v9057_v2 = vld [vmem:[#allocation30_spill] sm:$0xff] }
 0x1bc   : > { %v2184_v11 = vsel %vm9049_vm9, %v9046_v53, %v9044_v31  ;;  %v3882_v16 = vsel %vm3104_vm12, %v3525_v26, %v3881_v1  ;;  %v2015_v4 = vrot.slane %v9040_v33, %v9003_v35  ;;  %v2185_v26 = vsel %vm9055_vm2, %v9045_v22, %v9037_v34  ;;  %v9065_v33 = vld [vmem:[#allocation83_spill] sm:$0xff] }
 0x1bd   : > { %v2502_v44 = vsel %vm2246_vm1, %v9053_v60, %v2184_v11  ;;  %v3883_v41 = vsel %vm1453_vm8, %v3533_v56, %v3882_v16  ;;  %v6545_v1 = vrot.slane %v9057_v2, %v9056_v13  ;;  %v6551_v53 = vrot.slane %v9057_v2, %v9014_v45  ;;  %v9061_v45 = vld [vmem:[#allocation82_spill] sm:$0xff]  ;;  %v9062_v16 = vld [vmem:[#allocation85_spill] sm:$0xff]  ;;  %v9064_v13 = vld [vmem:[#allocation8_spill] sm:$0xff] }
 0x1be   : > { %v6534_v31 = vsel %vm9054_vm0, %v3541_v49, %v3883_v41  ;;  %v2503_v37 = vsel %vm2247_vm3, %v9039_v3, %v2185_v26  ;;  %v2143_v27 = vrot.slane %v9042_v25, %v9003_v35  ;;  %v3553_v11 = vrot.slane %v2502_v44, %v4989_v12  ;;  %v9066_v60 = vld [vmem:[#allocation87_spill] sm:$0xff] }
 0x1bf   : > { %9058 = vst [vmem:[#allocation66_spill] sm:$0xff] %v6545_v1  ;;  %9059 = vst [vmem:[#allocation64_spill] sm:$0xff] %v6551_v53  ;;  %v8580_v62 = vrot.slane %v6545_v1, 7  ;;  %v3561_v49 = vrot.slane %v2503_v37, %v4989_v12  ;;  %vm9063_vm1 = vcmp.gt.f32.partialorder %v9061_v45, %v9062_v16  ;;  %v884_v55 = vadd.f32 %v6433_v17, %v9064_v13 }
 0x1c0   : > { %v2186_v41 = vsel %vm9063_vm1, %v8576_v42, %v8577_v30  ;;  %v2461_v25 = vrot.slane %v9057_v2, %v9003_v35  ;;  %vm9067_vm3 = vcmp.gt.f32.partialorder %v9065_v33, %v9066_v60  ;;  %v3557_v17 = vrot.slane %v2503_v37, %v4922_v43  ;;  %v893_v42 = vpop.f32.mrf.mxu0  ;;  %v1002_v35 = vpop.f32.mrf.mxu1  ;;  %v9073_v60 = vld [vmem:[#allocation88_spill] sm:$0xff]  ;;  %3990 = vxpose.xlu1.b32.start [1/4] (short) %v6319_v28, 128 }
 0x1c1   : > { %v2187_v56 = vsel %vm9067_vm3, %v9051_v48, %v9052_v39  ;;  %v2504_v45 = vsel %vm2248_vm4, %v8580_v62, %v2186_v41  ;;  %v3898_v16 = vsel %vm3098_vm5, %v3561_v49, %v3553_v11  ;;  %v6586_v2 = vrot.slane %v2015_v4, 7  ;;  %v9074_v33 = vld [vmem:[#allocation96_spill] sm:$0xff] }
 0x1c2   : > { %v9071_v30 = vrot.slane %v6511_v47, 7  ;;  %v9072_v26 = vrot.slane %v6507_v14, 7  ;;  %vm9075_vm9 = vcmp.gt.f32.partialorder %v9073_v60, %v9074_v33  ;;  %v2505_v22 = vsel %vm2249_vm15, %v6545_v1, %v2187_v56  ;;  %v9079_v4 = vld [vmem:[#allocation76_spill] sm:$0xff]  ;;  %v9086_v56 = vld [vmem:[#allocation119_spill] sm:$0xff]  ;;  %3958 = vxpose.xlu0.b32.start [1/4] (short) %v6353_v8, 128 }
 0x1c3   : > { %9070 = vst [vmem:[#allocation68_spill] sm:$0xff] %v6586_v2  ;;  %v3569_v11 = vrot.slane %v2504_v45, %v4989_v12  ;;  %v6600_v37 = vrot.slane %v2143_v27, 7  ;;  %v9080_v49 = vld [vmem:[#allocation116_spill] sm:$0xff]  ;;  %v9082_v62 = vrot.slane %v6551_v53, 7  ;;  %v6613_v39 = vrot.slane %v2461_v25, 7 }
 0x1c4   : > { %v2188_v48 = vsel %vm9075_vm9, %v9072_v26, %v9071_v30  ;;  %vm9081_vm4 = vcmp.gt.f32.partialorder %v9079_v4, %v9080_v49  ;;  %v3549_v26 = vrot.slane %v2502_v44, %v4922_v43  ;;  %v9087_v27 = vld [vmem:[#allocation124_spill] sm:$0xff]  ;;  %v3577_v4 = vrot.slane %v2505_v22, %v4989_v12  ;;  %v895_v44 = vpop.f32.mrf.mxu0  ;;  %3991 = vxpose.xlu1.b32.cont [2/4] (short) %v6394_v46, 128 }
 0x1c5   : > { %9078 = vst [vmem:[#allocation59_spill] sm:$0xff] %v6600_v37  ;;  %v2189_v41 = vsel %vm9081_vm4, %v6507_v14, %v6511_v47  ;;  %v2506_v30 = vsel %vm2250_vm13, %v9082_v62, %v2188_v48  ;;  %9085 = vst [vmem:[#allocation69_spill] sm:$0xff] %v6613_v39  ;;  %vm9088_vm15 = vcmp.gt.f32.partialorder %v9086_v56, %v9087_v27  ;;  %v9089_v14 = vld [vmem:[#allocation9_spill] sm:$0xff]  ;;  %v1006_v62 = vpop.f32.mrf.mxu1 }
 0x1c6   : > { %v6619_v33 = vsel %vm9088_vm15, %v6551_v53, %v2189_v41  ;;  %v3899_v3 = vsel %vm1449_vm6, %v3569_v11, %v3898_v16  ;;  %v3892_v49 = vsel %vm3098_vm5, %v3557_v17, %v3549_v26  ;;  %v886_v34 = vadd.f32 %v6479_v20, %v9089_v14  ;;  %v9090_v16 = vld [vmem:[#allocation89_spill] sm:$0xff]  ;;  %3959 = vxpose.xlu0.b32.cont [2/4] (short) %v6418_v23, 128 }
 0x1c7   : > { %v997_v48 = vadd.f32 %v6481_v57, %v884_v55  ;;  %v3585_v25 = vrot.slane %v2506_v30, %v4989_v12  ;;  %v3565_v60 = vrot.slane %v2504_v45, %v4922_v43  ;;  %v888_v41 = vadd.f32 %v887_v61, %v9064_v13  ;;  %v9091_v11 = vld [vmem:[#allocation97_spill] sm:$0xff] }
 0x1c8   : > { %v890_v56 = vadd.f32 %v889_v18, %v9089_v14  ;;  %vm9092_vm13 = vcmp.gt.f32.partialorder %v9090_v16, %v9091_v11  ;;  %v3900_v20 = vsel %vm3101_vm10, %v3577_v4, %v3899_v3  ;;  %v999_v57 = vadd.f32 %v998_v52, %v886_v34  ;;  %v897_v16 = vpop.f32.mrf.mxu0  ;;  %v1008_v11 = vpop.f32.mrf.mxu1  ;;  %v9093_v3 = vld [vmem:[#allocation121_spill] sm:$0xff]  ;;  %3992 = vxpose.xlu1.b32.cont [3/4] (short) %v6521_v21, 128 }
 0x1c9   : > { %v2190_v17 = vsel %vm9092_vm13, %v6586_v2, %v6600_v37  ;;  %v1051_v26 = vmax.f32 %v997_v48, 0.0  ;;  %v3593_v55 = vrot.slane %v6619_v33, %v4989_v12  ;;  %v3893_v27 = vsel %vm1449_vm6, %v3565_v60, %v3892_v49  ;;  %v9094_v4 = vld [vmem:[#allocation125_spill] sm:$0xff] }
 0x1ca   : > { %v1001_v45 = vadd.f32 %v1000_v6, %v888_v41  ;;  %v894_v61 = vadd.f32 %v893_v42, %v9064_v13  ;;  %v3573_v18 = vrot.slane %v2505_v22, %v4922_v43  ;;  %v1052_v53 = vmax.f32 %v999_v57, 0.0  ;;  %3960 = vxpose.xlu0.b32.cont [3/4] (short) %v6534_v31, 128 }
 0x1cb   : > { %v1003_v47 = vadd.f32 %v1002_v35, %v890_v56  ;;  %v896_v1 = vadd.f32 %v895_v44, %v9089_v14  ;;  %vm9095_vm14 = vcmp.gt.f32.partialorder %v9093_v3, %v9094_v4  ;;  %v3901_v34 = vsel %vm1451_vm7, %v3585_v25, %v3900_v20  ;;  %v9096_v56 = vld [vmem:[#allocation10_spill] sm:$0xff]  ;;  %v899_v25 = vpop.f32.mrf.mxu0  ;;  %v1010_v20 = vpop.f32.mrf.mxu1 }
 0x1cc   : > { %v6647_v52 = vsel %vm9095_vm14, %v6613_v39, %v2190_v17  ;;  %v3581_v6 = vrot.slane %v2506_v30, %v4922_v43  ;;  %v1053_v49 = vmax.f32 %v1001_v45, 0.0  ;;  %v3894_v42 = vsel %vm3101_vm10, %v3573_v18, %v3893_v27 }
 0x1cd   : > { %v1242_v22 = vcombine.low %v1051_v26, %v1052_v53  ;;  %v1243_v48 = vcombine.high %v1051_v26, %v1052_v53  ;;  %v1054_v35 = vmax.f32 %v1003_v47, 0.0  ;;  %v1007_v44 = vadd.f32 %v1006_v62, %v894_v61  ;;  %v1012_v4 = vpop.f32.mrf.mxu1 }
 0x1ce   : > { %v1009_v60 = vadd.f32 %v1008_v11, %v896_v1  ;;  %v3601_v41 = vrot.slane %v6647_v52, %v4989_v12  ;;  %v3902_v30 = vsel %vm3104_vm12, %v3593_v55, %v3901_v34  ;;  %v3589_v47 = vrot.slane %v6619_v33, %v4922_v43 }
 0x1cf   : > { %v1250_v17 = vrot.slane %v1242_v22, %v9096_v56  ;;  %v1257_v57 = vrot.slane %v1243_v48, %v9096_v56  ;;  %v3895_v28 = vsel %vm1451_vm7, %v3581_v6, %v3894_v42  ;;  %v1260_v53 = vcombine.low %v1053_v49, %v1054_v35 }
 0x1d0   : > { %v1055_v45 = vmax.f32 %v1007_v44, 0.0  ;;  %v898_v61 = vadd.f32 %v897_v16, %v9064_v13  ;;  %v1056_v18 = vmax.f32 %v1009_v60, 0.0  ;;  %v900_v8 = vadd.f32 %v899_v25, %v9089_v14  ;;  %v903_v16 = vpop.f32.mrf.mxu0 }
 0x1d1   : > { %v1258_v1 = vcombine.high %v1250_v17, %v1250_v17  ;;  %v6662_v62 = vcombine.high %v1257_v57, %v1257_v57  ;;  %v1549_v26 = vrot.slane %v1250_v17, 7  ;;  %v1554_v27 = vrot.slane %v1257_v57, 7 }
 0x1d2   : > { %v3597_v34 = vrot.slane %v6647_v52, %v4922_v43  ;;  %v6674_v46 = vrot.slane %v1260_v53, %v9096_v56  ;;  %v3903_v6 = vsel %vm1453_vm8, %v3601_v41, %v3902_v30  ;;  %v3896_v42 = vsel %vm3104_vm12, %v3589_v47, %v3895_v28  ;;  %v9100_v53 = vld [vmem:[#allocation5_spill] sm:$0xff]  ;;  %v9102_v41 = vld [vmem:[#allocation3_spill] sm:$0xff] }
 0x1d3   : > { %9097 = vst [vmem:[#allocation79_spill] sm:$0xff] %v6662_v62  ;;  %v1550_v55 = vrot.slane %v1549_v26, 2  ;;  %v1551_v11 = vrot.slane %v1258_v1, 7  ;;  %v1556_v3 = vrot.slane %v1554_v27, 2  ;;  %v6668_v33 = vrot.slane %v6662_v62, 7  ;;  %v9104_v28 = vld [vmem:[#allocation7_spill] sm:$0xff]  ;;  %3993 = vxpose.xlu1.b32.end [4/4] (short) %v3903_v6, 128 }
 0x1d4   : > { %vm1807_vm0 = vcmp.gt.f32.partialorder %v1250_v17, %v1549_v26  ;;  %vm1809_vm2 = vcmp.gt.f32.partialorder %v1257_v57, %v1554_v27  ;;  %v6684_v60 = vadd.f32 %v1010_v20, %v898_v61  ;;  %v6686_v25 = vadd.f32 %v1012_v4, %v900_v8 }
 0x1d5   : > { %9098 = vst [vmem:[#allocation86_spill] sm:$0xff] %v6668_v33  ;;  %v1552_v48 = vsel %vm5168_vm11, %v1550_v55, %v1551_v11  ;;  %v1558_v23 = vsel %vm5168_vm11, %v1556_v3, %v6668_v33  ;;  %v1869_v52 = vsel %vm1807_vm0, %v1250_v17, %v1549_v26  ;;  %v1871_v44 = vsel %vm1809_vm2, %v1257_v57, %v1554_v27  ;;  %v9106_v55 = vld [vmem:[#allocation4_spill] sm:$0xff]  ;;  %v905_v57 = vpop.f32.mrf.mxu0 }
 0x1d6   : > { %v9101_v39 = vrot.slane %v9100_v53, 7  ;;  %v9103_v30 = vrot.slane %v9102_v41, 7  ;;  %v9105_v2 = vrot.slane %v9104_v28, 7  ;;  %v9107_v37 = vrot.slane %v9106_v55, 7 }
 0x1d7   : > { %v1261_v10 = vcombine.high %v1053_v49, %v1054_v35  ;;  %v1278_v3 = vcombine.low %v1055_v45, %v1056_v18  ;;  %vm2253_vm1 = vcmp.gt.f32.partialorder %v1552_v48, %v1869_v52  ;;  %vm2255_vm3 = vcmp.gt.f32.partialorder %v1558_v23, %v1871_v44  ;;  %v1016_v35 = vpop.f32.mrf.mxu1 }
 0x1d8   : > { %v2191_v47 = vsel %vm1807_vm0, %v9103_v30, %v9101_v39  ;;  %v2193_v24 = vsel %vm1809_vm2, %v9107_v37, %v9105_v2  ;;  %v6698_v21 = vrot.slane %v6674_v46, 7  ;;  %v1279_v17 = vcombine.high %v1055_v45, %v1056_v18 }
 0x1d9   : > { %v1553_v20 = vrot.slane %v1551_v11, 2  ;;  %vm1808_vm9 = vcmp.gt.f32.partialorder %v1258_v1, %v1551_v11  ;;  %v9108_v39 = vrot.slane %v8925_v15, 7  ;;  %v9110_v61 = vrot.slane %v8930_v7, 7 }
 0x1da   : > { %v3897_v31 = vsel %vm1453_vm8, %v3597_v34, %v3896_v42  ;;  %v1057_v37 = vmax.f32 %v6684_v60, 0.0  ;;  %v904_v49 = vadd.f32 %v903_v16, %v9064_v13  ;;  %v6712_v45 = vsel %vm2253_vm1, %v1552_v48, %v1869_v52  ;;  %v9124_v60 = vld [vmem:[#allocation12_spill] sm:$0xff] }
 0x1db   : > { %v6702_v26 = vsel %vm2253_vm1, %v9108_v39, %v2191_v47  ;;  %v6707_v2 = vsel %vm2255_vm3, %v9110_v61, %v2193_v24  ;;  %9112 = vst [vmem:[#allocation63_spill] sm:$0xff] %v6712_v45  ;;  %v6715_v18 = vrot.slane %v1261_v10, %v9096_v56  ;;  %v1058_v8 = vmax.f32 %v6686_v25, 0.0  ;;  %3961 = vxpose.xlu0.b32.end [4/4] (short) %v3897_v31, 128 }
 0x1dc   : > { %9109 = vst [vmem:[#allocation62_spill] sm:$0xff] %v6702_v26  ;;  %9111 = vst [vmem:[#allocation60_spill] sm:$0xff] %v6707_v2  ;;  %v6719_v4 = vadd.f32 %v905_v57, %v9089_v14  ;;  %v6722_v24 = vsel %vm1808_vm9, %v1258_v1, %v1551_v11  ;;  %v6726_v34 = vcombine.high %v6674_v46, %v6674_v46  ;;  %v1562_v52 = vrot.slane %v6698_v21, 2  ;;  %v9122_v11 = vld [vmem:[#allocation15_spill] sm:$0xff] }
 0x1dd   : > { %9113 = vst [vmem:[#allocation58_spill] sm:$0xff] %v6715_v18  ;;  %9114 = vst [vmem:[#allocation61_spill] sm:$0xff] %v6722_v24  ;;  %v1286_v16 = vrot.slane %v1278_v3, %v9096_v56  ;;  %v1293_v6 = vrot.slane %v1279_v17, %v9096_v56  ;;  %v6732_v10 = vsel %vm5168_vm11, %v1553_v20, %v1554_v27  ;;  %v907_v27 = vpop.f32.mrf.mxu0  ;;  %v1018_v3 = vpop.f32.mrf.mxu1  ;;  %v9125_v1 = vrot.slane %v9124_v60, 7 }
 0x1de   : > { %9115 = vst [vmem:[#allocation90_spill] sm:$0xff] %v6726_v34  ;;  %9116 = vst [vmem:[#allocation98_spill] sm:$0xff] %v6732_v10  ;;  %v6737_v42 = vsel %vm1808_vm9, %v9102_v41, %v9100_v53  ;;  %v6740_v48 = vsel %vm2255_vm3, %v1558_v23, %v1871_v44  ;;  %v6761_v57 = vrot.slane %v6726_v34, 7  ;;  %v9123_v23 = vrot.slane %v9122_v11, 7 }
 0x1df   : > { %9117 = vst [vmem:[#allocation91_spill] sm:$0xff] %v6737_v42  ;;  %9118 = vst [vmem:[#allocation99_spill] sm:$0xff] %v6740_v48  ;;  %v1294_v25 = vcombine.high %v1286_v16, %v1286_v16  ;;  %v6745_v30 = vcombine.high %v1293_v6, %v1293_v6  ;;  %v6747_v47 = vrot.slane %v1286_v16, 7  ;;  %v1578_v44 = vrot.slane %v1293_v6, 7  ;;  %v909_v7 = vpop.f32.mrf.mxu0  ;;  %v1020_v15 = vpop.f32.mrf.mxu1 }
 0x1e0   : > { %9121 = vst [vmem:[#allocation94_spill] sm:$0xff] %v6761_v57  ;;  %vm1811_vm14 = vcmp.gt.f32.partialorder %v6674_v46, %v6698_v21  ;;  %v9128_v28 = vrot.slane %v8955_v19, 7  ;;  %v1296_v45 = vcombine.low %v1057_v37, %v1058_v8 }
 0x1e1   : > { %9119 = vst [vmem:[#allocation93_spill] sm:$0xff] %v6745_v30  ;;  %9120 = vst [vmem:[#allocation100_spill] sm:$0xff] %v6747_v47  ;;  %v1574_v53 = vrot.slane %v6747_v47, 2  ;;  %v1575_v41 = vrot.slane %v1294_v25, 7  ;;  %v6757_v17 = vrot.slane %v6745_v30, 7  ;;  %vm1815_vm4 = vcmp.gt.f32.partialorder %v1286_v16, %v6747_v47  ;;  %v1022_v48 = vpop.f32.mrf.mxu1 }
 0x1e2   : > { %v1580_v20 = vrot.slane %v1578_v44, 2  ;;  %vm1817_vm15 = vcmp.gt.f32.partialorder %v1293_v6, %v1578_v44  ;;  %v1877_v39 = vsel %vm1815_vm4, %v1286_v16, %v6747_v47  ;;  %v2199_v26 = vsel %vm1815_vm4, %v9125_v1, %v9123_v23 }
 0x1e3   : > { %v1576_v61 = vsel %vm5168_vm11, %v1574_v53, %v1575_v41  ;;  %v1577_v31 = vrot.slane %v1575_v41, 2  ;;  %vm1816_vm13 = vcmp.gt.f32.partialorder %v1294_v25, %v1575_v41  ;;  %v1879_v53 = vsel %vm1817_vm15, %v1293_v6, %v1578_v44 }
 0x1e4   : > { %v1582_v42 = vsel %vm5168_vm11, %v1580_v20, %v6757_v17  ;;  %v6776_v16 = vsel %vm1816_vm13, %v1294_v25, %v1575_v41  ;;  %v9129_v1 = vrot.slane %v8956_v5, 7  ;;  %vm2261_vm0 = vcmp.gt.f32.partialorder %v1576_v61, %v1877_v39 }
 0x1e5   : > { %9126 = vst [vmem:[#allocation101_spill] sm:$0xff] %v6776_v16  ;;  %v6780_v55 = vsel %vm5168_vm11, %v1577_v31, %v1578_v44  ;;  %vm2263_vm2 = vcmp.gt.f32.partialorder %v1582_v42, %v1879_v53  ;;  %v9130_v20 = vrot.slane %v8971_v51, 7  ;;  %v1297_v6 = vcombine.high %v1057_v37, %v1058_v8 }
 0x1e6   : > { %9127 = vst [vmem:[#allocation102_spill] sm:$0xff] %v6780_v55  ;;  %v2201_v23 = vsel %vm1817_vm15, %v9129_v1, %v9128_v28  ;;  %vm8657_vm1 = vcmp.gt.f32.partialorder %v6745_v30, %v6757_v17  ;;  %vm8656_vm3 = vcmp.gt.f32.partialorder %v6780_v55, %v6776_v16  ;;  %v9132_v28 = vrot.slane %v8974_v0, 7  ;;  %v913_v1 = vpop.f32.mrf.mxu0 }
 0x1e7   : > { %v6791_v47 = vsel %vm2261_vm0, %v9130_v20, %v2199_v26  ;;  %v1017_v31 = vadd.f32 %v1016_v35, %v904_v49  ;;  %v6806_v26 = vsel %vm5168_vm11, %v1562_v52, %v6761_v57  ;;  %v6809_v37 = vrot.slane %v6715_v18, 7  ;;  %v9138_v35 = vld [vmem:[#allocation31_spill] sm:$0xff] }
 0x1e8   : > { %9131 = vst [vmem:[#allocation103_spill] sm:$0xff] %v6791_v47  ;;  %v6799_v44 = vsel %vm2263_vm2, %v9132_v28, %v2201_v23  ;;  %9134 = vst [vmem:[#allocation72_spill] sm:$0xff] %v6806_v26  ;;  %v6816_v8 = vsel %vm1811_vm14, %v6674_v46, %v6698_v21  ;;  %v9137_v49 = vrot.slane %v8906_v63, 7  ;;  %v9139_v23 = vrot.slane %v9138_v35, 7  ;;  %v915_v25 = vpop.f32.mrf.mxu0 }
 0x1e9   : > { %9133 = vst [vmem:[#allocation54_spill] sm:$0xff] %v6799_v44  ;;  %9135 = vst [vmem:[#allocation106_spill] sm:$0xff] %v6809_v37  ;;  %v6828_v52 = vsel %vm2261_vm0, %v1576_v61, %v1877_v39  ;;  %v6830_v28 = vsel %vm2263_vm2, %v1582_v42, %v1879_v53  ;;  %v1304_v51 = vrot.slane %v1296_v45, %v9096_v56  ;;  %v1059_v39 = vmax.f32 %v1017_v31, 0.0 }
 0x1ea   : > { %9136 = vst [vmem:[#allocation104_spill] sm:$0xff] %v6816_v8  ;;  %v6825_v20 = vsel %vm1811_vm14, %v9139_v23, %v9137_v49  ;;  %9141 = vst [vmem:[#allocation105_spill] sm:$0xff] %v6828_v52  ;;  %v6838_v0 = vsel %vm8657_vm1, %v6745_v30, %v6757_v17  ;;  %v6843_v46 = vsel %vm1816_vm13, %v9124_v60, %v9122_v11  ;;  %v1026_v60 = vpop.f32.mrf.mxu1  ;;  %v9146_v44 = vrot.slane %v8960_v38, 7 }
 0x1eb   : > { %9140 = vst [vmem:[#allocation108_spill] sm:$0xff] %v6825_v20  ;;  %9142 = vst [vmem:[#allocation109_spill] sm:$0xff] %v6830_v28  ;;  %v6850_v42 = vsel %vm8656_vm3, %v6780_v55, %v6776_v16  ;;  %v6853_v45 = vrot.slane %v1297_v6, %v9096_v56  ;;  %v908_v61 = vadd.f32 %v907_v27, %v9064_v13  ;;  %v6867_v31 = vrot.slane %v1304_v51, 7 }
 0x1ec   : > { %9143 = vst [vmem:[#allocation107_spill] sm:$0xff] %v6843_v46  ;;  %v1019_v53 = vadd.f32 %v1018_v3, %v6719_v4  ;;  %v910_v49 = vadd.f32 %v909_v7, %v9089_v14  ;;  %v914_v6 = vadd.f32 %v913_v1, %v9064_v13  ;;  %v6871_v16 = vcombine.high %v1304_v51, %v1304_v51  ;;  %v1028_v46 = vpop.f32.mrf.mxu1  ;;  %v917_v1 = vpop.f32.mrf.mxu0 }
 0x1ed   : > { %v1021_v7 = vadd.f32 %v1020_v15, %v908_v61  ;;  %v916_v41 = vadd.f32 %v915_v25, %v9089_v14  ;;  %vm1819_vm9 = vcmp.gt.f32.partialorder %v1304_v51, %v6867_v31  ;;  %v9152_v52 = vrot.slane %v9010_v40, 7  ;;  %v9187_v40 = vld [vmem:[#allocation100_spill] sm:$0xff] }
 0x1ee   : > { %v1060_v4 = vmax.f32 %v1019_v53, 0.0  ;;  %v1023_v11 = vadd.f32 %v1022_v48, %v910_v49  ;;  %v1027_v3 = vadd.f32 %v1026_v60, %v914_v6  ;;  %v6882_v48 = vcombine.high %v6853_v45, %v6853_v45  ;;  %v919_v20 = vpop.f32.mrf.mxu0  ;;  %v1030_v28 = vpop.f32.mrf.mxu1 }
 0x1ef   : > { %v1061_v61 = vmax.f32 %v1021_v7, 0.0  ;;  %v6892_v7 = vrot.slane %v6853_v45, 7  ;;  %v1029_v60 = vadd.f32 %v1028_v46, %v916_v41  ;;  %v920_v63 = vadd.f32 %v919_v20, %v9089_v14 }
 0x1f0   : > { %v1314_v55 = vcombine.low %v1059_v39, %v1060_v4  ;;  %v1315_v27 = vcombine.high %v1059_v39, %v1060_v4  ;;  %v1062_v53 = vmax.f32 %v1023_v11, 0.0  ;;  %v1586_v39 = vrot.slane %v6867_v31, 2 }
 0x1f1   : > { %v6889_v4 = vrot.slane %v6871_v16, 7  ;;  %v1063_v5 = vmax.f32 %v1027_v3, 0.0  ;;  %v1064_v35 = vmax.f32 %v1029_v60, 0.0  ;;  %v9151_v60 = vrot.slane %v8995_v50, 7 }
 0x1f2   : > { %v1322_v49 = vrot.slane %v1314_v55, %v9096_v56  ;;  %v1329_v25 = vrot.slane %v1315_v27, %v9096_v56  ;;  %v6899_v55 = vsel %vm1819_vm9, %v1304_v51, %v6867_v31  ;;  %v9145_v27 = vrot.slane %v8958_v59, 7 }
 0x1f3   : > { %v1332_v30 = vcombine.low %v1061_v61, %v1062_v53  ;;  %v1333_v51 = vcombine.high %v1061_v61, %v1062_v53  ;;  %v918_v59 = vadd.f32 %v917_v1, %v9064_v13  ;;  %v9150_v53 = vrot.slane %v8994_v54, 7 }
 0x1f4   : > { %v1330_v11 = vcombine.high %v1322_v49, %v1322_v49  ;;  %v6894_v6 = vcombine.high %v1329_v25, %v1329_v25  ;;  %v6896_v15 = vrot.slane %v1322_v49, 7  ;;  %v1602_v23 = vrot.slane %v1329_v25, 7 }
 0x1f5   : > { %v6905_v47 = vsel %vm1819_vm9, %v9146_v44, %v9145_v27  ;;  %v9153_v13 = vrot.slane %v9011_v29, 7  ;;  %v6939_v20 = vrot.slane %v1333_v51, %v9096_v56  ;;  %v9154_v1 = vrot.slane %v9019_v58, 7 }
 0x1f6   : > { %9144 = vst [vmem:[#allocation110_spill] sm:$0xff] %v6894_v6  ;;  %9147 = vst [vmem:[#allocation112_spill] sm:$0xff] %v6905_v47  ;;  %v1598_v19 = vrot.slane %v6896_v15, 2  ;;  %v1599_v46 = vrot.slane %v1330_v11, 7  ;;  %v1604_v41 = vrot.slane %v1602_v23, 2  ;;  %v6909_v2 = vrot.slane %v6894_v6, 7 }
 0x1f7   : > { %vm1823_vm4 = vcmp.gt.f32.partialorder %v1322_v49, %v6896_v15  ;;  %vm1825_vm15 = vcmp.gt.f32.partialorder %v1329_v25, %v1602_v23  ;;  %v6960_v51 = vcombine.high %v6715_v18, %v6715_v18  ;;  %v1559_v58 = vrot.slane %v6668_v33, 2 }
 0x1f8   : > { %v1600_v38 = vsel %vm5168_vm11, %v1598_v19, %v1599_v46  ;;  %v1601_v44 = vrot.slane %v1599_v46, 2  ;;  %v1606_v3 = vsel %vm5168_vm11, %v1604_v41, %v6909_v2  ;;  %vm1824_vm13 = vcmp.gt.f32.partialorder %v1330_v11, %v1599_v46 }
 0x1f9   : > { %v1885_v27 = vsel %vm1823_vm4, %v1322_v49, %v6896_v15  ;;  %v1887_v47 = vsel %vm1825_vm15, %v1329_v25, %v1602_v23  ;;  %v6926_v19 = vsel %vm1824_vm13, %v1330_v11, %v1599_v46  ;;  %v2207_v41 = vsel %vm1823_vm4, %v9151_v60, %v9150_v53  ;;  %v1032_v25 = vpop.f32.mrf.mxu1  ;;  %9158 = vst [vmem:[#allocation70_spill] sm:$0xff] %v6960_v51 }
 0x1fa   : > { %v6923_v61 = vsel %vm5168_vm11, %v1601_v44, %v1602_v23  ;;  %9149 = vst [vmem:[#allocation65_spill] sm:$0xff] %v6926_v19  ;;  %v1340_v49 = vrot.slane %v1332_v30, %v9096_v56  ;;  %v2209_v14 = vsel %vm1825_vm15, %v9153_v13, %v9152_v52  ;;  %vm2269_vm14 = vcmp.gt.f32.partialorder %v1600_v38, %v1885_v27 }
 0x1fb   : > { %9148 = vst [vmem:[#allocation111_spill] sm:$0xff] %v6923_v61  ;;  %vm2271_vm0 = vcmp.gt.f32.partialorder %v1606_v3, %v1887_v47  ;;  %vm8636_vm2 = vcmp.gt.f32.partialorder %v6894_v6, %v6909_v2  ;;  %v6945_v44 = vsel %vm2269_vm14, %v9154_v1, %v2207_v41  ;;  %v1350_v53 = vcombine.low %v1063_v5, %v1064_v35 }
 0x1fc   : > { %9155 = vst [vmem:[#allocation22_spill] sm:$0xff] %v6945_v44  ;;  %v1351_v30 = vcombine.high %v1063_v5, %v1064_v35  ;;  %v6950_v60 = vsel %vm5168_vm11, %v1586_v39, %v6889_v4  ;;  %vm8629_vm9 = vcmp.gt.f32.partialorder %v6923_v61, %v6926_v19  ;;  %v9156_v52 = vrot.slane %v9021_v9, 7 }
 0x1fd   : > { %v6962_v41 = vsel %vm2269_vm14, %v1600_v38, %v1885_v27  ;;  %v6964_v5 = vsel %vm2271_vm0, %v1606_v3, %v1887_v47  ;;  %v6966_v35 = vcombine.high %v1340_v49, %v1340_v49  ;;  %v1031_v39 = vadd.f32 %v1030_v28, %v918_v59 }
 0x1fe   : > { %v6956_v23 = vsel %vm2271_vm0, %v9156_v52, %v2209_v14  ;;  %v6973_v13 = vsel %vm8636_vm2, %v6894_v6, %v6909_v2  ;;  %v6978_v14 = vsel %vm1824_vm13, %v8995_v50, %v8994_v54  ;;  %v6982_v38 = vcombine.high %v6939_v20, %v6939_v20 }
 0x1ff   : > { %9157 = vst [vmem:[#allocation20_spill] sm:$0xff] %v6956_v23  ;;  %9159 = vst [vmem:[#allocation73_spill] sm:$0xff] %v6978_v14  ;;  %v6984_v47 = vrot.slane %v1340_v49, 7  ;;  %v6991_v59 = vsel %vm8629_vm9, %v6923_v61, %v6926_v19  ;;  %v6994_v28 = vrot.slane %v1350_v53, %v9096_v56  ;;  %v6997_v11 = vrot.slane %v1351_v30, %v9096_v56 }
 0x200   : > { %v1033_v54 = vadd.f32 %v1032_v25, %v920_v63  ;;  %vm1810_vm4 = vcmp.gt.f32.partialorder %v6662_v62, %v6668_v33  ;;  %v7012_v63 = vrot.slane %v6966_v35, 7  ;;  %v1065_v1 = vmax.f32 %v1031_v39, 0.0 }
 0x201   : > { %9160 = vst [vmem:[#allocation74_spill] sm:$0xff] %v6994_v28  ;;  %9161 = vst [vmem:[#allocation67_spill] sm:$0xff] %v6997_v11  ;;  %v7016_v53 = vcombine.high %v6994_v28, %v6994_v28  ;;  %v7020_v30 = vcombine.high %v6997_v11, %v6997_v11  ;;  %v1610_v52 = vrot.slane %v6984_v47, 2  ;;  %v7024_v25 = vrot.slane %v6994_v28, 7 }
 0x202   : > { %v7027_v3 = vrot.slane %v6997_v11, 7  ;;  %vm1827_vm15 = vcmp.gt.f32.partialorder %v1340_v49, %v6984_v47  ;;  %v1066_v46 = vmax.f32 %v1033_v54, 0.0  ;;  %vm8689_vm9 = vcmp.gt.f32.partialorder %v6806_v26, %v6816_v8 }
 0x203   : > { %9162 = vst [vmem:[#allocation28_spill] sm:$0xff] %v7016_v53  ;;  %9163 = vst [vmem:[#allocation6_spill] sm:$0xff] %v7024_v25  ;;  %v7031_v50 = vrot.slane %v7016_v53, 7  ;;  %v7034_v27 = vrot.slane %v7020_v30, 7  ;;  %v1622_v9 = vrot.slane %v7024_v25, 2  ;;  %vm8628_vm13 = vcmp.gt.f32.partialorder %v6994_v28, %v7024_v25 }
 0x204   : > { %9164 = vst [vmem:[#allocation27_spill] sm:$0xff] %v7027_v3  ;;  %v1628_v19 = vrot.slane %v7027_v3, 2  ;;  %vm8635_vm14 = vcmp.gt.f32.partialorder %v6997_v11, %v7027_v3  ;;  %v7050_v54 = vsel %vm8628_vm13, %v6994_v28, %v7024_v25  ;;  %vm8694_vm13 = vcmp.gt.f32.partialorder %v6732_v10, %v6722_v24 }
 0x205   : > { %9165 = vst [vmem:[#allocation16_spill] sm:$0xff] %v7031_v50  ;;  %v1625_v61 = vrot.slane %v7031_v50, 2  ;;  %9166 = vst [vmem:[#allocation78_spill] sm:$0xff] %v7050_v54  ;;  %v7056_v14 = vsel %vm5168_vm11, %v1622_v9, %v7031_v50  ;;  %vm8650_vm0 = vcmp.gt.f32.partialorder %v7016_v53, %v7031_v50  ;;  %v7070_v28 = vsel %vm8635_vm14, %v6997_v11, %v7027_v3 }
 0x206   : > { %9167 = vst [vmem:[#allocation77_spill] sm:$0xff] %v7056_v14  ;;  %v7061_v39 = vsel %vm5168_vm11, %v1628_v19, %v7034_v27  ;;  %9169 = vst [vmem:[#allocation113_spill] sm:$0xff] %v7070_v28  ;;  %v7079_v19 = vrot.slane %v6939_v20, 7  ;;  %v7084_v44 = vsel %vm1827_vm15, %v1340_v49, %v6984_v47  ;;  %v9170_v11 = vrot.slane %v9008_v36, 7 }
 0x207   : > { %9168 = vst [vmem:[#allocation80_spill] sm:$0xff] %v7061_v39  ;;  %v9171_v6 = vrot.slane %v9006_v32, 7  ;;  %v7097_v9 = vsel %vm5168_vm11, %v1610_v52, %v7012_v63  ;;  %vm8646_vm14 = vcmp.gt.f32.partialorder %v7056_v14, %v7050_v54  ;;  %vm8642_vm2 = vcmp.gt.f32.partialorder %v7061_v39, %v7070_v28 }
 0x208   : > { %v1368_v23 = vcombine.low %v1065_v1, %v1066_v46  ;;  %v7108_v49 = vsel %vm8650_vm0, %v7016_v53, %v7031_v50  ;;  %v7120_v52 = vsel %vm5168_vm11, %v1559_v58, %v6698_v21  ;;  %v7132_v50 = vsel %vm8642_vm2, %v7061_v39, %v7070_v28  ;;  %v3274_v53 = vpop.trf.xlu1 }
 0x209   : > { %v7092_v29 = vsel %vm1827_vm15, %v9171_v6, %v9170_v11  ;;  %v7115_v6 = vsel %vm8646_vm14, %v7056_v14, %v7050_v54  ;;  %v1369_v11 = vcombine.high %v1065_v1, %v1066_v46  ;;  %9174 = vst [vmem:[#allocation115_spill] sm:$0xff] %v7120_v52  ;;  %9175 = vst [vmem:[#allocation75_spill] sm:$0xff] %v7132_v50  ;;  %v1568_v54 = vrot.slane %v6809_v37, 2 }
 0x20a   : > { %9172 = vst [vmem:[#allocation114_spill] sm:$0xff] %v7092_v29  ;;  %9173 = vst [vmem:[#allocation71_spill] sm:$0xff] %v7115_v6  ;;  %v7125_v29 = vsel %vm5168_vm11, %v1625_v61, %v7027_v3  ;;  %v7139_v58 = vrot.slane %v1368_v23, %v9096_v56  ;;  %v1565_v61 = vrot.slane %v6761_v57, 2  ;;  %v7147_v14 = vrot.slane %v6960_v51, 7 }
 0x20b   : > { %v7142_v21 = vrot.slane %v1369_v11, %v9096_v56  ;;  %vm8659_vm15 = vcmp.gt.f32.partialorder %v6726_v34, %v6761_v57  ;;  %vm8658_vm2 = vcmp.gt.f32.partialorder %v6715_v18, %v6809_v37  ;;  %v7158_v56 = vsel %vm1810_vm4, %v6662_v62, %v6668_v33 }
 0x20c   : > { %9176 = vst [vmem:[#allocation24_spill] sm:$0xff] %v7139_v58  ;;  %9178 = vst [vmem:[#allocation81_spill] sm:$0xff] %v7147_v14  ;;  %v7162_v23 = vcombine.high %v7139_v58, %v7139_v58  ;;  %v7167_v46 = vrot.slane %v7139_v58, 7  ;;  %v7175_v28 = vsel %vm5168_vm11, %v1565_v61, %v6809_v37  ;;  %v7180_v39 = vsel %vm5168_vm11, %v1568_v54, %v7147_v14 }
 0x20d   : > { %9177 = vst [vmem:[#allocation14_spill] sm:$0xff] %v7142_v21  ;;  %9179 = vst [vmem:[#allocation84_spill] sm:$0xff] %v7158_v56  ;;  %v1448_v11 = vcombine.high %v7142_v21, %v7142_v21  ;;  %v7170_v1 = vrot.slane %v7142_v21, 7  ;;  %v1571_v3 = vrot.slane %v7147_v14, 2  ;;  %vm8695_vm14 = vcmp.gt.f32.partialorder %v6960_v51, %v7147_v14 }
 0x20e   : > { %9180 = vst [vmem:[#allocation2_spill] sm:$0xff] %v7162_v23  ;;  %9182 = vst [vmem:[#allocation120_spill] sm:$0xff] %v7175_v28  ;;  %v7186_v32 = vrot.slane %v7162_v23, 7  ;;  %vm8655_vm0 = vcmp.gt.f32.partialorder %v7139_v58, %v7167_v46  ;;  %v7197_v54 = vsel %vm8659_vm15, %v6726_v34, %v6761_v57  ;;  %v7216_v33 = vsel %vm8658_vm2, %v6715_v18, %v6809_v37  ;;  %v3275_v37 = vpop.trf.xlu1 }
 0x20f   : > { %9181 = vst [vmem:[#allocation30_spill] sm:$0xff] %v7170_v1  ;;  %9183 = vst [vmem:[#allocation82_spill] sm:$0xff] %v7180_v39  ;;  %v7188_v36 = vrot.slane %v1448_v11, 7  ;;  %v7204_v61 = vsel %vm8655_vm0, %v7139_v58, %v7167_v46  ;;  %v7209_v11 = vsel %vm5168_vm11, %v1571_v3, %v9187_v40  ;;  %v7223_v57 = vsel %vm8695_vm14, %v6960_v51, %v7147_v14  ;;  %v3242_v58 = vpop.trf.xlu0 }
 0x210   : > { %9184 = vst [vmem:[#allocation85_spill] sm:$0xff] %v7186_v32  ;;  %9185 = vst [vmem:[#allocation8_spill] sm:$0xff] %v7197_v54  ;;  %vm8690_vm0 = vcmp.gt.f32.partialorder %v7120_v52, %v7158_v56  ;;  %vm8668_vm3 = vcmp.gt.f32.partialorder %v7175_v28, %v7197_v54  ;;  %vm8688_vm1 = vcmp.gt.f32.partialorder %v7180_v39, %v7216_v33 }
 0x211   : > { %9186 = vst [vmem:[#allocation83_spill] sm:$0xff] %v7204_v61  ;;  %9188 = vst [vmem:[#allocation87_spill] sm:$0xff] %v7209_v11  ;;  %vm8687_vm2 = vcmp.gt.f32.partialorder %v7209_v11, %v7223_v57  ;;  %vm8691_vm15 = vcmp.gt.f32.partialorder %v6853_v45, %v6892_v7  ;;  %v2316_v40 = vsel %vm8694_vm13, %v6732_v10, %v6722_v24 }
 0x212   : > { %9189 = vst [vmem:[#allocation92_spill] sm:$0xff] %v7216_v33  ;;  %9190 = vst [vmem:[#allocation95_spill] sm:$0xff] %v7223_v57  ;;  %v2318_v3 = vsel %vm8690_vm0, %v7120_v52, %v7158_v56  ;;  %v2319_v14 = vsel %vm8689_vm9, %v6806_v26, %v6816_v8  ;;  %v2320_v51 = vsel %vm8668_vm3, %v7175_v28, %v7197_v54  ;;  %v9191_v26 = vld [vmem:[#allocation99_spill] sm:$0xff]  ;;  %vm9196_vm0 = vcmask 1047559  }
 0x213   : > { %v2321_v24 = vsel %vm8688_vm1, %v7180_v39, %v7216_v33  ;;  %v2322_v56 = vsel %vm8687_vm2, %v7209_v11, %v7223_v57  ;;  %v2865_v8 = vrot.slane %v2316_v40, %v4989_v12  ;;  %v2873_v52 = vrot.slane %v9191_v26, %v4989_v12  ;;  %v3243_v10 = vpop.trf.xlu0  ;;  %v9192_v11 = vld [vmem:[#allocation63_spill] sm:$0xff] }
 0x214   : > { %vm8702_vm3 = vcmp.gt.f32.partialorder %v6950_v60, %v6899_v55  ;;  %v2881_v54 = vrot.slane %v2318_v3, %v4989_v12  ;;  %v2889_v33 = vrot.slane %v2319_v14, %v4989_v12  ;;  %v2897_v39 = vrot.slane %v2320_v51, %v4989_v12 }
 0x215   : > { %v2905_v28 = vrot.slane %v2321_v24, %v4989_v12  ;;  %v2913_v57 = vrot.slane %v2322_v56, %v4989_v12  ;;  %v9193_v18 = vrot.slane %v9192_v11, %v4989_v12  ;;  %v2861_v62 = vrot.slane %v2316_v40, %v4922_v43 }
 0x216   : > { %v2869_v6 = vrot.slane %v9191_v26, %v4922_v43  ;;  %v2877_v61 = vrot.slane %v2318_v3, %v4922_v43  ;;  %v2885_v21 = vrot.slane %v2319_v14, %v4922_v43  ;;  %v2893_v23 = vrot.slane %v2320_v51, %v4922_v43 }
 0x217   : > { %v3163_v34 = vsel %vm3098_vm5, %v2865_v8, %v9193_v18  ;;  %v3276_v18 = vpop.trf.xlu1  ;;  %v2909_v8 = vrot.slane %v2322_v56, %v4922_v43  ;;  %v9194_v51 = vrot.slane %v9192_v11, %v4922_v43  ;;  %vm4086_vm2 = vcmask 252928  }
 0x218   : > { %v3164_v50 = vsel %vm1449_vm6, %v2873_v52, %v3163_v34  ;;  %v2901_v34 = vrot.slane %v2321_v24, %v4922_v43  ;;  %v1583_v3 = vrot.slane %v6757_v17, 2  ;;  %4103 = vst.msk [vmem:[%s7292_s23 + $0x80] sm:$0xff] %vm4086_vm2, %v3274_v53  ;;  %4087 = vst.msk [vmem:[%s7292_s23] sm:$0xff] %vm4086_vm2, %v3242_v58  ;;  %v1589_v56 = vrot.slane %v6889_v4, 2 }
 0x219   : > { %v3165_v26 = vsel %vm3101_vm10, %v2881_v54, %v3164_v50  ;;  %v3156_v14 = vsel %vm3098_vm5, %v2861_v62, %v9194_v51  ;;  %v3244_v50 = vpop.trf.xlu0  ;;  %v1592_v62 = vrot.slane %v6892_v7, 2  ;;  %4104 = vst.msk [vmem:[%s7292_s23 + $0x88] sm:$0xff] %vm4086_vm2, %v3275_v37  ;;  %4088 = vst.msk [vmem:[%s7292_s23 + $0x8] sm:$0xff] %vm4086_vm2, %v3243_v10  ;;  %vm9195_vm1 = vcmask 1047559  }
 0x21a   : > { %v3166_v52 = vsel %vm1451_vm7, %v2889_v33, %v3165_v26  ;;  %v3157_v40 = vsel %vm1449_vm6, %v2869_v6, %v3156_v14  ;;  %4105 = vst.msk [vmem:[%s7292_s23 + $0x90] sm:$0xff] %vm4086_vm2, %v3276_v18  ;;  %4089 = vst.msk [vmem:[%s7292_s23 + $0x10] sm:$0xff] %vm4086_vm2, %v3244_v50  ;;  %v7325_v53 = vsel %vm5168_vm11, %v1583_v3, %v6867_v31  ;;  %v7328_v6 = vrot.slane %v6882_v48, 7 }
 0x21b   : > { %v3167_v54 = vsel %vm3104_vm12, %v2897_v39, %v3166_v52  ;;  %v3158_v24 = vsel %vm3101_vm10, %v2877_v61, %v3157_v40  ;;  %v3277_v58 = vpop.trf.xlu1  ;;  %vm8692_vm9 = vcmp.gt.f32.partialorder %v6871_v16, %v6889_v4  ;;  %v7363_v18 = vsel %vm8691_vm15, %v6853_v45, %v6892_v7 }
 0x21c   : > { %v3168_v33 = vsel %vm1453_vm8, %v2905_v28, %v3167_v54  ;;  %v3159_v39 = vsel %vm1451_vm7, %v2885_v21, %v3158_v24  ;;  %v7335_v28 = vsel %vm5168_vm11, %v1589_v56, %v6892_v7  ;;  %4106 = vst.msk [vmem:[%s7292_s23 + $0x98] sm:$0xff] %vm4086_vm2, %v3277_v58  ;;  %v7345_v21 = vsel %vm5168_vm11, %v1592_v62, %v7328_v6 }
 0x21d   : > { %v3169_v10 = vsel %vm9195_vm1, %v2913_v57, %v3168_v33  ;;  %v3160_v37 = vsel %vm3104_vm12, %v2893_v23, %v3159_v39  ;;  %v1595_v57 = vrot.slane %v7328_v6, 2  ;;  %vm8693_vm1 = vcmp.gt.f32.partialorder %v6882_v48, %v7328_v6  ;;  %v3245_v23 = vpop.trf.xlu0  ;;  %9197 = vst [vmem:[#allocation88_spill] sm:$0xff] %v7363_v18  ;;  %v9200_v39 = vld [vmem:[#allocation105_spill] sm:$0xff] }
 0x21e   : > { %3322 = vxpose.xlu1.b32.start [1/4] (short) %v3169_v10, 128  ;;  %v3161_v31 = vsel %vm1453_vm8, %v2901_v34, %v3160_v37  ;;  %v7356_v11 = vsel %vm8692_vm9, %v6871_v16, %v6889_v4  ;;  %v7370_v26 = vsel %vm8693_vm1, %v6882_v48, %v7328_v6  ;;  %4090 = vst.msk [vmem:[%s7292_s23 + $0x18] sm:$0xff] %vm4086_vm2, %v3245_v23 }
 0x21f   : > { %v3162_v61 = vsel %vm9196_vm0, %v2909_v8, %v3161_v31  ;;  %9198 = vst [vmem:[#allocation96_spill] sm:$0xff] %v7370_v26  ;;  %vm8704_vm0 = vcmp.gt.f32.partialorder %v6939_v20, %v7079_v19  ;;  %v7379_v34 = vsel %vm5168_vm11, %v1595_v57, %v6896_v15  ;;  %vm8705_vm15 = vcmp.gt.f32.partialorder %v7325_v53, %v6838_v0  ;;  %v3278_v8 = vpop.trf.xlu1 }
 0x220   : > { %3290 = vxpose.xlu0.b32.start [1/4] (short) %v3162_v61, 128  ;;  %9199 = vst [vmem:[#allocation117_spill] sm:$0xff] %v7379_v34  ;;  %vm8701_vm9 = vcmp.gt.f32.partialorder %v7335_v28, %v7356_v11  ;;  %vm8700_vm1 = vcmp.gt.f32.partialorder %v7345_v21, %v7363_v18  ;;  %vm8699_vm13 = vcmp.gt.f32.partialorder %v7379_v34, %v7370_v26  ;;  %4107 = vst.msk [vmem:[%s7292_s23 + $0xa0] sm:$0xff] %vm4086_vm2, %v3278_v8  ;;  %v9202_v61 = vld [vmem:[#allocation109_spill] sm:$0xff] }
 0x221   : > { %v2326_v15 = vsel %vm8705_vm15, %v7325_v53, %v6838_v0  ;;  %v2327_v51 = vsel %vm8702_vm3, %v6950_v60, %v6899_v55  ;;  %v2328_v14 = vsel %vm8701_vm9, %v7335_v28, %v7356_v11  ;;  %vm2273_vm14 = vcmp.gt.f32.partialorder %v7097_v9, %v7084_v44  ;;  %v3246_v54 = vpop.trf.xlu0 }
 0x222   : > { %v2329_v52 = vsel %vm8700_vm1, %v7345_v21, %v7363_v18  ;;  %v2330_v40 = vsel %vm8699_vm13, %v7379_v34, %v7370_v26  ;;  %v2929_v3 = vrot.slane %v6850_v42, %v4989_v12  ;;  %v2945_v50 = vrot.slane %v2326_v15, %v4989_v12  ;;  %4091 = vst.msk [vmem:[%s7292_s23 + $0x20] sm:$0xff] %vm4086_vm2, %v3246_v54 }
 0x223   : > { %v2953_v24 = vrot.slane %v2327_v51, %v4989_v12  ;;  %v2961_v56 = vrot.slane %v2328_v14, %v4989_v12  ;;  %v2969_v62 = vrot.slane %v2329_v52, %v4989_v12  ;;  %v2977_v33 = vrot.slane %v2330_v40, %v4989_v12  ;;  %v3279_v23 = vpop.trf.xlu1 }
 0x224   : > { %v9201_v58 = vrot.slane %v9200_v39, %v4989_v12  ;;  %v2925_v37 = vrot.slane %v6850_v42, %v4922_v43  ;;  %v2941_v31 = vrot.slane %v2326_v15, %v4922_v43  ;;  %v2949_v57 = vrot.slane %v2327_v51, %v4922_v43  ;;  %4108 = vst.msk [vmem:[%s7292_s23 + $0xa8] sm:$0xff] %vm4086_vm2, %v3279_v23 }
 0x225   : > { %v9203_v8 = vrot.slane %v9202_v61, %v4989_v12  ;;  %v2957_v54 = vrot.slane %v2328_v14, %v4922_v43  ;;  %v2965_v34 = vrot.slane %v2329_v52, %v4922_v43  ;;  %v9204_v15 = vrot.slane %v9200_v39, %v4922_v43 }
 0x226   : > { %v3177_v10 = vsel %vm3098_vm5, %v2929_v3, %v9201_v58  ;;  %v2973_v3 = vrot.slane %v2330_v40, %v4922_v43  ;;  %v1607_v58 = vrot.slane %v6909_v2, 2  ;;  %v1613_v18 = vrot.slane %v7012_v63, 2 }
 0x227   : > { %v3178_v26 = vsel %vm1449_vm6, %v9203_v8, %v3177_v10  ;;  %v3170_v51 = vsel %vm3098_vm5, %v2925_v37, %v9204_v15  ;;  %v3247_v10 = vpop.trf.xlu0  ;;  %v9205_v52 = vrot.slane %v9202_v61, %v4922_v43  ;;  %v3280_v61 = vpop.trf.xlu1  ;;  %vm9206_vm13 = vcmask 1047559  }
 0x228   : > { %v3179_v42 = vsel %vm3101_vm10, %v2945_v50, %v3178_v26  ;;  %v1616_v26 = vrot.slane %v7079_v19, 2  ;;  %v7458_v50 = vrot.slane %v6982_v38, 7  ;;  %4092 = vst.msk [vmem:[%s7292_s23 + $0x28] sm:$0xff] %vm4086_vm2, %v3247_v10  ;;  %v7472_v23 = vsel %vm5168_vm11, %v1613_v18, %v7079_v19  ;;  %4109 = vst.msk [vmem:[%s7292_s23 + $0xb0] sm:$0xff] %vm4086_vm2, %v3280_v61 }
 0x229   : > { %v3180_v14 = vsel %vm1451_vm7, %v2953_v24, %v3179_v42  ;;  %v3171_v40 = vsel %vm1449_vm6, %v9205_v52, %v3170_v51  ;;  %v7467_v24 = vsel %vm5168_vm11, %v1607_v58, %v6984_v47  ;;  %vm8703_vm1 = vcmp.gt.f32.partialorder %v6966_v35, %v7012_v63 }
 0x22a   : > { %v3181_v39 = vsel %vm3104_vm12, %v2961_v56, %v3180_v14  ;;  %v3172_v37 = vsel %vm3101_vm10, %v2941_v31, %v3171_v40  ;;  %v7479_v56 = vsel %vm5168_vm11, %v1616_v26, %v7458_v50  ;;  %v1619_v31 = vrot.slane %v7458_v50, 2 }
 0x22b   : > { %v3182_v8 = vsel %vm1453_vm8, %v2969_v62, %v3181_v39  ;;  %v3173_v42 = vsel %vm1451_vm7, %v2949_v57, %v3172_v37  ;;  %vm8706_vm9 = vcmp.gt.f32.partialorder %v6982_v38, %v7458_v50  ;;  %v3248_v62 = vpop.trf.xlu0  ;;  %vm9209_vm3 = vcmask 1047559   ;;  %v3281_v58 = vpop.trf.xlu1 }
 0x22c   : > { %v3183_v47 = vsel %vm9206_vm13, %v2977_v33, %v3182_v8  ;;  %v3174_v18 = vsel %vm3104_vm12, %v2957_v54, %v3173_v42  ;;  %v7494_v15 = vsel %vm5168_vm11, %v1619_v31, %v7024_v25  ;;  %v7501_v33 = vsel %vm8703_vm1, %v6966_v35, %v7012_v63  ;;  %4093 = vst.msk [vmem:[%s7292_s23 + $0x30] sm:$0xff] %vm4086_vm2, %v3248_v62 }
 0x22d   : > { %3323 = vxpose.xlu1.b32.cont [2/4] (short) %v3183_v47, 128  ;;  %v3175_v57 = vsel %vm1453_vm8, %v2965_v34, %v3174_v18  ;;  %9207 = vst [vmem:[#allocation122_spill] sm:$0xff] %v7494_v15  ;;  %v7508_v54 = vsel %vm8704_vm0, %v6939_v20, %v7079_v19  ;;  %vm8714_vm13 = vcmp.gt.f32.partialorder %v7020_v30, %v7034_v27  ;;  %4110 = vst.msk [vmem:[%s7292_s23 + $0xb8] sm:$0xff] %vm4086_vm2, %v3281_v58 }
 0x22e   : > { %9208 = vst [vmem:[#allocation76_spill] sm:$0xff] %v7508_v54  ;;  %v3176_v34 = vsel %vm9209_vm3, %v2973_v3, %v3175_v57  ;;  %v7520_v51 = vsel %vm8706_vm9, %v6982_v38, %v7458_v50  ;;  %vm2272_vm1 = vcmp.gt.f32.partialorder %v7467_v24, %v6973_v13  ;;  %vm8713_vm0 = vcmp.gt.f32.partialorder %v7472_v23, %v7501_v33 }
 0x22f   : > { %9210 = vst [vmem:[#allocation116_spill] sm:$0xff] %v7520_v51  ;;  %3291 = vxpose.xlu0.b32.cont [2/4] (short) %v3176_v34, 128  ;;  %vm8712_vm15 = vcmp.gt.f32.partialorder %v7479_v56, %v7508_v54  ;;  %vm8711_vm3 = vcmp.gt.f32.partialorder %v7494_v15, %v7520_v51  ;;  %v2334_v3 = vsel %vm2272_vm1, %v7467_v24, %v6973_v13  ;;  %v3249_v39 = vpop.trf.xlu0  ;;  %v3282_v34 = vpop.trf.xlu1 }
 0x230   : > { %v2335_v10 = vsel %vm2273_vm14, %v7097_v9, %v7084_v44  ;;  %vm2278_vm9 = vcmp.gt.f32.partialorder %v7125_v29, %v7108_v49  ;;  %v2336_v14 = vsel %vm8713_vm0, %v7472_v23, %v7501_v33  ;;  %v2337_v52 = vsel %vm8712_vm15, %v7479_v56, %v7508_v54  ;;  %4094 = vst.msk [vmem:[%s7292_s23 + $0x38] sm:$0xff] %vm4086_vm2, %v3249_v39 }
 0x231   : > { %v2338_v40 = vsel %vm8711_vm3, %v7494_v15, %v7520_v51  ;;  %v2993_v26 = vrot.slane %v6991_v59, %v4989_v12  ;;  %v3009_v37 = vrot.slane %v2334_v3, %v4989_v12  ;;  %v3017_v61 = vrot.slane %v2335_v10, %v4989_v12  ;;  %4111 = vst.msk [vmem:[%s7292_s23 + $0xc0] sm:$0xff] %vm4086_vm2, %v3282_v34 }
 0x232   : > { %v3025_v8 = vrot.slane %v2336_v14, %v4989_v12  ;;  %v3033_v42 = vrot.slane %v2337_v52, %v4989_v12  ;;  %v3041_v31 = vrot.slane %v2338_v40, %v4989_v12  ;;  %v9211_v47 = vrot.slane %v6962_v41, %v4989_v12 }
 0x233   : > { %v2989_v62 = vrot.slane %v6991_v59, %v4922_v43  ;;  %v3005_v57 = vrot.slane %v2334_v3, %v4922_v43  ;;  %v9212_v58 = vrot.slane %v6964_v5, %v4989_v12  ;;  %v3013_v39 = vrot.slane %v2335_v10, %v4922_v43 }
 0x234   : > { %v3191_v18 = vsel %vm3098_vm5, %v2993_v26, %v9211_v47  ;;  %v3021_v51 = vrot.slane %v2336_v14, %v4922_v43  ;;  %v3029_v15 = vrot.slane %v2337_v52, %v4922_v43  ;;  %v3037_v59 = vrot.slane %v2338_v40, %v4922_v43  ;;  %v9350_v44 = vld [vmem:[#allocation122_spill] sm:$0xff] }
 0x235   : > { %v3192_v25 = vsel %vm1449_vm6, %v9212_v58, %v3191_v18  ;;  %v9213_v3 = vrot.slane %v6962_v41, %v4922_v43  ;;  %v1631_v54 = vrot.slane %v7034_v27, 2  ;;  %v3250_v18 = vpop.trf.xlu0  ;;  %v9214_v14 = vrot.slane %v6964_v5, %v4922_v43  ;;  %v3283_v5 = vpop.trf.xlu1 }
 0x236   : > { %v3193_v26 = vsel %vm3101_vm10, %v3009_v37, %v3192_v25  ;;  %v1634_v25 = vrot.slane %v7167_v46, 2  ;;  %v1637_v40 = vrot.slane %v7186_v32, 2  ;;  %4095 = vst.msk [vmem:[%s7292_s23 + $0x40] sm:$0xff] %vm4086_vm2, %v3250_v18  ;;  %4112 = vst.msk [vmem:[%s7292_s23 + $0xc8] sm:$0xff] %vm4086_vm2, %v3283_v5  ;;  %vm9218_vm3 = vcmask 1047559   ;;  %v9221_v18 = vld [vmem:[#allocation14_spill] sm:$0xff] }
 0x237   : > { %v3184_v47 = vsel %vm3098_vm5, %v2989_v62, %v9213_v3  ;;  %v3194_v10 = vsel %vm1451_vm7, %v3017_v61, %v3193_v26  ;;  %v7605_v62 = vsel %vm5168_vm11, %v1631_v54, %v7167_v46  ;;  %v1640_v61 = vrot.slane %v7170_v1, 2  ;;  %v9351_v9 = vld [vmem:[#allocation116_spill] sm:$0xff] }
 0x238   : > { %v3185_v52 = vsel %vm1449_vm6, %v9214_v14, %v3184_v47  ;;  %v3195_v41 = vsel %vm3104_vm12, %v3025_v8, %v3194_v10  ;;  %9215 = vst [vmem:[#allocation118_spill] sm:$0xff] %v7605_v62  ;;  %v7613_v26 = vsel %vm5168_vm11, %v1634_v25, %v7186_v32  ;;  %v7618_v8 = vsel %vm5168_vm11, %v1637_v40, %v7170_v1 }
 0x239   : > { %v3186_v37 = vsel %vm3101_vm10, %v3005_v57, %v3185_v52  ;;  %v3196_v34 = vsel %vm1453_vm8, %v3033_v42, %v3195_v41  ;;  %9216 = vst [vmem:[#allocation123_spill] sm:$0xff] %v7613_v26  ;;  %9217 = vst [vmem:[#allocation119_spill] sm:$0xff] %v7618_v8  ;;  %v7627_v42 = vsel %vm5168_vm11, %v1640_v61, %v7188_v36  ;;  %v3251_v3 = vpop.trf.xlu0  ;;  %v3284_v10 = vpop.trf.xlu1  ;;  %v9227_v61 = vld [vmem:[#allocation75_spill] sm:$0xff] }
 0x23a   : > { %v3187_v58 = vsel %vm1451_vm7, %v3013_v39, %v3186_v37  ;;  %v3197_v54 = vsel %vm9218_vm3, %v3041_v31, %v3196_v34  ;;  %9219 = vst [vmem:[#allocation124_spill] sm:$0xff] %v7627_v42  ;;  %v9220_v39 = vld [vmem:[#allocation2_spill] sm:$0xff]  ;;  %vm8730_vm0 = vcmp.gt.f32.partialorder %v9221_v18, %v7170_v1  ;;  %4096 = vst.msk [vmem:[%s7292_s23 + $0x48] sm:$0xff] %vm4086_vm2, %v3251_v3  ;;  %v9226_v31 = vld [vmem:[#allocation83_spill] sm:$0xff] }
 0x23b   : > { %v3188_v57 = vsel %vm3104_vm12, %v3021_v51, %v3187_v58  ;;  %vm8715_vm15 = vcmp.gt.f32.partialorder %v9220_v39, %v7186_v32  ;;  %3324 = vxpose.xlu1.b32.cont [3/4] (short) %v3197_v54, 128  ;;  %v7639_v51 = vsel %vm8714_vm13, %v7020_v30, %v7034_v27  ;;  %vm9224_vm11 = vmmov %vm9218_vm3  ;;  %vm8731_vm13 = vcmp.gt.f32.partialorder %v7613_v26, %v9226_v31  ;;  %v9228_v3 = vld [vmem:[#allocation71_spill] sm:$0xff] }
 0x23c   : > { %v3189_v47 = vsel %vm1453_vm8, %v3029_v15, %v3188_v57  ;;  %9222 = vst [vmem:[#allocation9_spill] sm:$0xff] %v7639_v51  ;;  %v7646_v36 = vsel %vm8715_vm15, %v9220_v39, %v7186_v32  ;;  %v7656_v15 = vsel %vm8730_vm0, %v9221_v18, %v7170_v1  ;;  %vm2280_vm3 = vcmp.gt.f32.partialorder %v7605_v62, %v7639_v51  ;;  %v9242_v32 = vld [vmem:[#allocation33_spill] sm:$0xff] }
 0x23d   : > { %9223 = vst [vmem:[#allocation89_spill] sm:$0xff] %v7646_v36  ;;  %v3190_v22 = vsel %vm9224_vm11, %v3037_v59, %v3189_v47  ;;  %9225 = vst [vmem:[#allocation97_spill] sm:$0xff] %v7656_v15  ;;  %vm8729_vm15 = vcmp.gt.f32.partialorder %v7618_v8, %v7646_v36  ;;  %vm8723_vm11 = vcmp.gt.f32.partialorder %v7627_v42, %v7656_v15  ;;  %v3252_v37 = vpop.trf.xlu0  ;;  %v9243_v39 = vrot.slane %v9242_v32, 7 }
 0x23e   : > { %3292 = vxpose.xlu0.b32.cont [3/4] (short) %v3190_v22, 128  ;;  %v2340_v59 = vsel %vm2278_vm9, %v7125_v29, %v7108_v49  ;;  %v2342_v14 = vsel %vm2280_vm3, %v7605_v62, %v7639_v51  ;;  %4113 = vst.msk [vmem:[%s7292_s23 + $0xd0] sm:$0xff] %vm4086_vm2, %v3284_v10  ;;  %v2343_v52 = vsel %vm8731_vm13, %v7613_v26, %v9226_v31  ;;  %4097 = vst.msk [vmem:[%s7292_s23 + $0x50] sm:$0xff] %vm4086_vm2, %v3252_v37  ;;  %v9244_v51 = vld [vmem:[#allocation58_spill] sm:$0xff] }
 0x23f   : > { %v2344_v25 = vsel %vm8729_vm15, %v7618_v8, %v7646_v36  ;;  %v2345_v40 = vsel %vm8723_vm11, %v7627_v42, %v7656_v15  ;;  %v3057_v41 = vrot.slane %v2340_v59, %v4989_v12  ;;  %v3065_v5 = vrot.slane %v9227_v61, %v4989_v12  ;;  %v3285_v42 = vpop.trf.xlu1  ;;  %v9245_v62 = vld [vmem:[#allocation106_spill] sm:$0xff] }
 0x240   : > { %v3073_v34 = vrot.slane %v2342_v14, %v4989_v12  ;;  %v3081_v58 = vrot.slane %v2343_v52, %v4989_v12  ;;  %v3089_v54 = vrot.slane %v2344_v25, %v4989_v12  ;;  %v3097_v57 = vrot.slane %v2345_v40, %v4989_v12  ;;  %4114 = vst.msk [vmem:[%s7292_s23 + $0xd8] sm:$0xff] %vm4086_vm2, %v3285_v42 }
 0x241   : > { %v9229_v47 = vrot.slane %v9228_v3, %v4989_v12  ;;  %v3053_v10 = vrot.slane %v2340_v59, %v4922_v43  ;;  %v3061_v15 = vrot.slane %v9227_v61, %v4922_v43  ;;  %v3069_v8 = vrot.slane %v2342_v14, %v4922_v43  ;;  %v9251_v14 = vld [vmem:[#allocation11_spill] sm:$0xff] }
 0x242   : > { %v3077_v37 = vrot.slane %v2343_v52, %v4922_v43  ;;  %v3085_v1 = vrot.slane %v2344_v25, %v4922_v43  ;;  %v9230_v59 = vrot.slane %v9228_v3, %v4922_v43  ;;  %v9238_v3 = vld [vmem:[#allocation94_spill] sm:$0xff]  ;;  %vm9246_vm15 = vcmp.gt.f32.partialorder %v9244_v51, %v9245_v62  ;;  %v9256_v51 = vld [vmem:[#allocation115_spill] sm:$0xff] }
 0x243   : > { %v3204_v22 = vsel %vm3098_vm5, %v3057_v41, %v9229_v47  ;;  %v3093_v41 = vrot.slane %v2345_v40, %v4922_v43  ;;  %v3253_v47 = vpop.trf.xlu0  ;;  %v9236_v40 = vld [vmem:[#allocation31_spill] sm:$0xff] }
 0x244   : > { %v3205_v36 = vsel %vm1449_vm6, %v3065_v5, %v3204_v22  ;;  %v3198_v61 = vsel %vm3098_vm5, %v3053_v10, %v9230_v59  ;;  %v9231_v5 = vld [vmem:[#allocation7_spill] sm:$0xff]  ;;  %v9232_v22 = vld [vmem:[#allocation4_spill] sm:$0xff]  ;;  %4098 = vst.msk [vmem:[%s7292_s23 + $0x58] sm:$0xff] %vm4086_vm2, %v3253_v47  ;;  %v9240_v10 = vld [vmem:[#allocation37_spill] sm:$0xff] }
 0x245   : > { %v3206_v18 = vsel %vm3101_vm10, %v3073_v34, %v3205_v36  ;;  %v2194_v52 = vsel %vm1810_vm4, %v9232_v22, %v9231_v5  ;;  %v3199_v42 = vsel %vm1449_vm6, %v3061_v15, %v3198_v61  ;;  %v9235_v36 = vld [vmem:[#allocation34_spill] sm:$0xff]  ;;  %v9241_v59 = vrot.slane %v9240_v10, 7  ;;  %v9248_v47 = vld [vmem:[#allocation81_spill] sm:$0xff]  ;;  %v9250_v22 = vld [vmem:[#allocation91_spill] sm:$0xff] }
 0x246   : > { %v3207_v25 = vsel %vm1451_vm7, %v3081_v58, %v3206_v18  ;;  %v9237_v34 = vld [vmem:[#allocation90_spill] sm:$0xff]  ;;  %v3200_v15 = vsel %vm3101_vm10, %v3069_v8, %v3199_v42  ;;  %v3286_v58 = vpop.trf.xlu1  ;;  %v9259_v42 = vld [vmem:[#allocation108_spill] sm:$0xff] }
 0x247   : > { %vm9239_vm11 = vcmp.gt.f32.partialorder %v9237_v34, %v9238_v3  ;;  %v2197_v31 = vsel %vm9246_vm15, %v9243_v39, %v9241_v59  ;;  %v3208_v18 = vsel %vm3104_vm12, %v3089_v54, %v3207_v25  ;;  %v9247_v61 = vld [vmem:[#allocation70_spill] sm:$0xff]  ;;  %v3201_v39 = vsel %vm1451_vm7, %v3077_v37, %v3200_v15  ;;  %4115 = vst.msk [vmem:[%s7292_s23 + $0xe0] sm:$0xff] %vm4086_vm2, %v3286_v58  ;;  %v9257_v54 = vld [vmem:[#allocation84_spill] sm:$0xff]  ;;  %v9260_v3 = vld [vmem:[#allocation39_spill] sm:$0xff] }
 0x248   : > { %v2196_v26 = vsel %vm9239_vm11, %v9236_v40, %v9235_v36  ;;  %vm9249_vm4 = vcmp.gt.f32.partialorder %v9247_v61, %v9248_v47  ;;  %v9252_v36 = vld [vmem:[#allocation98_spill] sm:$0xff]  ;;  %v9253_v40 = vld [vmem:[#allocation61_spill] sm:$0xff]  ;;  %v3209_v62 = vsel %vm1453_vm8, %v3097_v57, %v3208_v18  ;;  %vm9258_vm15 = vcmp.gt.f32.partialorder %v9256_v51, %v9257_v54  ;;  %v9263_v59 = vld [vmem:[#allocation104_spill] sm:$0xff]  ;;  %v3254_v57 = vpop.trf.xlu0 }
 0x249   : > { %v2198_v5 = vsel %vm9249_vm4, %v9242_v32, %v9240_v10  ;;  %vm9254_vm11 = vcmp.gt.f32.partialorder %v9252_v36, %v9253_v40  ;;  %v9255_v8 = vld [vmem:[#allocation38_spill] sm:$0xff]  ;;  %v9261_v32 = vrot.slane %v9260_v3, 7  ;;  %v9262_v10 = vld [vmem:[#allocation72_spill] sm:$0xff]  ;;  %3325 = vxpose.xlu1.b32.end [4/4] (short) %v3209_v62, 128  ;;  %v3202_v47 = vsel %vm3104_vm12, %v3085_v1, %v3201_v39  ;;  %v9268_v58 = vld [vmem:[#allocation41_spill] sm:$0xff]  ;;  %4099 = vst.msk [vmem:[%s7292_s23 + $0x60] sm:$0xff] %vm4086_vm2, %v3254_v57 }
 0x24a   : > { %v2510_v34 = vsel %vm9254_vm11, %v9251_v14, %v9250_v22  ;;  %v2512_v25 = vsel %vm9258_vm15, %v9255_v8, %v2194_v52  ;;  %vm9264_vm4 = vcmp.gt.f32.partialorder %v9262_v10, %v9263_v59  ;;  %v9265_v37 = vld [vmem:[#allocation120_spill] sm:$0xff]  ;;  %v9269_v22 = vrot.slane %v9268_v58, 7  ;;  %v9270_v52 = vld [vmem:[#allocation82_spill] sm:$0xff]  ;;  %v9273_v40 = vld [vmem:[#allocation87_spill] sm:$0xff]  ;;  %v3287_v54 = vpop.trf.xlu1 }
 0x24b   : > { %v2513_v61 = vsel %vm9264_vm4, %v9261_v32, %v9259_v42  ;;  %v9266_v18 = vld [vmem:[#allocation8_spill] sm:$0xff]  ;;  %v9274_v8 = vld [vmem:[#allocation95_spill] sm:$0xff]  ;;  %v3203_v1 = vsel %vm1453_vm8, %v3093_v41, %v3202_v47  ;;  %v3617_v39 = vrot.slane %v2510_v34, %v4989_v12  ;;  %v3633_v51 = vrot.slane %v2512_v25, %v4989_v12  ;;  %4116 = vst.msk [vmem:[%s7292_s23 + $0xe8] sm:$0xff] %vm4086_vm2, %v3287_v54  ;;  %v9276_v41 = vld [vmem:[#allocation62_spill] sm:$0xff] }
 0x24c   : > { %vm9267_vm11 = vcmp.gt.f32.partialorder %v9265_v37, %v9266_v18  ;;  %v9271_v14 = vld [vmem:[#allocation92_spill] sm:$0xff]  ;;  %vm9275_vm4 = vcmp.gt.f32.partialorder %v9273_v40, %v9274_v8  ;;  %3293 = vxpose.xlu0.b32.end [4/4] (short) %v3203_v1, 128  ;;  %v9277_v32 = vrot.slane %v9276_v41, %v4989_v12  ;;  %v3629_v59 = vrot.slane %v2512_v25, %v4922_v43  ;;  %v3255_v37 = vpop.trf.xlu0  ;;  %v9282_v8 = vld [vmem:[#allocation17_spill] sm:$0xff]  ;;  %v9287_v54 = vld [vmem:[#allocation42_spill] sm:$0xff] }
 0x24d   : > { %v2514_v15 = vsel %vm9267_vm11, %v9260_v3, %v2196_v26  ;;  %vm9272_vm15 = vcmp.gt.f32.partialorder %v9270_v52, %v9271_v14  ;;  %v2516_v62 = vsel %vm9275_vm4, %v9268_v58, %v2198_v5  ;;  %v3641_v26 = vrot.slane %v2513_v61, %v4989_v12  ;;  %v9278_v18 = vld [vmem:[#allocation60_spill] sm:$0xff]  ;;  %4100 = vst.msk [vmem:[%s7292_s23 + $0x68] sm:$0xff] %vm4086_vm2, %v3255_v37  ;;  %v9283_v1 = vld [vmem:[#allocation13_spill] sm:$0xff] }
 0x24e   : > { %v2515_v36 = vsel %vm9272_vm15, %v9269_v22, %v2197_v31  ;;  %v3649_v31 = vrot.slane %v2514_v15, %v4989_v12  ;;  %v3665_v3 = vrot.slane %v2516_v62, %v4989_v12  ;;  %v3613_v5 = vrot.slane %v2510_v34, %v4922_v43 }
 0x24f   : > { %v3657_v42 = vrot.slane %v2515_v36, %v4989_v12  ;;  %v3911_v10 = vsel %vm3098_vm5, %v3617_v39, %v9277_v32  ;;  %v3637_v47 = vrot.slane %v2513_v61, %v4922_v43  ;;  %v3645_v57 = vrot.slane %v2514_v15, %v4922_v43  ;;  %v9284_v39 = vld [vmem:[#allocation93_spill] sm:$0xff] }
 0x250   : > { %v9279_v58 = vrot.slane %v9278_v18, %v4989_v12  ;;  %v3653_v22 = vrot.slane %v2515_v36, %v4922_v43  ;;  %v3661_v52 = vrot.slane %v2516_v62, %v4922_v43  ;;  %v9280_v14 = vrot.slane %v9276_v41, %v4922_v43  ;;  %v9286_v62 = vld [vmem:[#allocation44_spill] sm:$0xff]  ;;  %v3288_v41 = vpop.trf.xlu1 }
 0x251   : > { %v9281_v15 = vrot.slane %v9278_v18, %v4922_v43  ;;  %vm9285_vm11 = vcmp.gt.f32.partialorder %v9284_v39, %v6757_v17  ;;  %vm9288_vm15 = vcmp.gt.f32.partialorder %v6871_v16, %v6889_v4  ;;  %v9291_v18 = vld [vmem:[#allocation43_spill] sm:$0xff]  ;;  %vm9293_vm4 = vcmp.gt.f32.partialorder %v6853_v45, %v6892_v7  ;;  %4117 = vst.msk [vmem:[%s7292_s23 + $0xf0] sm:$0xff] %vm4086_vm2, %v3288_v41  ;;  %v9310_v39 = vld [vmem:[#allocation88_spill] sm:$0xff] }
 0x252   : > { %v3912_v34 = vsel %vm1449_vm6, %v9279_v58, %v3911_v10  ;;  %v3904_v25 = vsel %vm3098_vm5, %v3613_v5, %v9280_v14  ;;  %v2202_v36 = vsel %vm9285_vm11, %v9283_v1, %v9282_v8  ;;  %v2204_v5 = vsel %vm9288_vm15, %v9287_v54, %v9286_v62  ;;  %v9289_v10 = vld [vmem:[#allocation45_spill] sm:$0xff]  ;;  %v9297_v14 = vld [vmem:[#allocation102_spill] sm:$0xff]  ;;  %v9300_v45 = vld [vmem:[#allocation19_spill] sm:$0xff] }
 0x253   : > { %v3913_v61 = vsel %vm3101_vm10, %v3633_v51, %v3912_v34  ;;  %v3905_v40 = vsel %vm1449_vm6, %v9281_v15, %v3904_v25  ;;  %v9290_v37 = vrot.slane %v9289_v10, 7  ;;  %v9292_v58 = vrot.slane %v9291_v18, 7  ;;  %v9296_v34 = vld [vmem:[#allocation18_spill] sm:$0xff]  ;;  %v9298_v25 = vld [vmem:[#allocation101_spill] sm:$0xff] }
 0x254   : > { %v3914_v51 = vsel %vm1451_vm7, %v3641_v26, %v3913_v61  ;;  %v3906_v32 = vsel %vm3101_vm10, %v3629_v59, %v3905_v40  ;;  %vm9294_vm11 = vcmp.gt.f32.partialorder %v6882_v48, %v7328_v6  ;;  %v9295_v59 = vld [vmem:[#allocation107_spill] sm:$0xff]  ;;  %vm9299_vm15 = vcmp.gt.f32.partialorder %v9297_v14, %v9298_v25  ;;  %v3256_v48 = vpop.trf.xlu0  ;;  %v9303_v40 = vld [vmem:[#allocation48_spill] sm:$0xff] }
 0x255   : > { %v2205_v17 = vsel %vm9293_vm4, %v9292_v58, %v9290_v37  ;;  %v2206_v16 = vsel %vm9294_vm11, %v9291_v18, %v9289_v10  ;;  %v3915_v4 = vsel %vm3104_vm12, %v3649_v31, %v3914_v51  ;;  %v3907_v26 = vsel %vm1451_vm7, %v3637_v47, %v3906_v32  ;;  %v9302_v31 = vld [vmem:[#allocation112_spill] sm:$0xff]  ;;  %4101 = vst.msk [vmem:[%s7292_s23 + $0x70] sm:$0xff] %vm4086_vm2, %v3256_v48  ;;  %v9316_v32 = vld [vmem:[#allocation103_spill] sm:$0xff] }
 0x256   : > { %v2518_v61 = vsel %vm9299_vm15, %v9296_v34, %v9295_v59  ;;  %vm9301_vm4 = vcmp.gt.f32.partialorder %v7325_v53, %v6838_v0  ;;  %v3916_v6 = vsel %vm1453_vm8, %v3657_v42, %v3915_v4  ;;  %v3908_v15 = vsel %vm3104_vm12, %v3645_v57, %v3907_v26  ;;  %v9308_v42 = vld [vmem:[#allocation49_spill] sm:$0xff] }
 0x257   : > { %v2520_v7 = vsel %vm9301_vm4, %v9300_v45, %v2202_v36  ;;  %v9304_v47 = vrot.slane %v9303_v40, 7  ;;  %vm9305_vm11 = vcmp.gt.f32.partialorder %v6950_v60, %v6899_v55  ;;  %vm9306_vm15 = vcmp.gt.f32.partialorder %v7335_v28, %v7356_v11  ;;  %v9312_v55 = vld [vmem:[#allocation117_spill] sm:$0xff]  ;;  %v9313_v60 = vld [vmem:[#allocation96_spill] sm:$0xff]  ;;  %v3289_v11 = vpop.trf.xlu1 }
 0x258   : > { %v2522_v1 = vsel %vm9306_vm15, %v9303_v40, %v2204_v5  ;;  %vm9307_vm4 = vcmask 1047559   ;;  %v3909_v53 = vsel %vm1453_vm8, %v3653_v22, %v3908_v15  ;;  %v9309_v57 = vrot.slane %v9308_v42, 7  ;;  %4118 = vst.msk [vmem:[%s7292_s23 + $0xf8] sm:$0xff] %vm4086_vm2, %v3289_v11  ;;  %v9323_v15 = vld [vmem:[#allocation21_spill] sm:$0xff] }
 0x259   : > { %v2521_v8 = vsel %vm9305_vm11, %v9304_v47, %v9302_v31  ;;  %v7870_v0 = vsel %vm9307_vm4, %v3665_v3, %v3916_v6  ;;  %vm9311_vm0 = vcmp.gt.f32.partialorder %v7345_v21, %v9310_v39  ;;  %vm9314_vm11 = vcmp.gt.f32.partialorder %v9312_v55, %v9313_v60  ;;  %vm9315_vm13 = vmmov %vm9307_vm4  ;;  %v9322_v6 = vld [vmem:[#allocation23_spill] sm:$0xff]  ;;  %v9324_v31 = vld [vmem:[#allocation110_spill] sm:$0xff] }
 0x25a   : > { %v2523_v36 = vsel %vm9311_vm0, %v9309_v57, %v2205_v17  ;;  %v2524_v62 = vsel %vm9314_vm11, %v9308_v42, %v2206_v16  ;;  %v7883_v28 = vsel %vm9315_vm13, %v3661_v52, %v3909_v53  ;;  %v3681_v3 = vrot.slane %v2518_v61, %v4989_v12  ;;  %v3257_v52 = vpop.trf.xlu0  ;;  %v9318_v16 = vld [vmem:[#allocation54_spill] sm:$0xff]  ;;  %v9326_v47 = vld [vmem:[#allocation55_spill] sm:$0xff]  ;;  %v9335_v11 = vld [vmem:[#allocation73_spill] sm:$0xff] }
 0x25b   : > { %v3697_v22 = vrot.slane %v2520_v7, %v4989_v12  ;;  %v3705_v54 = vrot.slane %v2521_v8, %v4989_v12  ;;  %v3713_v21 = vrot.slane %v2522_v1, %v4989_v12  ;;  %v3721_v5 = vrot.slane %v2523_v36, %v4989_v12  ;;  %4102 = vst.msk [vmem:[%s7292_s23 + $0x78] sm:$0xff] %vm4086_vm2, %v3257_v52  ;;  %v4006_v48 = vpop.trf.xlu1  ;;  %v9329_v57 = vld [vmem:[#allocation46_spill] sm:$0xff] }
 0x25c   : > { %v3729_v41 = vrot.slane %v2524_v62, %v4989_v12  ;;  %v3677_v51 = vrot.slane %v2518_v61, %v4922_v43  ;;  %v9317_v10 = vrot.slane %v9316_v32, %v4989_v12  ;;  %v3693_v18 = vrot.slane %v2520_v7, %v4922_v43  ;;  %4167 = vst.msk [vmem:[%s7906_s26 + $0x80] sm:$0xff] %vm4086_vm2, %v4006_v48  ;;  %v9340_v52 = vld [vmem:[#allocation26_spill] sm:$0xff] }
 0x25d   : > { %v3701_v58 = vrot.slane %v2521_v8, %v4922_v43  ;;  %v3709_v17 = vrot.slane %v2522_v1, %v4922_v43  ;;  %v9319_v4 = vrot.slane %v9318_v16, %v4989_v12  ;;  %v3717_v59 = vrot.slane %v2523_v36, %v4922_v43  ;;  %v9327_v8 = vld [vmem:[#allocation52_spill] sm:$0xff]  ;;  %v9331_v36 = vld [vmem:[#allocation53_spill] sm:$0xff] }
 0x25e   : > { %v3925_v37 = vsel %vm3098_vm5, %v3681_v3, %v9317_v10  ;;  %v3725_v34 = vrot.slane %v2524_v62, %v4922_v43  ;;  %v9320_v14 = vrot.slane %v9316_v32, %v4922_v43  ;;  %v9321_v45 = vrot.slane %v9318_v16, %v4922_v43  ;;  %v3974_v62 = vpop.trf.xlu0  ;;  %v9336_v3 = vld [vmem:[#allocation25_spill] sm:$0xff] }
 0x25f   : > { %v3926_v26 = vsel %vm1449_vm6, %v9319_v4, %v3925_v37  ;;  %vm9325_vm0 = vcmp.gt.f32.partialorder %v9324_v31, %v6909_v2  ;;  %vm9328_vm13 = vcmp.gt.f32.partialorder %v6966_v35, %v7012_v63  ;;  %v9330_v39 = vrot.slane %v9329_v57, 7  ;;  %4151 = vst.msk [vmem:[%s7906_s26] sm:$0xff] %vm4086_vm2, %v3974_v62  ;;  %v9346_v37 = vld [vmem:[#allocation51_spill] sm:$0xff]  ;;  %v4007_v4 = vpop.trf.xlu1 }
 0x260   : > { %v3918_v25 = vsel %vm3098_vm5, %v3677_v51, %v9320_v14  ;;  %v3927_v61 = vsel %vm3101_vm10, %v3697_v22, %v3926_v26  ;;  %v2210_v40 = vsel %vm9325_vm0, %v9323_v15, %v9322_v6  ;;  %v2212_v1 = vsel %vm9328_vm13, %v9327_v8, %v9326_v47  ;;  %v9337_v22 = vld [vmem:[#allocation111_spill] sm:$0xff]  ;;  %4168 = vst.msk [vmem:[%s7906_s26 + $0x88] sm:$0xff] %vm4086_vm2, %v4007_v4 }
 0x261   : > { %v3919_v7 = vsel %vm1449_vm6, %v9321_v45, %v3918_v25  ;;  %v3928_v53 = vsel %vm1451_vm7, %v3705_v54, %v3927_v61  ;;  %v9332_v55 = vrot.slane %v9331_v36, 7  ;;  %vm9333_vm15 = vcmp.gt.f32.partialorder %v6939_v20, %v7079_v19  ;;  %v9338_v54 = vld [vmem:[#allocation65_spill] sm:$0xff]  ;;  %v9355_v45 = vld [vmem:[#allocation22_spill] sm:$0xff] }
 0x262   : > { %v3920_v42 = vsel %vm3101_vm10, %v3693_v18, %v3919_v7  ;;  %vm9334_vm4 = vcmp.gt.f32.partialorder %v6982_v38, %v7458_v50  ;;  %v3929_v63 = vsel %vm3104_vm12, %v3713_v21, %v3928_v53  ;;  %vm9339_vm11 = vcmp.gt.f32.partialorder %v9337_v22, %v9338_v54  ;;  %v9341_v50 = vld [vmem:[#allocation114_spill] sm:$0xff]  ;;  %v3975_v25 = vpop.trf.xlu0 }
 0x263   : > { %v2213_v2 = vsel %vm9333_vm15, %v9332_v55, %v9330_v39  ;;  %v2214_v35 = vsel %vm9334_vm4, %v9331_v36, %v9329_v57  ;;  %v3921_v60 = vsel %vm1451_vm7, %v3701_v58, %v3920_v42  ;;  %v2526_v51 = vsel %vm9339_vm11, %v9336_v3, %v9335_v11  ;;  %v9342_v21 = vld [vmem:[#allocation50_spill] sm:$0xff]  ;;  %v9348_v58 = vld [vmem:[#allocation76_spill] sm:$0xff]  ;;  %4152 = vst.msk [vmem:[%s7906_s26 + $0x8] sm:$0xff] %vm4086_vm2, %v3975_v25  ;;  %v4008_v53 = vpop.trf.xlu1 }
 0x264   : > { %v2528_v20 = vsel %vm2272_vm1, %v9340_v52, %v2210_v40  ;;  %v3930_v38 = vsel %vm1453_vm8, %v3721_v5, %v3929_v63  ;;  %v3922_v19 = vsel %vm3104_vm12, %v3709_v17, %v3921_v60  ;;  %v9343_v32 = vrot.slane %v9342_v21, 7  ;;  %4169 = vst.msk [vmem:[%s7906_s26 + $0x90] sm:$0xff] %vm4086_vm2, %v4008_v53 }
 0x265   : > { %vm9344_vm0 = vcmp.gt.f32.partialorder %v7472_v23, %v7501_v33  ;;  %vm9345_vm13 = vcmask 1047559   ;;  %v3923_v5 = vsel %vm1453_vm8, %v3717_v59, %v3922_v19  ;;  %v9347_v18 = vrot.slane %v9346_v37, 7  ;;  %v9353_v23 = vld [vmem:[#allocation20_spill] sm:$0xff] }
 0x266   : > { %v2529_v10 = vsel %vm2273_vm14, %v9343_v32, %v9341_v50  ;;  %v2530_v13 = vsel %vm9344_vm0, %v9342_v21, %v2212_v1  ;;  %v7977_v24 = vsel %vm9345_vm13, %v3729_v41, %v3930_v38  ;;  %vm9349_vm1 = vcmp.gt.f32.partialorder %v7479_v56, %v9348_v58  ;;  %vm9354_vm15 = vmmov %vm9345_vm13  ;;  %v3976_v63 = vpop.trf.xlu0  ;;  %v9361_v21 = vld [vmem:[#allocation35_spill] sm:$0xff]  ;;  %v9368_v58 = vld [vmem:[#allocation28_spill] sm:$0xff] }
 0x267   : > { %v2531_v17 = vsel %vm9349_vm1, %v9347_v18, %v2213_v2  ;;  %vm9352_vm14 = vcmp.gt.f32.partialorder %v9350_v44, %v9351_v9  ;;  %v3749_v33 = vrot.slane %v9353_v23, %v4922_v43  ;;  %v7992_v41 = vsel %vm9354_vm15, %v3725_v34, %v3923_v5  ;;  %4153 = vst.msk [vmem:[%s7906_s26 + $0x10] sm:$0xff] %vm4086_vm2, %v3976_v63  ;;  %v4009_v22 = vpop.trf.xlu1  ;;  %vm9359_vm4 = vmmov %vm9345_vm13  ;;  %v9365_v5 = vld [vmem:[#allocation74_spill] sm:$0xff] }
 0x268   : > { %v2532_v16 = vsel %vm9352_vm14, %v9346_v37, %v2214_v35  ;;  %v3745_v26 = vrot.slane %v2526_v51, %v4989_v12  ;;  %v3761_v59 = vrot.slane %v2528_v20, %v4989_v12  ;;  %v3769_v56 = vrot.slane %v2529_v10, %v4989_v12  ;;  %4170 = vst.msk [vmem:[%s7906_s26 + $0x98] sm:$0xff] %vm4086_vm2, %v4009_v22  ;;  %vm9360_vm11 = vmmov %vm9359_vm4  ;;  %v9366_v37 = vld [vmem:[#allocation6_spill] sm:$0xff] }
 0x269   : > { %v3741_v14 = vrot.slane %v2526_v51, %v4922_v43  ;;  %v3777_v61 = vrot.slane %v2530_v13, %v4989_v12  ;;  %v9356_v7 = vrot.slane %v9355_v45, %v4989_v12  ;;  %v3757_v48 = vrot.slane %v2528_v20, %v4922_v43 }
 0x26a   : > { %v3765_v6 = vrot.slane %v2529_v10, %v4922_v43  ;;  %v3785_v15 = vrot.slane %v2531_v17, %v4989_v12  ;;  %v9357_v31 = vrot.slane %v9353_v23, %v4989_v12  ;;  %v3773_v47 = vrot.slane %v2530_v13, %v4922_v43  ;;  %v3977_v20 = vpop.trf.xlu0  ;;  %v9363_v10 = vld [vmem:[#allocation29_spill] sm:$0xff]  ;;  %v9373_v23 = vld [vmem:[#allocation32_spill] sm:$0xff] }
 0x26b   : > { %v3939_v34 = vsel %vm3098_vm5, %v3745_v26, %v9356_v7  ;;  %v9358_v8 = vrot.slane %v9355_v45, %v4922_v43  ;;  %v3793_v42 = vrot.slane %v2532_v16, %v4989_v12  ;;  %v3781_v39 = vrot.slane %v2531_v17, %v4922_v43  ;;  %4154 = vst.msk [vmem:[%s7906_s26 + $0x18] sm:$0xff] %vm4086_vm2, %v3977_v20  ;;  %v4010_v38 = vpop.trf.xlu1  ;;  %v9369_v17 = vld [vmem:[#allocation16_spill] sm:$0xff]  ;;  %v9375_v26 = vld [vmem:[#allocation67_spill] sm:$0xff]  ;;  %v9381_v45 = vld [vmem:[#allocation78_spill] sm:$0xff] }
 0x26c   : > { %v3940_v40 = vsel %vm1449_vm6, %v9357_v31, %v3939_v34  ;;  %v3789_v2 = vrot.slane %v2532_v16, %v4922_v43  ;;  %4171 = vst.msk [vmem:[%s7906_s26 + $0xa0] sm:$0xff] %vm4086_vm2, %v4010_v38  ;;  %v9362_v32 = vrot.slane %v9361_v21, 7  ;;  %v9364_v13 = vrot.slane %v9363_v10, 7  ;;  %v9371_v16 = vld [vmem:[#allocation36_spill] sm:$0xff]  ;;  %v9398_v20 = vld [vmem:[#allocation85_spill] sm:$0xff] }
 0x26d   : > { %v3932_v1 = vsel %vm3098_vm5, %v3741_v14, %v9358_v8  ;;  %v3941_v57 = vsel %vm3101_vm10, %v3761_v59, %v3940_v40  ;;  %vm9367_vm0 = vcmp.gt.f32.partialorder %v9365_v5, %v9366_v37  ;;  %vm9370_vm13 = vcmp.gt.f32.partialorder %v9368_v58, %v9369_v17  ;;  %v9376_v59 = vld [vmem:[#allocation27_spill] sm:$0xff]  ;;  %v9378_v14 = vld [vmem:[#allocation40_spill] sm:$0xff]  ;;  %v9384_v40 = vld [vmem:[#allocation66_spill] sm:$0xff] }
 0x26e   : > { %v3933_v36 = vsel %vm1449_vm6, %v3749_v33, %v3932_v1  ;;  %v3942_v55 = vsel %vm1451_vm7, %v3769_v56, %v3941_v57  ;;  %v3978_v19 = vpop.trf.xlu0  ;;  %v2215_v18 = vsel %vm9367_vm0, %v9364_v13, %v9362_v32  ;;  %v2216_v44 = vsel %vm9370_vm13, %v9363_v10, %v9361_v21  ;;  %v9386_v8 = vld [vmem:[#allocation80_spill] sm:$0xff]  ;;  %v9387_v1 = vld [vmem:[#allocation113_spill] sm:$0xff]  ;;  %v9402_v21 = vld [vmem:[#allocation123_spill] sm:$0xff] }
 0x26f   : > { %v3934_v35 = vsel %vm3101_vm10, %v3757_v48, %v3933_v36  ;;  %v3943_v60 = vsel %vm3104_vm12, %v3777_v61, %v3942_v55  ;;  %4155 = vst.msk [vmem:[%s7906_s26 + $0x20] sm:$0xff] %vm4086_vm2, %v3978_v19  ;;  %v4011_v50 = vpop.trf.xlu1  ;;  %v9372_v4 = vrot.slane %v9371_v16, 7  ;;  %v9374_v33 = vrot.slane %v9373_v23, 7  ;;  %v9380_v61 = vld [vmem:[#allocation77_spill] sm:$0xff]  ;;  %v9393_v55 = vld [vmem:[#allocation24_spill] sm:$0xff]  ;;  %v9403_v32 = vld [vmem:[#allocation83_spill] sm:$0xff] }
 0x270   : > { %v3935_v62 = vsel %vm1451_vm7, %v3765_v6, %v3934_v35  ;;  %v3944_v11 = vsel %vm1453_vm8, %v3785_v15, %v3943_v60  ;;  %4172 = vst.msk [vmem:[%s7906_s26 + $0xa8] sm:$0xff] %vm4086_vm2, %v4011_v50  ;;  %vm9377_vm1 = vcmp.gt.f32.partialorder %v9375_v26, %v9376_v59  ;;  %v9379_v25 = vrot.slane %v9378_v14, 7  ;;  %v9400_v19 = vld [vmem:[#allocation64_spill] sm:$0xff]  ;;  %v9405_v17 = vld [vmem:[#allocation59_spill] sm:$0xff] }
 0x271   : > { %v3936_v3 = vsel %vm3104_vm12, %v3773_v47, %v3935_v62  ;;  %v8035_v54 = vsel %vm9359_vm4, %v3793_v42, %v3944_v11  ;;  %v2217_v56 = vsel %vm9377_vm1, %v9374_v33, %v9372_v4  ;;  %vm9382_vm14 = vcmp.gt.f32.partialorder %v9380_v61, %v9381_v45  ;;  %v9411_v33 = vld [vmem:[#allocation89_spill] sm:$0xff] }
 0x272   : > { %v3937_v51 = vsel %vm1453_vm8, %v3781_v39, %v3936_v3  ;;  %v3979_v9 = vpop.trf.xlu0  ;;  %v2533_v7 = vsel %vm9382_vm14, %v9379_v25, %v2215_v18  ;;  %v2534_v34 = vsel %vm2278_vm9, %v9378_v14, %v2216_v44  ;;  %vm9383_vm15 = vcmp.gt.f32.partialorder %v7020_v30, %v7034_v27  ;;  %v9389_v27 = vld [vmem:[#allocation57_spill] sm:$0xff]  ;;  %v9391_v39 = vld [vmem:[#allocation56_spill] sm:$0xff] }
 0x273   : > { %v8041_v52 = vsel %vm9360_vm11, %v3789_v2, %v3937_v51  ;;  %4156 = vst.msk [vmem:[%s7906_s26 + $0x28] sm:$0xff] %vm4086_vm2, %v3979_v9  ;;  %v4012_v48 = vpop.trf.xlu1  ;;  %v3801_v15 = vrot.slane %v2533_v7, %v4989_v12  ;;  %v2218_v31 = vsel %vm9383_vm15, %v9373_v23, %v9371_v16  ;;  %v9385_v47 = vrot.slane %v9384_v40, 7  ;;  %v9406_v44 = vld [vmem:[#allocation68_spill] sm:$0xff]  ;;  %v9407_v9 = vld [vmem:[#allocation14_spill] sm:$0xff]  ;;  %v9410_v23 = vld [vmem:[#allocation119_spill] sm:$0xff] }
 0x274   : > { %4173 = vst.msk [vmem:[%s7906_s26 + $0xb0] sm:$0xff] %vm4086_vm2, %v4012_v48  ;;  %vm9388_vm4 = vcmp.gt.f32.partialorder %v9386_v8, %v9387_v1  ;;  %v3809_v49 = vrot.slane %v2534_v34, %v4989_v12  ;;  %v3797_v42 = vrot.slane %v2533_v7, %v4922_v43  ;;  %v3805_v57 = vrot.slane %v2534_v34, %v4922_v43  ;;  %v9408_v16 = vld [vmem:[#allocation30_spill] sm:$0xff]  ;;  %v9413_v45 = vld [vmem:[#allocation69_spill] sm:$0xff]  ;;  %v9414_v7 = vld [vmem:[#allocation124_spill] sm:$0xff] }
 0x275   : > { %v2535_v29 = vsel %vm9388_vm4, %v9385_v47, %v2217_v56  ;;  %v9390_v30 = vrot.slane %v9389_v27, 7  ;;  %v9392_v36 = vrot.slane %v9391_v39, 7  ;;  %vm9394_vm9 = vcmp.gt.f32.partialorder %v9393_v55, %v7167_v46  ;;  %v9397_v46 = vld [vmem:[#allocation2_spill] sm:$0xff]  ;;  %v9415_v34 = vld [vmem:[#allocation97_spill] sm:$0xff] }
 0x276   : > { %v3980_v6 = vpop.trf.xlu0  ;;  %v2536_v60 = vsel %vm2280_vm3, %v9384_v40, %v2218_v31  ;;  %v3817_v62 = vrot.slane %v2535_v29, %v4989_v12  ;;  %v3952_v3 = vsel %vm3098_vm5, %v3809_v49, %v3801_v15  ;;  %v3813_v22 = vrot.slane %v2535_v29, %v4922_v43 }
 0x277   : > { %4157 = vst.msk [vmem:[%s7906_s26 + $0x30] sm:$0xff] %vm4086_vm2, %v3980_v6  ;;  %v4013_v53 = vpop.trf.xlu1  ;;  %v2219_v2 = vsel %vm9394_vm9, %v9392_v36, %v9390_v30  ;;  %vm9399_vm11 = vcmp.gt.f32.partialorder %v9397_v46, %v9398_v20  ;;  %v9401_v50 = vrot.slane %v9400_v19, 7  ;;  %vm9404_vm3 = vcmp.gt.f32.partialorder %v9402_v21, %v9403_v32 }
 0x278   : > { %4174 = vst.msk [vmem:[%s7906_s26 + $0xb8] sm:$0xff] %vm4086_vm2, %v4013_v53  ;;  %v2220_v38 = vsel %vm9399_vm11, %v9391_v39, %v9389_v27  ;;  %v3825_v13 = vrot.slane %v2536_v60, %v4989_v12  ;;  %v3946_v5 = vsel %vm3098_vm5, %v3805_v57, %v3797_v42  ;;  %v3953_v37 = vsel %vm1449_vm6, %v3817_v62, %v3952_v3 }
 0x279   : > { %v2537_v10 = vsel %vm9404_vm3, %v9401_v50, %v2219_v2  ;;  %v3821_v58 = vrot.slane %v2536_v60, %v4922_v43  ;;  %vm9409_vm0 = vcmp.gt.f32.partialorder %v9407_v9, %v9408_v16  ;;  %vm9412_vm5 = vcmp.gt.f32.partialorder %v9410_v23, %v9411_v33 }
 0x27a   : > { %v3981_v11 = vpop.trf.xlu0  ;;  %4054 = vxpose.xlu1.b32.start [1/4] (short) %v7870_v0, 128  ;;  %v2221_v4 = vsel %vm9409_vm0, %v9406_v44, %v9405_v17  ;;  %v2538_v26 = vsel %vm9412_vm5, %v9400_v19, %v2220_v38  ;;  %v3833_v59 = vrot.slane %v2537_v10, %v4989_v12  ;;  %v3947_v0 = vsel %vm1449_vm6, %v3813_v22, %v3946_v5 }
 0x27b   : > { %4158 = vst.msk [vmem:[%s7906_s26 + $0x38] sm:$0xff] %vm4086_vm2, %v3981_v11  ;;  %v4014_v51 = vpop.trf.xlu1  ;;  %v3954_v14 = vsel %vm3101_vm10, %v3825_v13, %v3953_v37  ;;  %v3829_v25 = vrot.slane %v2537_v10, %v4922_v43  ;;  %vm9416_vm13 = vcmp.gt.f32.partialorder %v9414_v7, %v9415_v34  ;;  %v3841_v6 = vrot.slane %v2538_v26, %v4989_v12 }
 0x27c   : > { %4175 = vst.msk [vmem:[%s7906_s26 + $0xc0] sm:$0xff] %vm4086_vm2, %v4014_v51  ;;  %v2539_v48 = vsel %vm9416_vm13, %v9413_v45, %v2221_v4  ;;  %v3948_v15 = vsel %vm3101_vm10, %v3821_v58, %v3947_v0  ;;  %v3837_v40 = vrot.slane %v2538_v26, %v4922_v43 }
 0x27d   : > { %4022 = vxpose.xlu0.b32.start [1/4] (short) %v7883_v28, 128  ;;  %v3955_v28 = vsel %vm1451_vm7, %v3833_v59, %v3954_v14  ;;  %v3949_v47 = vsel %vm1451_vm7, %v3829_v25, %v3948_v15 }
 0x27e   : > { %v3982_v18 = vpop.trf.xlu0  ;;  %4055 = vxpose.xlu1.b32.cont [2/4] (short) %v7977_v24, 128  ;;  %v3849_v24 = vrot.slane %v2539_v48, %v4989_v12  ;;  %v3956_v1 = vsel %vm3104_vm12, %v3841_v6, %v3955_v28  ;;  %v3950_v12 = vsel %vm3104_vm12, %v3837_v40, %v3949_v47 }
 0x27f   : > { %4159 = vst.msk [vmem:[%s7906_s26 + $0x40] sm:$0xff] %vm4086_vm2, %v3982_v18  ;;  %v4015_v56 = vpop.trf.xlu1 }
 0x280   : > { %4176 = vst.msk [vmem:[%s7906_s26 + $0xc8] sm:$0xff] %vm4086_vm2, %v4015_v56  ;;  %v3957_v49 = vsel %vm1453_vm8, %v3849_v24, %v3956_v1 }
 0x281   : > { %4023 = vxpose.xlu0.b32.cont [2/4] (short) %v7992_v41, 128  ;;  %v3845_v41 = vrot.slane %v2539_v48, %v4922_v43 }
 0x282   : > { %v3983_v61 = vpop.trf.xlu0  ;;  %4056 = vxpose.xlu1.b32.cont [3/4] (short) %v8035_v54, 128 }
 0x283   : > { %4160 = vst.msk [vmem:[%s7906_s26 + $0x48] sm:$0xff] %vm4086_vm2, %v3983_v61  ;;  %v4016_v31 = vpop.trf.xlu1  ;;  %v3951_v43 = vsel %vm1453_vm8, %v3845_v41, %v3950_v12 }
 0x284   : > { %4177 = vst.msk [vmem:[%s7906_s26 + $0xd0] sm:$0xff] %vm4086_vm2, %v4016_v31 }
 0x285   : > { %4024 = vxpose.xlu0.b32.cont [3/4] (short) %v8041_v52, 128 }
 0x286   : > { %v3984_v8 = vpop.trf.xlu0  ;;  %4057 = vxpose.xlu1.b32.end [4/4] (short) %v3957_v49, 128 }
 0x287   : > { %4161 = vst.msk [vmem:[%s7906_s26 + $0x50] sm:$0xff] %vm4086_vm2, %v3984_v8  ;;  %v4017_v29 = vpop.trf.xlu1 }
 0x288   : > { %4178 = vst.msk [vmem:[%s7906_s26 + $0xd8] sm:$0xff] %vm4086_vm2, %v4017_v29 }
 0x289   : > { %4025 = vxpose.xlu0.b32.end [4/4] (short) %v3951_v43, 128 }
 0x28a   : > { %v3985_v54 = vpop.trf.xlu0 }
 0x28b   : > { %4162 = vst.msk [vmem:[%s7906_s26 + $0x58] sm:$0xff] %vm4086_vm2, %v3985_v54  ;;  %v4018_v53 = vpop.trf.xlu1 }
 0x28c   : > { %4179 = vst.msk [vmem:[%s7906_s26 + $0xe0] sm:$0xff] %vm4086_vm2, %v4018_v53 }
 0x28e   : > { %v3986_v52 = vpop.trf.xlu0 }
 0x28f   : > { %4163 = vst.msk [vmem:[%s7906_s26 + $0x60] sm:$0xff] %vm4086_vm2, %v3986_v52  ;;  %v4019_v42 = vpop.trf.xlu1 }
 0x290   : > { %4180 = vst.msk [vmem:[%s7906_s26 + $0xe8] sm:$0xff] %vm4086_vm2, %v4019_v42 }
 0x292   : > { %v3987_v57 = vpop.trf.xlu0 }
 0x293   : > { %4164 = vst.msk [vmem:[%s7906_s26 + $0x68] sm:$0xff] %vm4086_vm2, %v3987_v57  ;;  %v4020_v27 = vpop.trf.xlu1 }
 0x294   : > { %4181 = vst.msk [vmem:[%s7906_s26 + $0xf0] sm:$0xff] %vm4086_vm2, %v4020_v27 }
 0x296   : > { %v3988_v30 = vpop.trf.xlu0 }
 0x297   : > { %4165 = vst.msk [vmem:[%s7906_s26 + $0x70] sm:$0xff] %vm4086_vm2, %v3988_v30  ;;  %v4021_v39 = vpop.trf.xlu1 }
 0x298   : > { %4182 = vst.msk [vmem:[%s7906_s26 + $0xf8] sm:$0xff] %vm4086_vm2, %v4021_v39 }
 0x29a   : > { %v3989_v36 = vpop.trf.xlu0 }
 0x29b   : > { %4166 = vst.msk [vmem:[%s7906_s26 + $0x78] sm:$0xff] %vm4086_vm2, %v3989_v36 }
 0x2b9   : > { %v3338_v55 = vpop.trf.xlu1 }
 0x2ba   : > { %4135 = vst.msk [vmem:[%s7292_s23 + $0x180] sm:$0xff] %vm4086_vm2, %v3338_v55 }
 0x2bc   : > { %v3306_v2 = vpop.trf.xlu0 }
 0x2bd   : > { %4119 = vst.msk [vmem:[%s7292_s23 + $0x100] sm:$0xff] %vm4086_vm2, %v3306_v2  ;;  %v3339_v35 = vpop.trf.xlu1 }
 0x2be   : > { %4136 = vst.msk [vmem:[%s7292_s23 + $0x188] sm:$0xff] %vm4086_vm2, %v3339_v35 }
 0x2c0   : > { %v3307_v63 = vpop.trf.xlu0 }
 0x2c1   : > { %4120 = vst.msk [vmem:[%s7292_s23 + $0x108] sm:$0xff] %vm4086_vm2, %v3307_v63  ;;  %v3340_v60 = vpop.trf.xlu1 }
 0x2c2   : > { %4137 = vst.msk [vmem:[%s7292_s23 + $0x190] sm:$0xff] %vm4086_vm2, %v3340_v60 }
 0x2c4   : > { %v3308_v62 = vpop.trf.xlu0 }
 0x2c5   : > { %4121 = vst.msk [vmem:[%s7292_s23 + $0x110] sm:$0xff] %vm4086_vm2, %v3308_v62  ;;  %v3341_v11 = vpop.trf.xlu1 }
 0x2c6   : > { %4138 = vst.msk [vmem:[%s7292_s23 + $0x198] sm:$0xff] %vm4086_vm2, %v3341_v11 }
 0x2c8   : > { %v3309_v3 = vpop.trf.xlu0 }
 0x2c9   : > { %4122 = vst.msk [vmem:[%s7292_s23 + $0x118] sm:$0xff] %vm4086_vm2, %v3309_v3  ;;  %v3342_v22 = vpop.trf.xlu1 }
 0x2ca   : > { %4139 = vst.msk [vmem:[%s7292_s23 + $0x1a0] sm:$0xff] %vm4086_vm2, %v3342_v22 }
 0x2cc   : > { %v3310_v51 = vpop.trf.xlu0 }
 0x2cd   : > { %4123 = vst.msk [vmem:[%s7292_s23 + $0x120] sm:$0xff] %vm4086_vm2, %v3310_v51  ;;  %v3343_v46 = vpop.trf.xlu1 }
 0x2ce   : > { %4140 = vst.msk [vmem:[%s7292_s23 + $0x1a8] sm:$0xff] %vm4086_vm2, %v3343_v46 }
 0x2d0   : > { %v3311_v20 = vpop.trf.xlu0 }
 0x2d1   : > { %4124 = vst.msk [vmem:[%s7292_s23 + $0x128] sm:$0xff] %vm4086_vm2, %v3311_v20  ;;  %v3344_v38 = vpop.trf.xlu1 }
 0x2d2   : > { %4141 = vst.msk [vmem:[%s7292_s23 + $0x1b0] sm:$0xff] %vm4086_vm2, %v3344_v38 }
 0x2d4   : > { %v3312_v19 = vpop.trf.xlu0 }
 0x2d5   : > { %4125 = vst.msk [vmem:[%s7292_s23 + $0x130] sm:$0xff] %vm4086_vm2, %v3312_v19  ;;  %v3345_v50 = vpop.trf.xlu1 }
 0x2d6   : > { %4142 = vst.msk [vmem:[%s7292_s23 + $0x1b8] sm:$0xff] %vm4086_vm2, %v3345_v50 }
 0x2d8   : > { %v3313_v21 = vpop.trf.xlu0 }
 0x2d9   : > { %4126 = vst.msk [vmem:[%s7292_s23 + $0x138] sm:$0xff] %vm4086_vm2, %v3313_v21  ;;  %v3346_v32 = vpop.trf.xlu1 }
 0x2da   : > { %4143 = vst.msk [vmem:[%s7292_s23 + $0x1c0] sm:$0xff] %vm4086_vm2, %v3346_v32 }
 0x2dc   : > { %v3314_v10 = vpop.trf.xlu0 }
 0x2dd   : > { %4127 = vst.msk [vmem:[%s7292_s23 + $0x140] sm:$0xff] %vm4086_vm2, %v3314_v10  ;;  %v3347_v13 = vpop.trf.xlu1 }
 0x2de   : > { %4144 = vst.msk [vmem:[%s7292_s23 + $0x1c8] sm:$0xff] %vm4086_vm2, %v3347_v13 }
 0x2e0   : > { %v3315_v5 = vpop.trf.xlu0 }
 0x2e1   : > { %4128 = vst.msk [vmem:[%s7292_s23 + $0x148] sm:$0xff] %vm4086_vm2, %v3315_v5  ;;  %v3348_v37 = vpop.trf.xlu1 }
 0x2e2   : > { %4145 = vst.msk [vmem:[%s7292_s23 + $0x1d0] sm:$0xff] %vm4086_vm2, %v3348_v37 }
 0x2e4   : > { %v3316_v18 = vpop.trf.xlu0 }
 0x2e5   : > { %4129 = vst.msk [vmem:[%s7292_s23 + $0x150] sm:$0xff] %vm4086_vm2, %v3316_v18  ;;  %v3349_v58 = vpop.trf.xlu1 }
 0x2e6   : > { %4146 = vst.msk [vmem:[%s7292_s23 + $0x1d8] sm:$0xff] %vm4086_vm2, %v3349_v58 }
 0x2e8   : > { %v3317_v17 = vpop.trf.xlu0 }
 0x2e9   : > { %4130 = vst.msk [vmem:[%s7292_s23 + $0x158] sm:$0xff] %vm4086_vm2, %v3317_v17  ;;  %v3350_v44 = vpop.trf.xlu1 }
 0x2ea   : > { %4147 = vst.msk [vmem:[%s7292_s23 + $0x1e0] sm:$0xff] %vm4086_vm2, %v3350_v44 }
 0x2ec   : > { %v3318_v9 = vpop.trf.xlu0 }
 0x2ed   : > { %4131 = vst.msk [vmem:[%s7292_s23 + $0x160] sm:$0xff] %vm4086_vm2, %v3318_v9  ;;  %v3351_v16 = vpop.trf.xlu1 }
 0x2ee   : > { %4148 = vst.msk [vmem:[%s7292_s23 + $0x1e8] sm:$0xff] %vm4086_vm2, %v3351_v16 }
 0x2f0   : > { %v3319_v4 = vpop.trf.xlu0 }
 0x2f1   : > { %4132 = vst.msk [vmem:[%s7292_s23 + $0x168] sm:$0xff] %vm4086_vm2, %v3319_v4  ;;  %v3352_v23 = vpop.trf.xlu1 }
 0x2f2   : > { %4149 = vst.msk [vmem:[%s7292_s23 + $0x1f0] sm:$0xff] %vm4086_vm2, %v3352_v23 }
 0x2f4   : > { %v3320_v33 = vpop.trf.xlu0 }
 0x2f5   : > { %4133 = vst.msk [vmem:[%s7292_s23 + $0x170] sm:$0xff] %vm4086_vm2, %v3320_v33  ;;  %v3353_v26 = vpop.trf.xlu1 }
 0x2f6   : > { %4150 = vst.msk [vmem:[%s7292_s23 + $0x1f8] sm:$0xff] %vm4086_vm2, %v3353_v26 }
 0x2f8   : > { %v3321_v59 = vpop.trf.xlu0 }
 0x2f9   : > { %4134 = vst.msk [vmem:[%s7292_s23 + $0x178] sm:$0xff] %vm4086_vm2, %v3321_v59  ;;  %v4070_v0 = vpop.trf.xlu1 }
 0x2fa   : > { %4199 = vst.msk [vmem:[%s7906_s26 + $0x180] sm:$0xff] %vm4086_vm2, %v4070_v0 }
 0x2fc   : > { %v4038_v56 = vpop.trf.xlu0 }
 0x2fd   : > { %4183 = vst.msk [vmem:[%s7906_s26 + $0x100] sm:$0xff] %vm4086_vm2, %v4038_v56  ;;  %v4071_v14 = vpop.trf.xlu1 }
 0x2fe   : > { %4200 = vst.msk [vmem:[%s7906_s26 + $0x188] sm:$0xff] %vm4086_vm2, %v4071_v14 }
 0x300   : > { %v4039_v25 = vpop.trf.xlu0 }
 0x301   : > { %4184 = vst.msk [vmem:[%s7906_s26 + $0x108] sm:$0xff] %vm4086_vm2, %v4039_v25  ;;  %v4072_v61 = vpop.trf.xlu1 }
 0x302   : > { %4201 = vst.msk [vmem:[%s7906_s26 + $0x190] sm:$0xff] %vm4086_vm2, %v4072_v61 }
 0x304   : > { %v4040_v45 = vpop.trf.xlu0 }
 0x305   : > { %4185 = vst.msk [vmem:[%s7906_s26 + $0x110] sm:$0xff] %vm4086_vm2, %v4040_v45  ;;  %v4073_v7 = vpop.trf.xlu1 }
 0x306   : > { %4202 = vst.msk [vmem:[%s7906_s26 + $0x198] sm:$0xff] %vm4086_vm2, %v4073_v7 }
 0x308   : > { %v4041_v34 = vpop.trf.xlu0 }
 0x309   : > { %4186 = vst.msk [vmem:[%s7906_s26 + $0x118] sm:$0xff] %vm4086_vm2, %v4041_v34  ;;  %v4074_v48 = vpop.trf.xlu1 }
 0x30a   : > { %4203 = vst.msk [vmem:[%s7906_s26 + $0x1a0] sm:$0xff] %vm4086_vm2, %v4074_v48 }
 0x30c   : > { %v4042_v6 = vpop.trf.xlu0 }
 0x30d   : > { %4187 = vst.msk [vmem:[%s7906_s26 + $0x120] sm:$0xff] %vm4086_vm2, %v4042_v6  ;;  %v4075_v15 = vpop.trf.xlu1 }
 0x30e   : > { %4204 = vst.msk [vmem:[%s7906_s26 + $0x1a8] sm:$0xff] %vm4086_vm2, %v4075_v15 }
 0x310   : > { %v4043_v28 = vpop.trf.xlu0 }
 0x311   : > { %4188 = vst.msk [vmem:[%s7906_s26 + $0x128] sm:$0xff] %vm4086_vm2, %v4043_v28  ;;  %v4076_v31 = vpop.trf.xlu1 }
 0x312   : > { %4205 = vst.msk [vmem:[%s7906_s26 + $0x1b0] sm:$0xff] %vm4086_vm2, %v4076_v31 }
 0x314   : > { %v4044_v40 = vpop.trf.xlu0 }
 0x315   : > { %4189 = vst.msk [vmem:[%s7906_s26 + $0x130] sm:$0xff] %vm4086_vm2, %v4044_v40  ;;  %v4077_v24 = vpop.trf.xlu1 }
 0x316   : > { %4206 = vst.msk [vmem:[%s7906_s26 + $0x1b8] sm:$0xff] %vm4086_vm2, %v4077_v24 }
 0x318   : > { %v4045_v47 = vpop.trf.xlu0 }
 0x319   : > { %4190 = vst.msk [vmem:[%s7906_s26 + $0x138] sm:$0xff] %vm4086_vm2, %v4045_v47  ;;  %v4078_v8 = vpop.trf.xlu1 }
 0x31a   : > { %4207 = vst.msk [vmem:[%s7906_s26 + $0x1c0] sm:$0xff] %vm4086_vm2, %v4078_v8 }
 0x31c   : > { %v4046_v1 = vpop.trf.xlu0 }
 0x31d   : > { %4191 = vst.msk [vmem:[%s7906_s26 + $0x140] sm:$0xff] %vm4086_vm2, %v4046_v1  ;;  %v4079_v41 = vpop.trf.xlu1 }
 0x31e   : > { %4208 = vst.msk [vmem:[%s7906_s26 + $0x1c8] sm:$0xff] %vm4086_vm2, %v4079_v41 }
 0x320   : > { %v4047_v29 = vpop.trf.xlu0 }
 0x321   : > { %4192 = vst.msk [vmem:[%s7906_s26 + $0x148] sm:$0xff] %vm4086_vm2, %v4047_v29  ;;  %v4080_v12 = vpop.trf.xlu1 }
 0x322   : > { %4209 = vst.msk [vmem:[%s7906_s26 + $0x1d0] sm:$0xff] %vm4086_vm2, %v4080_v12 }
 0x324   : > { %v4048_v49 = vpop.trf.xlu0 }
 0x325   : > { %4193 = vst.msk [vmem:[%s7906_s26 + $0x150] sm:$0xff] %vm4086_vm2, %v4048_v49  ;;  %v4081_v54 = vpop.trf.xlu1 }
 0x326   : > { %4210 = vst.msk [vmem:[%s7906_s26 + $0x1d8] sm:$0xff] %vm4086_vm2, %v4081_v54 }
 0x328   : > { %v4049_v43 = vpop.trf.xlu0 }
 0x329   : > { %4194 = vst.msk [vmem:[%s7906_s26 + $0x158] sm:$0xff] %vm4086_vm2, %v4049_v43  ;;  %v4082_v53 = vpop.trf.xlu1 }
 0x32a   : > { %4211 = vst.msk [vmem:[%s7906_s26 + $0x1e0] sm:$0xff] %vm4086_vm2, %v4082_v53 }
 0x32c   : > { %v4050_v52 = vpop.trf.xlu0 }
 0x32d   : > { %4195 = vst.msk [vmem:[%s7906_s26 + $0x160] sm:$0xff] %vm4086_vm2, %v4050_v52  ;;  %v4083_v42 = vpop.trf.xlu1 }
 0x32e   : > { %4212 = vst.msk [vmem:[%s7906_s26 + $0x1e8] sm:$0xff] %vm4086_vm2, %v4083_v42 }
 0x330   : > { %v4051_v57 = vpop.trf.xlu0 }
 0x331   : > { %4196 = vst.msk [vmem:[%s7906_s26 + $0x168] sm:$0xff] %vm4086_vm2, %v4051_v57  ;;  %v4084_v27 = vpop.trf.xlu1 }
 0x332   : > { %4213 = vst.msk [vmem:[%s7906_s26 + $0x1f0] sm:$0xff] %vm4086_vm2, %v4084_v27 }
 0x334   : > { %v4052_v30 = vpop.trf.xlu0 }
 0x335   : > { %4197 = vst.msk [vmem:[%s7906_s26 + $0x170] sm:$0xff] %vm4086_vm2, %v4052_v30  ;;  %v4085_v39 = vpop.trf.xlu1 }
 0x336   : > { %4214 = vst.msk [vmem:[%s7906_s26 + $0x1f8] sm:$0xff] %vm4086_vm2, %v4085_v39 }
 0x338   : > { %v4053_v36 = vpop.trf.xlu0 }
 0x339   : > { %4198 = vst.msk [vmem:[%s7906_s26 + $0x178] sm:$0xff] %vm4086_vm2, %v4053_v36 }
 0x33a PF: > { %s17_s21 = sadd.s32 1, %s4525_s21  }
 0x33b   : > { %p14_p4 = scmp.ge.s32.totalorder %s17_s21, 6  }
 0x33d   :  { %16 = sbr.rel (!%p14_p4) target bundleno = 1 (0x1), region = 82 }

</bundles_post_ra>
